<compile_context>
chip_gen: v6e
topology: v6e:2x2x1
jax: 0.10.0
libtpu: 0.0.40
codegen_flags: <defaults>
</compile_context>

<pallas_src>
import math
import functools

import jax
import jax.numpy as jnp
from jax.experimental import pallas as pl
from jax.experimental.pallas import tpu as pltpu

F32 = jnp.float32
BF16 = jnp.bfloat16
LN_EPS = 1e-5
BN_EPS = 1e-5
NEG_INF = -1e30      # large negative instead of -inf: safe under dtype changes


def _round_up(x, m):
    return ((x + m - 1) // m) * m


# ----------------------------------------------------------------------------
# In-kernel helpers
# ----------------------------------------------------------------------------

def _sigmoid(v):
    # exact sigmoid (exp on EUP + true divide) for parity with torch
    return 1.0 / (1.0 + jnp.exp(-v))


def _layernorm(x, g, b):
    mu = jnp.mean(x, axis=-1, keepdims=True)
    xc = x - mu
    var = jnp.mean(xc * xc, axis=-1, keepdims=True)
    return xc * jax.lax.rsqrt(var + LN_EPS) * g + b


# ----------------------------------------------------------------------------
# Fused, tiled linear kernel
#   y = act( LN_n(...LN_1(x)) @ W + b );  y = GLU(y);  y = out_scale * y
#   out = residual + res_scale * y;       out = LN_post(out)
# Operands x/W arrive pre-cast to bf16; accumulation is f32 in VMEM scratch.
# ----------------------------------------------------------------------------

def _fused_linear_kernel(*refs, nk, act, glu, has_bias, n_ln, has_res,
                         has_post_ln, res_scale, out_scale):
    it = iter(refs)
    x_ref = next(it)
    w_ref = next(it)
    ln_refs = [(next(it), next(it)) for _ in range(n_ln)]
    b_ref = next(it) if has_bias else None
    res_ref = next(it) if has_res else None
    pln_refs = (next(it), next(it)) if has_post_ln else None
    o_ref = next(it)
    acc_ref = next(it)

    k = pl.program_id(2)

    @pl.when(k == 0)
    def _init():
        acc_ref[...] = jnp.zeros_like(acc_ref)

    xb = x_ref[...]                                   # bf16 tile
    if n_ln:
        xb = xb.astype(F32)
        for g_ref, bb_ref in ln_refs:                 # fused pre-LayerNorm(s)
            xb = _layernorm(xb, g_ref[...], bb_ref[...])
        xb = xb.astype(BF16)
    acc_ref[...] += jnp.dot(xb, w_ref[...], preferred_element_type=jnp.float32)

    @pl.when(k == nk - 1)
    def _epilogue():
        y = acc_ref[...]
        if has_bias:
            y = y + b_ref[...]
        if act == "relu":
            y = jnp.maximum(y, 0.0)
        elif act == "swish":
            y = y * _sigmoid(y)
        if glu:
            half = y.shape[-1] // 2
            y = y[:, :half] * _sigmoid(y[:, half:])
        if out_scale != 1.0:
            y = y * out_scale
        if has_res:
            y = res_ref[...].astype(F32) + res_scale * y
        if has_post_ln:
            y = _layernorm(y, pln_refs[0][...], pln_refs[1][...])
        o_ref[...] = y.astype(o_ref.dtype)


def fused_linear(x, w, b=None, *, ln=(), act="none", glu=False,
                 residual=None, res_scale=1.0, post_ln=None, out_scale=1.0,
                 out_dtype=BF16, tm_max=256, tk_max=512, tn_max=1024):
    """y = epilogue(prologue(x) @ w).  x:(M,K), w:(K,N).  Output dtype bf16."""
    M, K = x.shape
    N = w.shape[1]
    n_out = N // 2 if glu else N
    ln = tuple(ln)

    # Reduction (K) tiling; fused pre-LN needs the whole row -> single K tile.
    tk = K if (ln or K <= tk_max) else tk_max
    Kp = _round_up(K, tk)
    nk = Kp // tk

    # Row (M) tiling; pick the tile that minimizes padding waste.
    if M <= tm_max:
        tm = _round_up(M, 8)
    else:
        tm = tm_max if (-M) % tm_max <= (-M) % (tm_max // 2) else tm_max // 2
    Mp = _round_up(M, tm)
    nm = Mp // tm

    # Column (N) tiling only when the epilogue doesn't need whole output rows.
    if glu or post_ln is not None or N <= tn_max or (N % tn_max) != 0:
        tn = N
    else:
        tn = tn_max
    nn = N // tn
    tno = n_out if nn == 1 else tn                    # per-tile output width

    # Pre-cast to bf16 here (halves x/W HBM traffic and VMEM footprint).
    xp = x if (Mp == M and Kp == K) else jnp.pad(x, ((0, Mp - M), (0, Kp - K)))
    xp = xp.astype(BF16)
    wp = w if Kp == K else jnp.pad(w, ((0, Kp - K), (0, 0)))
    wp = wp.astype(BF16)

    args = [xp, wp]
    in_specs = [pl.BlockSpec((tm, tk), lambda m, n, k: (m, k)),
                pl.BlockSpec((tk, tn), lambda m, n, k: (k, n))]
    for g, bb in ln:
        args += [g.reshape(1, K), bb.reshape(1, K)]
        in_specs += [pl.BlockSpec((1, K), lambda m, n, k: (0, 0))] * 2
    if b is not None:
        args.append(b.reshape(1, N))
        in_specs.append(pl.BlockSpec((1, tn), lambda m, n, k: (0, n)))
    if residual is not None:
        rp = residual if Mp == M else jnp.pad(residual, ((0, Mp - M), (0, 0)))
        args.append(rp.astype(BF16))
        in_specs.append(pl.BlockSpec((tm, tno), lambda m, n, k: (m, n)))
    if post_ln is not None:
        args += [post_ln[0].reshape(1, n_out), post_ln[1].reshape(1, n_out)]
        in_specs += [pl.BlockSpec((1, n_out), lambda m, n, k: (0, 0))] * 2

    kernel = functools.partial(
        _fused_linear_kernel, nk=nk, act=act, glu=glu, has_bias=b is not None,
        n_ln=len(ln), has_res=residual is not None,
        has_post_ln=post_ln is not None, res_scale=res_scale,
        out_scale=out_scale)

    out = pl.pallas_call(
        kernel,
        out_shape=jax.ShapeDtypeStruct((Mp, n_out), out_dtype),
        grid=(nm, nn, nk),
        in_specs=in_specs,
        out_specs=pl.BlockSpec((tm, tno), lambda m, n, k: (m, n)),
        scratch_shapes=[pltpu.VMEM((tm, tn), jnp.float32)],
        compiler_params=pltpu.CompilerParams(
            dimension_semantics=("parallel", "parallel", "arbitrary")),
        cost_estimate=pl.CostEstimate(
            flops=2 * Mp * Kp * N, transcendentals=0,
            bytes_accessed=2 * (Mp * Kp + Kp * N + Mp * n_out)),
    )(*args)
    return out if Mp == M else out[:M]


# ----------------------------------------------------------------------------
# Fused relative-position multi-head attention (one kernel per batch element)
#   - q/k/v come in packed as (B, T, 3D) bf16 (no per-head transposes)
#   - per head: (q+pos_u)k^T, (q+pos_v)p^T, Transformer-XL rel-shift, mask,
#     softmax (exact division) and @V, all in-register
#   - output written lane-dense as (B, T, H*dk) bf16
# ----------------------------------------------------------------------------

def _attn_kernel(qkv_ref, p_ref, u_ref, pv_ref, m_ref, o_ref,
                 *, H, dk, T, D, inv_sqrt_dk):
    m = m_ref[0]                                             # (1, T); 1 = valid
    ctx = []
    for h in range(H):
        lo = h * dk
        q = qkv_ref[0, :, lo:lo + dk].astype(F32)            # (T, dk)
        kh = qkv_ref[0, :, D + lo:D + lo + dk]               # (T, dk) bf16
        vh = qkv_ref[0, :, 2 * D + lo:2 * D + lo + dk]       # (T, dk) bf16
        ph = p_ref[:, lo:lo + dk]                            # (P, dk) bf16
        q_u = (q + u_ref[h:h + 1, :]).astype(BF16)
        q_v = (q + pv_ref[h:h + 1, :]).astype(BF16)

        ac = jax.lax.dot_general(q_u, kh, (((1,), (1,)), ((), ())),
                                 preferred_element_type=F32)     # (T, T)
        bdf = jax.lax.dot_general(q_v, ph, (((1,), (1,)), ((), ())),
                                  preferred_element_type=F32)    # (T, 2T-1)
        # Transformer-XL rel-shift fused in-register: row i keeps columns
        # [T-1-i, 2T-1-i) of bdf, i.e. bd[i, j] = bdf[i, T-1+j-i].
        # TODO(synk): for production-length T use a strided pltpu.roll instead
        # of the statically unrolled per-row slices below.
        bd = jnp.concatenate(
            [bdf[i:i + 1, T - 1 - i:2 * T - 1 - i] for i in range(T)], axis=0)

        s = (ac + bd) * inv_sqrt_dk
        s = jnp.where(m > 0, s, NEG_INF)
        s = s - jnp.max(s, axis=-1, keepdims=True)
        e = jnp.exp(s)
        pr = e / jnp.sum(e, axis=-1, keepdims=True)              # exact div
        pr = jnp.where(m > 0, pr, 0.0)
        ctx.append(jnp.dot(pr.astype(BF16), vh, preferred_element_type=F32))
    o_ref[0] = jnp.concatenate(ctx, axis=-1).astype(o_ref.dtype)


def attention_pallas(qkv, p, pos_u, pos_v, mask_f, *, H, dk):
    """qkv:(B,T,3D) bf16, p:(2T-1,D) bf16, pos_u/pos_v:(H,dk), mask:(B,1,T)."""
    B, T, threeD = qkv.shape
    D = threeD // 3
    P = p.shape[0]
    kernel = functools.partial(_attn_kernel, H=H, dk=dk, T=T, D=D,
                               inv_sqrt_dk=1.0 / math.sqrt(dk))
    return pl.pallas_call(
        kernel,
        out_shape=jax.ShapeDtypeStruct((B, T, D), BF16),
        grid=(B,),
        in_specs=[pl.BlockSpec((1, T, threeD), lambda b: (b, 0, 0)),
                  pl.BlockSpec((P, D), lambda b: (0, 0)),
                  pl.BlockSpec((H, dk), lambda b: (0, 0)),
                  pl.BlockSpec((H, dk), lambda b: (0, 0)),
                  pl.BlockSpec((1, 1, T), lambda b: (b, 0, 0))],
        out_specs=pl.BlockSpec((1, T, D), lambda b: (b, 0, 0)),
        compiler_params=pltpu.CompilerParams(
            dimension_semantics=("parallel",)),
    )(qkv, p, pos_u, pos_v, mask_f)


# ----------------------------------------------------------------------------
# Depthwise conv + folded BatchNorm(eval) + Swish
# ----------------------------------------------------------------------------

def _dwconv_kernel(x_ref, w_ref, sc_ref, sh_ref, o_ref, *, K, T):
    acc = x_ref[0, 0:T, :].astype(F32) * w_ref[0:1, :]
    for k in range(1, K):                       # static unroll over kernel taps
        acc = acc + x_ref[0, k:k + T, :].astype(F32) * w_ref[k:k + 1, :]
    y = acc * sc_ref[...] + sh_ref[...]         # folded BatchNorm (eval)
    o_ref[0] = (y * _sigmoid(y)).astype(o_ref.dtype)    # Swish


def dwconv_bn_swish_pallas(x_btc, w_kc, scale_c, shift_c):
    # TODO(synk): per-tap shifted slices could be replaced by pltpu.roll on the
    # sublane axis and a tiled T grid axis (halo blocks) for long sequences.
    B, T, C = x_btc.shape
    K = w_kc.shape[0]
    pad = (K - 1) // 2
    Tp = _round_up(T + 2 * pad, 8)              # sublane-aligned padded time
    xp = jnp.pad(x_btc, ((0, 0), (pad, Tp - T - pad), (0, 0)))
    return pl.pallas_call(
        functools.partial(_dwconv_kernel, K=K, T=T),
        out_shape=jax.ShapeDtypeStruct((B, T, C), BF16),
        grid=(B,),
        in_specs=[pl.BlockSpec((1, Tp, C), lambda b: (b, 0, 0)),
                  pl.BlockSpec((K, C), lambda b: (0, 0)),
                  pl.BlockSpec((1, C), lambda b: (0, 0)),
                  pl.BlockSpec((1, C), lambda b: (0, 0))],
        out_specs=pl.BlockSpec((1, T, C), lambda b: (b, 0, 0)),
        compiler_params=pltpu.CompilerParams(dimension_semantics=("parallel",)),
    )(xp, w_kc, scale_c.reshape(1, C), shift_c.reshape(1, C))


# ----------------------------------------------------------------------------
# Model glue (reshapes / parameter handling in plain JAX)
# ----------------------------------------------------------------------------

def conv2d_s2_relu(x_nhwc, w_torch, b):
    """3x3 stride-2 valid conv + ReLU via im2col + fused Pallas matmul."""
    B, Hh, W, Cin = x_nhwc.shape
    KH = KW = 3
    Ho = (Hh - KH) // 2 + 1
    Wo = (W - KW) // 2 + 1
    cols = []
    for kh in range(KH):
        for kw in range(KW):
            cols.append(x_nhwc[:, kh:kh + 2 * (Ho - 1) + 1:2,
                               kw:kw + 2 * (Wo - 1) + 1:2, :])
    # TODO(synk): replace im2col with a Pallas kernel that accumulates 9
    # shifted stride-2 matmuls to avoid materializing the patch tensor in HBM
    # (patches are at least kept in bf16 here to halve that traffic).
    patches = jnp.stack(cols, axis=-1).reshape(B * Ho * Wo, Cin * KH * KW)
    wm = w_torch.reshape(w_torch.shape[0], -1).T
    y = fused_linear(patches, wm, b, act="relu")
    return y.reshape(B, Ho, Wo, w_torch.shape[0])


def rel_pos_emb(T, d):
    """ESPnet RelPositionalEncoding pe slice for length T: (2T-1, d)."""
    pos = jnp.arange(T, dtype=F32)[:, None]
    div = jnp.exp(jnp.arange(0, d, 2, dtype=F32) * (-(math.log(10000.0) / d)))
    pe_pos = jnp.zeros((T, d), F32)
    pe_pos = pe_pos.at[:, 0::2].set(jnp.sin(pos * div))
    pe_pos = pe_pos.at[:, 1::2].set(jnp.cos(pos * div))
    pe_neg = jnp.zeros((T, d), F32)
    pe_neg = pe_neg.at[:, 0::2].set(jnp.sin(-pos * div))
    pe_neg = pe_neg.at[:, 1::2].set(jnp.cos(-pos * div))
    pe_pos = jnp.flip(pe_pos, axis=0)
    pe_neg = pe_neg[1:]
    return jnp.concatenate([pe_pos, pe_neg], axis=0)


def conformer_block(x2d, B, T, pos2d, mask_f, lp, H, D, ff_scale=0.5):
    dk = D // H

    # --- Feed-forward 1: pre-LN + Swish fused into w1; half-step residual fused
    h = fused_linear(x2d, lp["f1_w1"], lp["f1_b1"],
                     ln=[(lp["f1_ln_g"], lp["f1_ln_b"])], act="swish")
    x2d = fused_linear(h, lp["f1_w2"], lp["f1_b2"],
                       residual=x2d, res_scale=ff_scale)

    # --- Relative-position MHA: pre-LN fused into one QKV projection; the
    #     whole attention tail (rel-shift included) runs in one kernel.
    qkv = fused_linear(x2d, lp["w_qkv"], lp["b_qkv"],
                       ln=[(lp["mha_ln_g"], lp["mha_ln_b"])])         # (BT, 3D)
    p = fused_linear(pos2d, lp["wp"])                                 # (P, D)
    ctx = attention_pallas(qkv.reshape(B, T, 3 * D), p,
                           lp["pos_u"], lp["pos_v"], mask_f, H=H, dk=dk)
    x2d = fused_linear(ctx.reshape(B * T, D), lp["wo"], lp["bo"], residual=x2d)

    # --- Convolution module: block LN + module LN + pointwise-1 + GLU fused
    h = fused_linear(x2d, lp["pw1_w"], lp["pw1_b"],
                     ln=[(lp["normconv_g"], lp["normconv_b"]),
                         (lp["conv_ln_g"], lp["conv_ln_b"])], glu=True)
    scale = lp["bn_g"] * jax.lax.rsqrt(lp["bn_var"] + BN_EPS)
    shift = lp["bn_b"] - lp["bn_mean"] * scale
    h = dwconv_bn_swish_pallas(h.reshape(B, T, D), lp["dw_w"], scale, shift)
    x2d = fused_linear(h.reshape(B * T, D), lp["pw2_w"], lp["pw2_b"],
                       residual=x2d)

    # --- Feed-forward 2 + final LayerNorm fused as matmul epilogue
    h = fused_linear(x2d, lp["f2_w1"], lp["f2_b1"],
                     ln=[(lp["f2_ln_g"], lp["f2_ln_b"])], act="swish")
    x2d = fused_linear(h, lp["f2_w2"], lp["f2_b2"],
                       residual=x2d, res_scale=ff_scale,
                       post_ln=(lp["fin_ln_g"], lp["fin_ln_b"]))
    return x2d


def conformer_encoder(inputs, input_lengths, params, *, D, H):
    """inputs: (B, T, input_dim) -> (outputs (B, T'', D), output_lengths (B,))."""
    B, T, _ = inputs.shape
    # --- Conv2dSubsampling (two 3x3 stride-2 convs + ReLU), NHWC, Cin=1 ---
    x = inputs[..., None].astype(BF16)
    x = conv2d_s2_relu(x, params["conv1_w"], params["conv1_b"])
    x = conv2d_s2_relu(x, params["conv2_w"], params["conv2_b"])
    _, Tsub, Fsub, C = x.shape
    # match torch: (B,C,T',F').permute(0,2,1,3).view(B,T',C*F')
    x2d = x.transpose(0, 1, 3, 2).reshape(B * Tsub, C * Fsub)
    output_lengths = ((input_lengths - 1) // 2 - 1) // 2      # exact nested formula

    # --- input projection (+ sqrt(D) positional-encoding scale fused) ---
    x2d = fused_linear(x2d, params["proj_w"], params["proj_b"],
                       out_scale=math.sqrt(D))
    pos2d = rel_pos_emb(Tsub, D)                              # (2*Tsub-1, D)

    # --- padding mask, subsampled like torch: [:, :, :-2:2][:, :, :-2:2] ---
    valid = jnp.arange(T)[None, :] < input_lengths[:, None]
    mask_f = valid[:, None, :][:, :, :-2:2][:, :, :-2:2].astype(F32)  # (B,1,T'')

    for lp in params["layers"]:
        x2d = conformer_block(x2d, B, Tsub, pos2d, mask_f, lp, H, D)
    return x2d.reshape(B, Tsub, D).astype(F32), output_lengths


# ----------------------------------------------------------------------------
# Deterministic parameter initialization
# ----------------------------------------------------------------------------

def init_params(key, input_dim, D, H, ff_exp, K, num_layers):
    keys = iter(jax.random.split(key, 512))

    def w(shape, scale=0.05):
        return jax.random.normal(next(keys), shape, dtype=F32) * scale

    params = {}
    params["conv1_w"] = w((D, 1, 3, 3), 0.1)
    params["conv1_b"] = w((D,), 0.01)
    params["conv2_w"] = w((D, D, 3, 3), 0.05)
    params["conv2_b"] = w((D,), 0.01)
    sub_freq = ((input_dim - 1) // 2 - 1) // 2
    params["proj_w"] = w((D * sub_freq, D), 0.05)
    params["proj_b"] = w((D,), 0.01)

    Dff = D * ff_exp
    dk = D // H
    layers = []
    for _ in range(num_layers):
        lp = {
            "f1_ln_g": jnp.ones((D,), F32), "f1_ln_b": jnp.zeros((D,), F32),
            "f1_w1": w((D, Dff)), "f1_b1": w((Dff,), 0.01),
            "f1_w2": w((Dff, D)), "f1_b2": w((D,), 0.01),
            "mha_ln_g": jnp.ones((D,), F32), "mha_ln_b": jnp.zeros((D,), F32),
            "w_qkv": w((D, 3 * D)), "b_qkv": w((3 * D,), 0.01),
            "wp": w((D, D)),
            "pos_u": w((H, dk)), "pos_v": w((H, dk)),
            "wo": w((D, D)), "bo": w((D,), 0.01),
            "normconv_g": jnp.ones((D,), F32), "normconv_b": jnp.zeros((D,), F32),
            "conv_ln_g": jnp.ones((D,), F32), "conv_ln_b": jnp.zeros((D,), F32),
            "pw1_w": w((D, 2 * D)), "pw1_b": w((2 * D,), 0.01),
            "dw_w": w((K, D), 0.1),
            "bn_g": jnp.ones((D,), F32), "bn_b": jnp.zeros((D,), F32),
            "bn_mean": jnp.zeros((D,), F32), "bn_var": jnp.ones((D,), F32),
            "pw2_w": w((D, D)), "pw2_b": w((D,), 0.01),
            "f2_ln_g": jnp.ones((D,), F32), "f2_ln_b": jnp.zeros((D,), F32),
            "f2_w1": w((D, Dff)), "f2_b1": w((Dff,), 0.01),
            "f2_w2": w((Dff, D)), "f2_b2": w((D,), 0.01),
            "fin_ln_g": jnp.ones((D,), F32), "fin_ln_b": jnp.zeros((D,), F32),
        }
        layers.append(lp)
    params["layers"] = layers
    return params


# ----------------------------------------------------------------------------
if __name__ == "__main__":
    key = jax.random.PRNGKey(0)
    k_in, k_par = jax.random.split(key)

    # small shapes consistent with the module
    B, T, INPUT_DIM = 2, 24, 16
    ENC_D, HEADS, NUM_LAYERS, FF_EXP, CONV_K = 32, 4, 2, 4, 7

    inputs = jax.random.normal(k_in, (B, T, INPUT_DIM), dtype=F32)
    input_lengths = jnp.array([24, 10], dtype=jnp.int32)

    params = init_params(k_par, INPUT_DIM, ENC_D, HEADS, FF_EXP, CONV_K,
                         NUM_LAYERS)

    encoder = jax.jit(functools.partial(conformer_encoder, D=ENC_D, H=HEADS))
    outputs, output_lengths = encoder(inputs, input_lengths, params)
    jax.block_until_ready(outputs)
    jax.block_until_ready(output_lengths)
    assert outputs.shape == (B, 5, ENC_D)        # T'' = ((24-1)//2 - 1)//2 = 5
    assert output_lengths.shape == (B,)
    print("KERNEL_OK")
</pallas_src>

<mosaic_0001>
module attributes {stable_mosaic.version = 11 : i64} {
  func.func @_fused_linear_kernel(%arg0: i32, %arg1: i32, %arg2: i32, %arg3: memref<160x9xbf16, #tpu.memory_space<vmem>>, %arg4: memref<9x32xbf16, #tpu.memory_space<vmem>>, %arg5: memref<1x32xf32, #tpu.memory_space<vmem>>, %arg6: memref<160x32xbf16, #tpu.memory_space<vmem>>, %arg7: memref<160x32xf32, #tpu.memory_space<vmem>>) attributes {dimension_semantics = [#tpu.dimension_semantics<parallel>, #tpu.dimension_semantics<parallel>, #tpu.dimension_semantics<arbitrary>], iteration_bounds = array<i64: 1, 1, 1>, scalar_prefetch = 0 : i64, scratch_operands = 1 : i64, tpu.core_type = #tpu.core_type<tc>, window_params = [{transform_indices = @transform_0, window_bounds = array<i64: 160, 9>}, {transform_indices = @transform_1, window_bounds = array<i64: 9, 32>}, {transform_indices = @transform_2, window_bounds = array<i64: 1, 32>}, {transform_indices = @transform_3, window_bounds = array<i64: 160, 32>}]} {
    %c0_i32 = arith.constant 0 : i32
    %0 = arith.cmpi eq, %arg2, %c0_i32 : i32
    %1 = arith.extui %0 : i1 to i32
    %c0_i32_0 = arith.constant 0 : i32
    %2 = arith.cmpi ne, %1, %c0_i32_0 : i32
    scf.if %2 {
      %cst_10 = arith.constant 0.000000e+00 : f32
      %12 = vector.broadcast %cst_10 : f32 to vector<160x32xf32>
      %c0_11 = arith.constant 0 : index
      %c0_12 = arith.constant 0 : index
      %13 = vector.load %arg7[%c0_11, %c0_12] : memref<160x32xf32, #tpu.memory_space<vmem>>, vector<160x32xf32>
      tpu.vector_store %arg7[%c0_11, %c0_12], %12 {strides = array<i32>} : memref<160x32xf32, #tpu.memory_space<vmem>>, vector<160x32xf32>,
    } else {
    }
    %c0 = arith.constant 0 : index
    %c0_1 = arith.constant 0 : index
    %3 = vector.load %arg3[%c0, %c0_1] : memref<160x9xbf16, #tpu.memory_space<vmem>>, vector<160x9xbf16>
    %c0_2 = arith.constant 0 : index
    %c0_3 = arith.constant 0 : index
    %4 = vector.load %arg7[%c0_2, %c0_3] : memref<160x32xf32, #tpu.memory_space<vmem>>, vector<160x32xf32>
    %c0_4 = arith.constant 0 : index
    %c0_5 = arith.constant 0 : index
    %5 = vector.load %arg4[%c0_4, %c0_5] : memref<9x32xbf16, #tpu.memory_space<vmem>>, vector<9x32xbf16>
    %cst = arith.constant dense<0.000000e+00> : vector<160x32xf32>
    %6 = tpu.matmul %3, %5, %cst {dimension_numbers = #tpu.dot_dimension_numbers<[1], [0], [0], [1], [0, 0, 1, 1], [], []>} : vector<160x9xbf16>, vector<9x32xbf16>, vector<160x32xf32> -> vector<160x32xf32>
    %7 = arith.addf %4, %6 : vector<160x32xf32>
    %c0_6 = arith.constant 0 : index
    %c0_7 = arith.constant 0 : index
    %8 = vector.load %arg7[%c0_6, %c0_7] : memref<160x32xf32, #tpu.memory_space<vmem>>, vector<160x32xf32>
    tpu.vector_store %arg7[%c0_6, %c0_7], %7 {strides = array<i32>} : memref<160x32xf32, #tpu.memory_space<vmem>>, vector<160x32xf32>,
    %c0_i32_8 = arith.constant 0 : i32
    %9 = arith.cmpi eq, %arg2, %c0_i32_8 : i32
    %10 = arith.extui %9 : i1 to i32
    %c0_i32_9 = arith.constant 0 : i32
    %11 = arith.cmpi ne, %10, %c0_i32_9 : i32
    scf.if %11 {
      %c0_10 = arith.constant 0 : index
      %c0_11 = arith.constant 0 : index
      %12 = vector.load %arg7[%c0_10, %c0_11] : memref<160x32xf32, #tpu.memory_space<vmem>>, vector<160x32xf32>
      %c0_12 = arith.constant 0 : index
      %c0_13 = arith.constant 0 : index
      %13 = vector.load %arg5[%c0_12, %c0_13] : memref<1x32xf32, #tpu.memory_space<vmem>>, vector<1x32xf32>
      %14 = vector.broadcast %13 : vector<1x32xf32> to vector<160x32xf32>
      %15 = arith.addf %12, %14 : vector<160x32xf32>
      %cst_14 = arith.constant 0.000000e+00 : f32
      %16 = vector.broadcast %cst_14 : f32 to vector<160x32xf32>
      %17 = arith.maximumf %15, %16 : vector<160x32xf32>
      %18 = arith.truncf %17 : vector<160x32xf32> to vector<160x32xbf16>
      %c0_15 = arith.constant 0 : index
      %c0_16 = arith.constant 0 : index
      %19 = vector.load %arg6[%c0_15, %c0_16] : memref<160x32xbf16, #tpu.memory_space<vmem>>, vector<160x32xbf16>
      tpu.vector_store %arg6[%c0_15, %c0_16], %18 {strides = array<i32>} : memref<160x32xbf16, #tpu.memory_space<vmem>>, vector<160x32xbf16>,
    } else {
    }
    return
  }
  func.func @transform_0(%arg0: i32, %arg1: i32, %arg2: i32) -> (i32, i32) {
    %c0_i32 = arith.constant 0 : i32
    return %arg0, %arg2 : i32, i32
  }
  func.func @transform_1(%arg0: i32, %arg1: i32, %arg2: i32) -> (i32, i32) {
    %c0_i32 = arith.constant 0 : i32
    return %arg2, %arg1 : i32, i32
  }
  func.func @transform_2(%arg0: i32, %arg1: i32, %arg2: i32) -> (i32, i32) {
    %c0_i32 = arith.constant 0 : i32
    %c0_i32_0 = arith.constant 0 : i32
    return %c0_i32, %arg1 : i32, i32
  }
  func.func @transform_3(%arg0: i32, %arg1: i32, %arg2: i32) -> (i32, i32) {
    %c0_i32 = arith.constant 0 : i32
    return %arg0, %arg1 : i32, i32
  }
}

module attributes {stable_mosaic.version = 11 : i64} {
  func.func @_fused_linear_kernel(%arg0: i32, %arg1: i32, %arg2: i32, %arg3: memref<32x288xbf16, #tpu.memory_space<vmem>>, %arg4: memref<288x32xbf16, #tpu.memory_space<vmem>>, %arg5: memref<1x32xf32, #tpu.memory_space<vmem>>, %arg6: memref<32x32xbf16, #tpu.memory_space<vmem>>, %arg7: memref<32x32xf32, #tpu.memory_space<vmem>>) attributes {dimension_semantics = [#tpu.dimension_semantics<parallel>, #tpu.dimension_semantics<parallel>, #tpu.dimension_semantics<arbitrary>], iteration_bounds = array<i64: 1, 1, 1>, scalar_prefetch = 0 : i64, scratch_operands = 1 : i64, tpu.core_type = #tpu.core_type<tc>, window_params = [{transform_indices = @transform_0, window_bounds = array<i64: 32, 288>}, {transform_indices = @transform_1, window_bounds = array<i64: 288, 32>}, {transform_indices = @transform_2, window_bounds = array<i64: 1, 32>}, {transform_indices = @transform_3, window_bounds = array<i64: 32, 32>}]} {
    %c0_i32 = arith.constant 0 : i32
    %0 = arith.cmpi eq, %arg2, %c0_i32 : i32
    %1 = arith.extui %0 : i1 to i32
    %c0_i32_0 = arith.constant 0 : i32
    %2 = arith.cmpi ne, %1, %c0_i32_0 : i32
    scf.if %2 {
      %cst_10 = arith.constant 0.000000e+00 : f32
      %12 = vector.broadcast %cst_10 : f32 to vector<32x32xf32>
      %c0_11 = arith.constant 0 : index
      %c0_12 = arith.constant 0 : index
      %13 = vector.load %arg7[%c0_11, %c0_12] : memref<32x32xf32, #tpu.memory_space<vmem>>, vector<32x32xf32>
      tpu.vector_store %arg7[%c0_11, %c0_12], %12 {strides = array<i32>} : memref<32x32xf32, #tpu.memory_space<vmem>>, vector<32x32xf32>,
    } else {
    }
    %c0 = arith.constant 0 : index
    %c0_1 = arith.constant 0 : index
    %3 = vector.load %arg3[%c0, %c0_1] : memref<32x288xbf16, #tpu.memory_space<vmem>>, vector<32x288xbf16>
    %c0_2 = arith.constant 0 : index
    %c0_3 = arith.constant 0 : index
    %4 = vector.load %arg7[%c0_2, %c0_3] : memref<32x32xf32, #tpu.memory_space<vmem>>, vector<32x32xf32>
    %c0_4 = arith.constant 0 : index
    %c0_5 = arith.constant 0 : index
    %5 = vector.load %arg4[%c0_4, %c0_5] : memref<288x32xbf16, #tpu.memory_space<vmem>>, vector<288x32xbf16>
    %cst = arith.constant dense<0.000000e+00> : vector<32x32xf32>
    %6 = tpu.matmul %3, %5, %cst {dimension_numbers = #tpu.dot_dimension_numbers<[1], [0], [0], [1], [0, 0, 1, 1], [], []>} : vector<32x288xbf16>, vector<288x32xbf16>, vector<32x32xf32> -> vector<32x32xf32>
    %7 = arith.addf %4, %6 : vector<32x32xf32>
    %c0_6 = arith.constant 0 : index
    %c0_7 = arith.constant 0 : index
    %8 = vector.load %arg7[%c0_6, %c0_7] : memref<32x32xf32, #tpu.memory_space<vmem>>, vector<32x32xf32>
    tpu.vector_store %arg7[%c0_6, %c0_7], %7 {strides = array<i32>} : memref<32x32xf32, #tpu.memory_space<vmem>>, vector<32x32xf32>,
    %c0_i32_8 = arith.constant 0 : i32
    %9 = arith.cmpi eq, %arg2, %c0_i32_8 : i32
    %10 = arith.extui %9 : i1 to i32
    %c0_i32_9 = arith.constant 0 : i32
    %11 = arith.cmpi ne, %10, %c0_i32_9 : i32
    scf.if %11 {
      %c0_10 = arith.constant 0 : index
      %c0_11 = arith.constant 0 : index
      %12 = vector.load %arg7[%c0_10, %c0_11] : memref<32x32xf32, #tpu.memory_space<vmem>>, vector<32x32xf32>
      %c0_12 = arith.constant 0 : index
      %c0_13 = arith.constant 0 : index
      %13 = vector.load %arg5[%c0_12, %c0_13] : memref<1x32xf32, #tpu.memory_space<vmem>>, vector<1x32xf32>
      %14 = vector.broadcast %13 : vector<1x32xf32> to vector<32x32xf32>
      %15 = arith.addf %12, %14 : vector<32x32xf32>
      %cst_14 = arith.constant 0.000000e+00 : f32
      %16 = vector.broadcast %cst_14 : f32 to vector<32x32xf32>
      %17 = arith.maximumf %15, %16 : vector<32x32xf32>
      %18 = arith.truncf %17 : vector<32x32xf32> to vector<32x32xbf16>
      %c0_15 = arith.constant 0 : index
      %c0_16 = arith.constant 0 : index
      %19 = vector.load %arg6[%c0_15, %c0_16] : memref<32x32xbf16, #tpu.memory_space<vmem>>, vector<32x32xbf16>
      tpu.vector_store %arg6[%c0_15, %c0_16], %18 {strides = array<i32>} : memref<32x32xbf16, #tpu.memory_space<vmem>>, vector<32x32xbf16>,
    } else {
    }
    return
  }
  func.func @transform_0(%arg0: i32, %arg1: i32, %arg2: i32) -> (i32, i32) {
    %c0_i32 = arith.constant 0 : i32
    return %arg0, %arg2 : i32, i32
  }
  func.func @transform_1(%arg0: i32, %arg1: i32, %arg2: i32) -> (i32, i32) {
    %c0_i32 = arith.constant 0 : i32
    return %arg2, %arg1 : i32, i32
  }
  func.func @transform_2(%arg0: i32, %arg1: i32, %arg2: i32) -> (i32, i32) {
    %c0_i32 = arith.constant 0 : i32
    %c0_i32_0 = arith.constant 0 : i32
    return %c0_i32, %arg1 : i32, i32
  }
  func.func @transform_3(%arg0: i32, %arg1: i32, %arg2: i32) -> (i32, i32) {
    %c0_i32 = arith.constant 0 : i32
    return %arg0, %arg1 : i32, i32
  }
}

module attributes {stable_mosaic.version = 11 : i64} {
  func.func @_fused_linear_kernel(%arg0: i32, %arg1: i32, %arg2: i32, %arg3: memref<16x96xbf16, #tpu.memory_space<vmem>>, %arg4: memref<96x32xbf16, #tpu.memory_space<vmem>>, %arg5: memref<1x32xf32, #tpu.memory_space<vmem>>, %arg6: memref<16x32xbf16, #tpu.memory_space<vmem>>, %arg7: memref<16x32xf32, #tpu.memory_space<vmem>>) attributes {dimension_semantics = [#tpu.dimension_semantics<parallel>, #tpu.dimension_semantics<parallel>, #tpu.dimension_semantics<arbitrary>], iteration_bounds = array<i64: 1, 1, 1>, scalar_prefetch = 0 : i64, scratch_operands = 1 : i64, tpu.core_type = #tpu.core_type<tc>, window_params = [{transform_indices = @transform_0, window_bounds = array<i64: 16, 96>}, {transform_indices = @transform_1, window_bounds = array<i64: 96, 32>}, {transform_indices = @transform_2, window_bounds = array<i64: 1, 32>}, {transform_indices = @transform_3, window_bounds = array<i64: 16, 32>}]} {
    %c0_i32 = arith.constant 0 : i32
    %0 = arith.cmpi eq, %arg2, %c0_i32 : i32
    %1 = arith.extui %0 : i1 to i32
    %c0_i32_0 = arith.constant 0 : i32
    %2 = arith.cmpi ne, %1, %c0_i32_0 : i32
    scf.if %2 {
      %cst_10 = arith.constant 0.000000e+00 : f32
      %12 = vector.broadcast %cst_10 : f32 to vector<16x32xf32>
      %c0_11 = arith.constant 0 : index
      %c0_12 = arith.constant 0 : index
      %13 = vector.load %arg7[%c0_11, %c0_12] : memref<16x32xf32, #tpu.memory_space<vmem>>, vector<16x32xf32>
      tpu.vector_store %arg7[%c0_11, %c0_12], %12 {strides = array<i32>} : memref<16x32xf32, #tpu.memory_space<vmem>>, vector<16x32xf32>,
    } else {
    }
    %c0 = arith.constant 0 : index
    %c0_1 = arith.constant 0 : index
    %3 = vector.load %arg3[%c0, %c0_1] : memref<16x96xbf16, #tpu.memory_space<vmem>>, vector<16x96xbf16>
    %c0_2 = arith.constant 0 : index
    %c0_3 = arith.constant 0 : index
    %4 = vector.load %arg7[%c0_2, %c0_3] : memref<16x32xf32, #tpu.memory_space<vmem>>, vector<16x32xf32>
    %c0_4 = arith.constant 0 : index
    %c0_5 = arith.constant 0 : index
    %5 = vector.load %arg4[%c0_4, %c0_5] : memref<96x32xbf16, #tpu.memory_space<vmem>>, vector<96x32xbf16>
    %cst = arith.constant dense<0.000000e+00> : vector<16x32xf32>
    %6 = tpu.matmul %3, %5, %cst {dimension_numbers = #tpu.dot_dimension_numbers<[1], [0], [0], [1], [0, 0, 1, 1], [], []>} : vector<16x96xbf16>, vector<96x32xbf16>, vector<16x32xf32> -> vector<16x32xf32>
    %7 = arith.addf %4, %6 : vector<16x32xf32>
    %c0_6 = arith.constant 0 : index
    %c0_7 = arith.constant 0 : index
    %8 = vector.load %arg7[%c0_6, %c0_7] : memref<16x32xf32, #tpu.memory_space<vmem>>, vector<16x32xf32>
    tpu.vector_store %arg7[%c0_6, %c0_7], %7 {strides = array<i32>} : memref<16x32xf32, #tpu.memory_space<vmem>>, vector<16x32xf32>,
    %c0_i32_8 = arith.constant 0 : i32
    %9 = arith.cmpi eq, %arg2, %c0_i32_8 : i32
    %10 = arith.extui %9 : i1 to i32
    %c0_i32_9 = arith.constant 0 : i32
    %11 = arith.cmpi ne, %10, %c0_i32_9 : i32
    scf.if %11 {
      %c0_10 = arith.constant 0 : index
      %c0_11 = arith.constant 0 : index
      %12 = vector.load %arg7[%c0_10, %c0_11] : memref<16x32xf32, #tpu.memory_space<vmem>>, vector<16x32xf32>
      %c0_12 = arith.constant 0 : index
      %c0_13 = arith.constant 0 : index
      %13 = vector.load %arg5[%c0_12, %c0_13] : memref<1x32xf32, #tpu.memory_space<vmem>>, vector<1x32xf32>
      %14 = vector.broadcast %13 : vector<1x32xf32> to vector<16x32xf32>
      %15 = arith.addf %12, %14 : vector<16x32xf32>
      %cst_14 = arith.constant 5.65685415 : f32
      %16 = vector.broadcast %cst_14 : f32 to vector<16x32xf32>
      %17 = arith.mulf %15, %16 : vector<16x32xf32>
      %18 = arith.truncf %17 : vector<16x32xf32> to vector<16x32xbf16>
      %c0_15 = arith.constant 0 : index
      %c0_16 = arith.constant 0 : index
      %19 = vector.load %arg6[%c0_15, %c0_16] : memref<16x32xbf16, #tpu.memory_space<vmem>>, vector<16x32xbf16>
      tpu.vector_store %arg6[%c0_15, %c0_16], %18 {strides = array<i32>} : memref<16x32xbf16, #tpu.memory_space<vmem>>, vector<16x32xbf16>,
    } else {
    }
    return
  }
  func.func @transform_0(%arg0: i32, %arg1: i32, %arg2: i32) -> (i32, i32) {
    %c0_i32 = arith.constant 0 : i32
    return %arg0, %arg2 : i32, i32
  }
  func.func @transform_1(%arg0: i32, %arg1: i32, %arg2: i32) -> (i32, i32) {
    %c0_i32 = arith.constant 0 : i32
    return %arg2, %arg1 : i32, i32
  }
  func.func @transform_2(%arg0: i32, %arg1: i32, %arg2: i32) -> (i32, i32) {
    %c0_i32 = arith.constant 0 : i32
    %c0_i32_0 = arith.constant 0 : i32
    return %c0_i32, %arg1 : i32, i32
  }
  func.func @transform_3(%arg0: i32, %arg1: i32, %arg2: i32) -> (i32, i32) {
    %c0_i32 = arith.constant 0 : i32
    return %arg0, %arg1 : i32, i32
  }
}

module attributes {stable_mosaic.version = 11 : i64} {
  func.func @_fused_linear_kernel(%arg0: i32, %arg1: i32, %arg2: i32, %arg3: memref<16x32xbf16, #tpu.memory_space<vmem>>, %arg4: memref<32x128xbf16, #tpu.memory_space<vmem>>, %arg5: memref<1x32xf32, #tpu.memory_space<vmem>>, %arg6: memref<1x32xf32, #tpu.memory_space<vmem>>, %arg7: memref<1x128xf32, #tpu.memory_space<vmem>>, %arg8: memref<16x128xbf16, #tpu.memory_space<vmem>>, %arg9: memref<16x128xf32, #tpu.memory_space<vmem>>) attributes {dimension_semantics = [#tpu.dimension_semantics<parallel>, #tpu.dimension_semantics<parallel>, #tpu.dimension_semantics<arbitrary>], iteration_bounds = array<i64: 1, 1, 1>, scalar_prefetch = 0 : i64, scratch_operands = 1 : i64, tpu.core_type = #tpu.core_type<tc>, window_params = [{transform_indices = @transform_0, window_bounds = array<i64: 16, 32>}, {transform_indices = @transform_1, window_bounds = array<i64: 32, 128>}, {pipeline_mode = #tpu.pipeline_mode<synchronous>, transform_indices = @transform_2, window_bounds = array<i64: 1, 32>}, {pipeline_mode = #tpu.pipeline_mode<synchronous>, transform_indices = @transform_3, window_bounds = array<i64: 1, 32>}, {transform_indices = @transform_4, window_bounds = array<i64: 1, 128>}, {transform_indices = @transform_5, window_bounds = array<i64: 16, 128>}]} {
    %c0_i32 = arith.constant 0 : i32
    %0 = arith.cmpi eq, %arg2, %c0_i32 : i32
    %1 = arith.extui %0 : i1 to i32
    %c0_i32_0 = arith.constant 0 : i32
    %2 = arith.cmpi ne, %1, %c0_i32_0 : i32
    scf.if %2 {
      %cst_19 = arith.constant 0.000000e+00 : f32
      %36 = vector.broadcast %cst_19 : f32 to vector<16x128xf32>
      %c0_20 = arith.constant 0 : index
      %c0_21 = arith.constant 0 : index
      %37 = vector.load %arg9[%c0_20, %c0_21] : memref<16x128xf32, #tpu.memory_space<vmem>>, vector<16x128xf32>
      tpu.vector_store %arg9[%c0_20, %c0_21], %36 {strides = array<i32>} : memref<16x128xf32, #tpu.memory_space<vmem>>, vector<16x128xf32>,
    } else {
    }
    %c0 = arith.constant 0 : index
    %c0_1 = arith.constant 0 : index
    %3 = vector.load %arg3[%c0, %c0_1] : memref<16x32xbf16, #tpu.memory_space<vmem>>, vector<16x32xbf16>
    %4 = arith.extf %3 : vector<16x32xbf16> to vector<16x32xf32>
    %c0_2 = arith.constant 0 : index
    %c0_3 = arith.constant 0 : index
    %5 = vector.load %arg5[%c0_2, %c0_3] : memref<1x32xf32, #tpu.memory_space<vmem>>, vector<1x32xf32>
    %c0_4 = arith.constant 0 : index
    %c0_5 = arith.constant 0 : index
    %6 = vector.load %arg6[%c0_4, %c0_5] : memref<1x32xf32, #tpu.memory_space<vmem>>, vector<1x32xf32>
    %cst = arith.constant dense<0.000000e+00> : vector<16xf32>
    %7 = vector.multi_reduction <add>, %4, %cst [1] : vector<16x32xf32> to vector<16xf32>
    %8 = vector.shape_cast %7 : vector<16xf32> to vector<16x1xf32>
    %cst_6 = arith.constant 3.200000e+01 : f32
    %9 = vector.broadcast %cst_6 : f32 to vector<16x1xf32>
    %10 = arith.divf %8, %9 : vector<16x1xf32>
    %11 = vector.broadcast %10 : vector<16x1xf32> to vector<16x32xf32>
    %12 = arith.subf %4, %11 : vector<16x32xf32>
    %13 = arith.mulf %12, %12 : vector<16x32xf32>
    %cst_7 = arith.constant dense<0.000000e+00> : vector<16xf32>
    %14 = vector.multi_reduction <add>, %13, %cst_7 [1] : vector<16x32xf32> to vector<16xf32>
    %15 = vector.shape_cast %14 : vector<16xf32> to vector<16x1xf32>
    %cst_8 = arith.constant 3.200000e+01 : f32
    %16 = vector.broadcast %cst_8 : f32 to vector<16x1xf32>
    %17 = arith.divf %15, %16 : vector<16x1xf32>
    %cst_9 = arith.constant 9.99999974E-6 : f32
    %18 = vector.broadcast %cst_9 : f32 to vector<16x1xf32>
    %19 = arith.addf %17, %18 : vector<16x1xf32>
    %20 = math.rsqrt %19 : vector<16x1xf32>
    %21 = vector.broadcast %20 : vector<16x1xf32> to vector<16x32xf32>
    %22 = arith.mulf %12, %21 : vector<16x32xf32>
    %23 = vector.broadcast %5 : vector<1x32xf32> to vector<16x32xf32>
    %24 = arith.mulf %22, %23 : vector<16x32xf32>
    %25 = vector.broadcast %6 : vector<1x32xf32> to vector<16x32xf32>
    %26 = arith.addf %24, %25 : vector<16x32xf32>
    %27 = arith.truncf %26 : vector<16x32xf32> to vector<16x32xbf16>
    %c0_10 = arith.constant 0 : index
    %c0_11 = arith.constant 0 : index
    %28 = vector.load %arg9[%c0_10, %c0_11] : memref<16x128xf32, #tpu.memory_space<vmem>>, vector<16x128xf32>
    %c0_12 = arith.constant 0 : index
    %c0_13 = arith.constant 0 : index
    %29 = vector.load %arg4[%c0_12, %c0_13] : memref<32x128xbf16, #tpu.memory_space<vmem>>, vector<32x128xbf16>
    %cst_14 = arith.constant dense<0.000000e+00> : vector<16x128xf32>
    %30 = tpu.matmul %27, %29, %cst_14 {dimension_numbers = #tpu.dot_dimension_numbers<[1], [0], [0], [1], [0, 0, 1, 1], [], []>} : vector<16x32xbf16>, vector<32x128xbf16>, vector<16x128xf32> -> vector<16x128xf32>
    %31 = arith.addf %28, %30 : vector<16x128xf32>
    %c0_15 = arith.constant 0 : index
    %c0_16 = arith.constant 0 : index
    %32 = vector.load %arg9[%c0_15, %c0_16] : memref<16x128xf32, #tpu.memory_space<vmem>>, vector<16x128xf32>
    tpu.vector_store %arg9[%c0_15, %c0_16], %31 {strides = array<i32>} : memref<16x128xf32, #tpu.memory_space<vmem>>, vector<16x128xf32>,
    %c0_i32_17 = arith.constant 0 : i32
    %33 = arith.cmpi eq, %arg2, %c0_i32_17 : i32
    %34 = arith.extui %33 : i1 to i32
    %c0_i32_18 = arith.constant 0 : i32
    %35 = arith.cmpi ne, %34, %c0_i32_18 : i32
    scf.if %35 {
      %c0_19 = arith.constant 0 : index
      %c0_20 = arith.constant 0 : index
      %36 = vector.load %arg9[%c0_19, %c0_20] : memref<16x128xf32, #tpu.memory_space<vmem>>, vector<16x128xf32>
      %c0_21 = arith.constant 0 : index
      %c0_22 = arith.constant 0 : index
      %37 = vector.load %arg7[%c0_21, %c0_22] : memref<1x128xf32, #tpu.memory_space<vmem>>, vector<1x128xf32>
      %38 = vector.broadcast %37 : vector<1x128xf32> to vector<16x128xf32>
      %39 = arith.addf %36, %38 : vector<16x128xf32>
      %cst_23 = arith.constant 0.000000e+00 : f32
      %40 = vector.broadcast %cst_23 : f32 to vector<16x128xf32>
      %41 = arith.subf %40, %39 : vector<16x128xf32>
      %42 = math.exp %41 : vector<16x128xf32>
      %cst_24 = arith.constant 1.000000e+00 : f32
      %43 = vector.broadcast %cst_24 : f32 to vector<16x128xf32>
      %44 = arith.addf %43, %42 : vector<16x128xf32>
      %cst_25 = arith.constant 1.000000e+00 : f32
      %45 = vector.broadcast %cst_25 : f32 to vector<16x128xf32>
      %46 = arith.divf %45, %44 : vector<16x128xf32>
      %47 = arith.mulf %39, %46 : vector<16x128xf32>
      %48 = arith.truncf %47 : vector<16x128xf32> to vector<16x128xbf16>
      %c0_26 = arith.constant 0 : index
      %c0_27 = arith.constant 0 : index
      %49 = vector.load %arg8[%c0_26, %c0_27] : memref<16x128xbf16, #tpu.memory_space<vmem>>, vector<16x128xbf16>
      tpu.vector_store %arg8[%c0_26, %c0_27], %48 {strides = array<i32>} : memref<16x128xbf16, #tpu.memory_space<vmem>>, vector<16x128xbf16>,
    } else {
    }
    return
  }
  func.func @transform_0(%arg0: i32, %arg1: i32, %arg2: i32) -> (i32, i32) {
    %c0_i32 = arith.constant 0 : i32
    return %arg0, %arg2 : i32, i32
  }
  func.func @transform_1(%arg0: i32, %arg1: i32, %arg2: i32) -> (i32, i32) {
    %c0_i32 = arith.constant 0 : i32
    return %arg2, %arg1 : i32, i32
  }
  func.func @transform_2(%arg0: i32, %arg1: i32, %arg2: i32) -> (i32, i32) {
    %c0_i32 = arith.constant 0 : i32
    %c0_i32_0 = arith.constant 0 : i32
    %c0_i32_1 = arith.constant 0 : i32
    return %c0_i32, %c0_i32_0 : i32, i32
  }
  func.func @transform_3(%arg0: i32, %arg1: i32, %arg2: i32) -> (i32, i32) {
    %c0_i32 = arith.constant 0 : i32
    %c0_i32_0 = arith.constant 0 : i32
    %c0_i32_1 = arith.constant 0 : i32
    return %c0_i32, %c0_i32_0 : i32, i32
  }
  func.func @transform_4(%arg0: i32, %arg1: i32, %arg2: i32) -> (i32, i32) {
    %c0_i32 = arith.constant 0 : i32
    %c0_i32_0 = arith.constant 0 : i32
    return %c0_i32, %arg1 : i32, i32
  }
  func.func @transform_5(%arg0: i32, %arg1: i32, %arg2: i32) -> (i32, i32) {
    %c0_i32 = arith.constant 0 : i32
    return %arg0, %arg1 : i32, i32
  }
}

module attributes {stable_mosaic.version = 11 : i64} {
  func.func @_fused_linear_kernel(%arg0: i32, %arg1: i32, %arg2: i32, %arg3: memref<16x128xbf16, #tpu.memory_space<vmem>>, %arg4: memref<128x32xbf16, #tpu.memory_space<vmem>>, %arg5: memref<1x32xf32, #tpu.memory_space<vmem>>, %arg6: memref<16x32xbf16, #tpu.memory_space<vmem>>, %arg7: memref<16x32xbf16, #tpu.memory_space<vmem>>, %arg8: memref<16x32xf32, #tpu.memory_space<vmem>>) attributes {dimension_semantics = [#tpu.dimension_semantics<parallel>, #tpu.dimension_semantics<parallel>, #tpu.dimension_semantics<arbitrary>], iteration_bounds = array<i64: 1, 1, 1>, scalar_prefetch = 0 : i64, scratch_operands = 1 : i64, tpu.core_type = #tpu.core_type<tc>, window_params = [{transform_indices = @transform_0, window_bounds = array<i64: 16, 128>}, {transform_indices = @transform_1, window_bounds = array<i64: 128, 32>}, {transform_indices = @transform_2, window_bounds = array<i64: 1, 32>}, {transform_indices = @transform_3, window_bounds = array<i64: 16, 32>}, {transform_indices = @transform_4, window_bounds = array<i64: 16, 32>}]} {
    %c0_i32 = arith.constant 0 : i32
    %0 = arith.cmpi eq, %arg2, %c0_i32 : i32
    %1 = arith.extui %0 : i1 to i32
    %c0_i32_0 = arith.constant 0 : i32
    %2 = arith.cmpi ne, %1, %c0_i32_0 : i32
    scf.if %2 {
      %cst_10 = arith.constant 0.000000e+00 : f32
      %12 = vector.broadcast %cst_10 : f32 to vector<16x32xf32>
      %c0_11 = arith.constant 0 : index
      %c0_12 = arith.constant 0 : index
      %13 = vector.load %arg8[%c0_11, %c0_12] : memref<16x32xf32, #tpu.memory_space<vmem>>, vector<16x32xf32>
      tpu.vector_store %arg8[%c0_11, %c0_12], %12 {strides = array<i32>} : memref<16x32xf32, #tpu.memory_space<vmem>>, vector<16x32xf32>,
    } else {
    }
    %c0 = arith.constant 0 : index
    %c0_1 = arith.constant 0 : index
    %3 = vector.load %arg3[%c0, %c0_1] : memref<16x128xbf16, #tpu.memory_space<vmem>>, vector<16x128xbf16>
    %c0_2 = arith.constant 0 : index
    %c0_3 = arith.constant 0 : index
    %4 = vector.load %arg8[%c0_2, %c0_3] : memref<16x32xf32, #tpu.memory_space<vmem>>, vector<16x32xf32>
    %c0_4 = arith.constant 0 : index
    %c0_5 = arith.constant 0 : index
    %5 = vector.load %arg4[%c0_4, %c0_5] : memref<128x32xbf16, #tpu.memory_space<vmem>>, vector<128x32xbf16>
    %cst = arith.constant dense<0.000000e+00> : vector<16x32xf32>
    %6 = tpu.matmul %3, %5, %cst {dimension_numbers = #tpu.dot_dimension_numbers<[1], [0], [0], [1], [0, 0, 1, 1], [], []>} : vector<16x128xbf16>, vector<128x32xbf16>, vector<16x32xf32> -> vector<16x32xf32>
    %7 = arith.addf %4, %6 : vector<16x32xf32>
    %c0_6 = arith.constant 0 : index
    %c0_7 = arith.constant 0 : index
    %8 = vector.load %arg8[%c0_6, %c0_7] : memref<16x32xf32, #tpu.memory_space<vmem>>, vector<16x32xf32>
    tpu.vector_store %arg8[%c0_6, %c0_7], %7 {strides = array<i32>} : memref<16x32xf32, #tpu.memory_space<vmem>>, vector<16x32xf32>,
    %c0_i32_8 = arith.constant 0 : i32
    %9 = arith.cmpi eq, %arg2, %c0_i32_8 : i32
    %10 = arith.extui %9 : i1 to i32
    %c0_i32_9 = arith.constant 0 : i32
    %11 = arith.cmpi ne, %10, %c0_i32_9 : i32
    scf.if %11 {
      %c0_10 = arith.constant 0 : index
      %c0_11 = arith.constant 0 : index
      %12 = vector.load %arg8[%c0_10, %c0_11] : memref<16x32xf32, #tpu.memory_space<vmem>>, vector<16x32xf32>
      %c0_12 = arith.constant 0 : index
      %c0_13 = arith.constant 0 : index
      %13 = vector.load %arg5[%c0_12, %c0_13] : memref<1x32xf32, #tpu.memory_space<vmem>>, vector<1x32xf32>
      %14 = vector.broadcast %13 : vector<1x32xf32> to vector<16x32xf32>
      %15 = arith.addf %12, %14 : vector<16x32xf32>
      %c0_14 = arith.constant 0 : index
      %c0_15 = arith.constant 0 : index
      %16 = vector.load %arg6[%c0_14, %c0_15] : memref<16x32xbf16, #tpu.memory_space<vmem>>, vector<16x32xbf16>
      %17 = arith.extf %16 : vector<16x32xbf16> to vector<16x32xf32>
      %cst_16 = arith.constant 5.000000e-01 : f32
      %18 = vector.broadcast %cst_16 : f32 to vector<16x32xf32>
      %19 = arith.mulf %18, %15 : vector<16x32xf32>
      %20 = arith.addf %17, %19 : vector<16x32xf32>
      %21 = arith.truncf %20 : vector<16x32xf32> to vector<16x32xbf16>
      %c0_17 = arith.constant 0 : index
      %c0_18 = arith.constant 0 : index
      %22 = vector.load %arg7[%c0_17, %c0_18] : memref<16x32xbf16, #tpu.memory_space<vmem>>, vector<16x32xbf16>
      tpu.vector_store %arg7[%c0_17, %c0_18], %21 {strides = array<i32>} : memref<16x32xbf16, #tpu.memory_space<vmem>>, vector<16x32xbf16>,
    } else {
    }
    return
  }
  func.func @transform_0(%arg0: i32, %arg1: i32, %arg2: i32) -> (i32, i32) {
    %c0_i32 = arith.constant 0 : i32
    return %arg0, %arg2 : i32, i32
  }
  func.func @transform_1(%arg0: i32, %arg1: i32, %arg2: i32) -> (i32, i32) {
    %c0_i32 = arith.constant 0 : i32
    return %arg2, %arg1 : i32, i32
  }
  func.func @transform_2(%arg0: i32, %arg1: i32, %arg2: i32) -> (i32, i32) {
    %c0_i32 = arith.constant 0 : i32
    %c0_i32_0 = arith.constant 0 : i32
    return %c0_i32, %arg1 : i32, i32
  }
  func.func @transform_3(%arg0: i32, %arg1: i32, %arg2: i32) -> (i32, i32) {
    %c0_i32 = arith.constant 0 : i32
    return %arg0, %arg1 : i32, i32
  }
  func.func @transform_4(%arg0: i32, %arg1: i32, %arg2: i32) -> (i32, i32) {
    %c0_i32 = arith.constant 0 : i32
    return %arg0, %arg1 : i32, i32
  }
}

module attributes {stable_mosaic.version = 11 : i64} {
  func.func @_fused_linear_kernel(%arg0: i32, %arg1: i32, %arg2: i32, %arg3: memref<16x32xbf16, #tpu.memory_space<vmem>>, %arg4: memref<32x96xbf16, #tpu.memory_space<vmem>>, %arg5: memref<1x32xf32, #tpu.memory_space<vmem>>, %arg6: memref<1x32xf32, #tpu.memory_space<vmem>>, %arg7: memref<1x96xf32, #tpu.memory_space<vmem>>, %arg8: memref<16x96xbf16, #tpu.memory_space<vmem>>, %arg9: memref<16x96xf32, #tpu.memory_space<vmem>>) attributes {dimension_semantics = [#tpu.dimension_semantics<parallel>, #tpu.dimension_semantics<parallel>, #tpu.dimension_semantics<arbitrary>], iteration_bounds = array<i64: 1, 1, 1>, scalar_prefetch = 0 : i64, scratch_operands = 1 : i64, tpu.core_type = #tpu.core_type<tc>, window_params = [{transform_indices = @transform_0, window_bounds = array<i64: 16, 32>}, {transform_indices = @transform_1, window_bounds = array<i64: 32, 96>}, {pipeline_mode = #tpu.pipeline_mode<synchronous>, transform_indices = @transform_2, window_bounds = array<i64: 1, 32>}, {pipeline_mode = #tpu.pipeline_mode<synchronous>, transform_indices = @transform_3, window_bounds = array<i64: 1, 32>}, {transform_indices = @transform_4, window_bounds = array<i64: 1, 96>}, {transform_indices = @transform_5, window_bounds = array<i64: 16, 96>}]} {
    %c0_i32 = arith.constant 0 : i32
    %0 = arith.cmpi eq, %arg2, %c0_i32 : i32
    %1 = arith.extui %0 : i1 to i32
    %c0_i32_0 = arith.constant 0 : i32
    %2 = arith.cmpi ne, %1, %c0_i32_0 : i32
    scf.if %2 {
      %cst_19 = arith.constant 0.000000e+00 : f32
      %36 = vector.broadcast %cst_19 : f32 to vector<16x96xf32>
      %c0_20 = arith.constant 0 : index
      %c0_21 = arith.constant 0 : index
      %37 = vector.load %arg9[%c0_20, %c0_21] : memref<16x96xf32, #tpu.memory_space<vmem>>, vector<16x96xf32>
      tpu.vector_store %arg9[%c0_20, %c0_21], %36 {strides = array<i32>} : memref<16x96xf32, #tpu.memory_space<vmem>>, vector<16x96xf32>,
    } else {
    }
    %c0 = arith.constant 0 : index
    %c0_1 = arith.constant 0 : index
    %3 = vector.load %arg3[%c0, %c0_1] : memref<16x32xbf16, #tpu.memory_space<vmem>>, vector<16x32xbf16>
    %4 = arith.extf %3 : vector<16x32xbf16> to vector<16x32xf32>
    %c0_2 = arith.constant 0 : index
    %c0_3 = arith.constant 0 : index
    %5 = vector.load %arg5[%c0_2, %c0_3] : memref<1x32xf32, #tpu.memory_space<vmem>>, vector<1x32xf32>
    %c0_4 = arith.constant 0 : index
    %c0_5 = arith.constant 0 : index
    %6 = vector.load %arg6[%c0_4, %c0_5] : memref<1x32xf32, #tpu.memory_space<vmem>>, vector<1x32xf32>
    %cst = arith.constant dense<0.000000e+00> : vector<16xf32>
    %7 = vector.multi_reduction <add>, %4, %cst [1] : vector<16x32xf32> to vector<16xf32>
    %8 = vector.shape_cast %7 : vector<16xf32> to vector<16x1xf32>
    %cst_6 = arith.constant 3.200000e+01 : f32
    %9 = vector.broadcast %cst_6 : f32 to vector<16x1xf32>
    %10 = arith.divf %8, %9 : vector<16x1xf32>
    %11 = vector.broadcast %10 : vector<16x1xf32> to vector<16x32xf32>
    %12 = arith.subf %4, %11 : vector<16x32xf32>
    %13 = arith.mulf %12, %12 : vector<16x32xf32>
    %cst_7 = arith.constant dense<0.000000e+00> : vector<16xf32>
    %14 = vector.multi_reduction <add>, %13, %cst_7 [1] : vector<16x32xf32> to vector<16xf32>
    %15 = vector.shape_cast %14 : vector<16xf32> to vector<16x1xf32>
    %cst_8 = arith.constant 3.200000e+01 : f32
    %16 = vector.broadcast %cst_8 : f32 to vector<16x1xf32>
    %17 = arith.divf %15, %16 : vector<16x1xf32>
    %cst_9 = arith.constant 9.99999974E-6 : f32
    %18 = vector.broadcast %cst_9 : f32 to vector<16x1xf32>
    %19 = arith.addf %17, %18 : vector<16x1xf32>
    %20 = math.rsqrt %19 : vector<16x1xf32>
    %21 = vector.broadcast %20 : vector<16x1xf32> to vector<16x32xf32>
    %22 = arith.mulf %12, %21 : vector<16x32xf32>
    %23 = vector.broadcast %5 : vector<1x32xf32> to vector<16x32xf32>
    %24 = arith.mulf %22, %23 : vector<16x32xf32>
    %25 = vector.broadcast %6 : vector<1x32xf32> to vector<16x32xf32>
    %26 = arith.addf %24, %25 : vector<16x32xf32>
    %27 = arith.truncf %26 : vector<16x32xf32> to vector<16x32xbf16>
    %c0_10 = arith.constant 0 : index
    %c0_11 = arith.constant 0 : index
    %28 = vector.load %arg9[%c0_10, %c0_11] : memref<16x96xf32, #tpu.memory_space<vmem>>, vector<16x96xf32>
    %c0_12 = arith.constant 0 : index
    %c0_13 = arith.constant 0 : index
    %29 = vector.load %arg4[%c0_12, %c0_13] : memref<32x96xbf16, #tpu.memory_space<vmem>>, vector<32x96xbf16>
    %cst_14 = arith.constant dense<0.000000e+00> : vector<16x96xf32>
    %30 = tpu.matmul %27, %29, %cst_14 {dimension_numbers = #tpu.dot_dimension_numbers<[1], [0], [0], [1], [0, 0, 1, 1], [], []>} : vector<16x32xbf16>, vector<32x96xbf16>, vector<16x96xf32> -> vector<16x96xf32>
    %31 = arith.addf %28, %30 : vector<16x96xf32>
    %c0_15 = arith.constant 0 : index
    %c0_16 = arith.constant 0 : index
    %32 = vector.load %arg9[%c0_15, %c0_16] : memref<16x96xf32, #tpu.memory_space<vmem>>, vector<16x96xf32>
    tpu.vector_store %arg9[%c0_15, %c0_16], %31 {strides = array<i32>} : memref<16x96xf32, #tpu.memory_space<vmem>>, vector<16x96xf32>,
    %c0_i32_17 = arith.constant 0 : i32
    %33 = arith.cmpi eq, %arg2, %c0_i32_17 : i32
    %34 = arith.extui %33 : i1 to i32
    %c0_i32_18 = arith.constant 0 : i32
    %35 = arith.cmpi ne, %34, %c0_i32_18 : i32
    scf.if %35 {
      %c0_19 = arith.constant 0 : index
      %c0_20 = arith.constant 0 : index
      %36 = vector.load %arg9[%c0_19, %c0_20] : memref<16x96xf32, #tpu.memory_space<vmem>>, vector<16x96xf32>
      %c0_21 = arith.constant 0 : index
      %c0_22 = arith.constant 0 : index
      %37 = vector.load %arg7[%c0_21, %c0_22] : memref<1x96xf32, #tpu.memory_space<vmem>>, vector<1x96xf32>
      %38 = vector.broadcast %37 : vector<1x96xf32> to vector<16x96xf32>
      %39 = arith.addf %36, %38 : vector<16x96xf32>
      %40 = arith.truncf %39 : vector<16x96xf32> to vector<16x96xbf16>
      %c0_23 = arith.constant 0 : index
      %c0_24 = arith.constant 0 : index
      %41 = vector.load %arg8[%c0_23, %c0_24] : memref<16x96xbf16, #tpu.memory_space<vmem>>, vector<16x96xbf16>
      tpu.vector_store %arg8[%c0_23, %c0_24], %40 {strides = array<i32>} : memref<16x96xbf16, #tpu.memory_space<vmem>>, vector<16x96xbf16>,
    } else {
    }
    return
  }
  func.func @transform_0(%arg0: i32, %arg1: i32, %arg2: i32) -> (i32, i32) {
    %c0_i32 = arith.constant 0 : i32
    return %arg0, %arg2 : i32, i32
  }
  func.func @transform_1(%arg0: i32, %arg1: i32, %arg2: i32) -> (i32, i32) {
    %c0_i32 = arith.constant 0 : i32
    return %arg2, %arg1 : i32, i32
  }
  func.func @transform_2(%arg0: i32, %arg1: i32, %arg2: i32) -> (i32, i32) {
    %c0_i32 = arith.constant 0 : i32
    %c0_i32_0 = arith.constant 0 : i32
    %c0_i32_1 = arith.constant 0 : i32
    return %c0_i32, %c0_i32_0 : i32, i32
  }
  func.func @transform_3(%arg0: i32, %arg1: i32, %arg2: i32) -> (i32, i32) {
    %c0_i32 = arith.constant 0 : i32
    %c0_i32_0 = arith.constant 0 : i32
    %c0_i32_1 = arith.constant 0 : i32
    return %c0_i32, %c0_i32_0 : i32, i32
  }
  func.func @transform_4(%arg0: i32, %arg1: i32, %arg2: i32) -> (i32, i32) {
    %c0_i32 = arith.constant 0 : i32
    %c0_i32_0 = arith.constant 0 : i32
    return %c0_i32, %arg1 : i32, i32
  }
  func.func @transform_5(%arg0: i32, %arg1: i32, %arg2: i32) -> (i32, i32) {
    %c0_i32 = arith.constant 0 : i32
    return %arg0, %arg1 : i32, i32
  }
}

module attributes {stable_mosaic.version = 11 : i64} {
  func.func @_fused_linear_kernel(%arg0: i32, %arg1: i32, %arg2: i32, %arg3: memref<16x32xbf16, #tpu.memory_space<vmem>>, %arg4: memref<32x32xbf16, #tpu.memory_space<vmem>>, %arg5: memref<16x32xbf16, #tpu.memory_space<vmem>>, %arg6: memref<16x32xf32, #tpu.memory_space<vmem>>) attributes {dimension_semantics = [#tpu.dimension_semantics<parallel>, #tpu.dimension_semantics<parallel>, #tpu.dimension_semantics<arbitrary>], iteration_bounds = array<i64: 1, 1, 1>, scalar_prefetch = 0 : i64, scratch_operands = 1 : i64, tpu.core_type = #tpu.core_type<tc>, window_params = [{transform_indices = @transform_0, window_bounds = array<i64: 16, 32>}, {transform_indices = @transform_1, window_bounds = array<i64: 32, 32>}, {transform_indices = @transform_2, window_bounds = array<i64: 16, 32>}]} {
    %c0_i32 = arith.constant 0 : i32
    %0 = arith.cmpi eq, %arg2, %c0_i32 : i32
    %1 = arith.extui %0 : i1 to i32
    %c0_i32_0 = arith.constant 0 : i32
    %2 = arith.cmpi ne, %1, %c0_i32_0 : i32
    scf.if %2 {
      %cst_10 = arith.constant 0.000000e+00 : f32
      %12 = vector.broadcast %cst_10 : f32 to vector<16x32xf32>
      %c0_11 = arith.constant 0 : index
      %c0_12 = arith.constant 0 : index
      %13 = vector.load %arg6[%c0_11, %c0_12] : memref<16x32xf32, #tpu.memory_space<vmem>>, vector<16x32xf32>
      tpu.vector_store %arg6[%c0_11, %c0_12], %12 {strides = array<i32>} : memref<16x32xf32, #tpu.memory_space<vmem>>, vector<16x32xf32>,
    } else {
    }
    %c0 = arith.constant 0 : index
    %c0_1 = arith.constant 0 : index
    %3 = vector.load %arg3[%c0, %c0_1] : memref<16x32xbf16, #tpu.memory_space<vmem>>, vector<16x32xbf16>
    %c0_2 = arith.constant 0 : index
    %c0_3 = arith.constant 0 : index
    %4 = vector.load %arg6[%c0_2, %c0_3] : memref<16x32xf32, #tpu.memory_space<vmem>>, vector<16x32xf32>
    %c0_4 = arith.constant 0 : index
    %c0_5 = arith.constant 0 : index
    %5 = vector.load %arg4[%c0_4, %c0_5] : memref<32x32xbf16, #tpu.memory_space<vmem>>, vector<32x32xbf16>
    %cst = arith.constant dense<0.000000e+00> : vector<16x32xf32>
    %6 = tpu.matmul %3, %5, %cst {dimension_numbers = #tpu.dot_dimension_numbers<[1], [0], [0], [1], [0, 0, 1, 1], [], []>} : vector<16x32xbf16>, vector<32x32xbf16>, vector<16x32xf32> -> vector<16x32xf32>
    %7 = arith.addf %4, %6 : vector<16x32xf32>
    %c0_6 = arith.constant 0 : index
    %c0_7 = arith.constant 0 : index
    %8 = vector.load %arg6[%c0_6, %c0_7] : memref<16x32xf32, #tpu.memory_space<vmem>>, vector<16x32xf32>
    tpu.vector_store %arg6[%c0_6, %c0_7], %7 {strides = array<i32>} : memref<16x32xf32, #tpu.memory_space<vmem>>, vector<16x32xf32>,
    %c0_i32_8 = arith.constant 0 : i32
    %9 = arith.cmpi eq, %arg2, %c0_i32_8 : i32
    %10 = arith.extui %9 : i1 to i32
    %c0_i32_9 = arith.constant 0 : i32
    %11 = arith.cmpi ne, %10, %c0_i32_9 : i32
    scf.if %11 {
      %c0_10 = arith.constant 0 : index
      %c0_11 = arith.constant 0 : index
      %12 = vector.load %arg6[%c0_10, %c0_11] : memref<16x32xf32, #tpu.memory_space<vmem>>, vector<16x32xf32>
      %13 = arith.truncf %12 : vector<16x32xf32> to vector<16x32xbf16>
      %c0_12 = arith.constant 0 : index
      %c0_13 = arith.constant 0 : index
      %14 = vector.load %arg5[%c0_12, %c0_13] : memref<16x32xbf16, #tpu.memory_space<vmem>>, vector<16x32xbf16>
      tpu.vector_store %arg5[%c0_12, %c0_13], %13 {strides = array<i32>} : memref<16x32xbf16, #tpu.memory_space<vmem>>, vector<16x32xbf16>,
    } else {
    }
    return
  }
  func.func @transform_0(%arg0: i32, %arg1: i32, %arg2: i32) -> (i32, i32) {
    %c0_i32 = arith.constant 0 : i32
    return %arg0, %arg2 : i32, i32
  }
  func.func @transform_1(%arg0: i32, %arg1: i32, %arg2: i32) -> (i32, i32) {
    %c0_i32 = arith.constant 0 : i32
    return %arg2, %arg1 : i32, i32
  }
  func.func @transform_2(%arg0: i32, %arg1: i32, %arg2: i32) -> (i32, i32) {
    %c0_i32 = arith.constant 0 : i32
    return %arg0, %arg1 : i32, i32
  }
}

module attributes {stable_mosaic.version = 11 : i64} {
  func.func @_attn_kernel(%arg0: i32, %arg1: memref<1x5x96xbf16, #tpu.memory_space<vmem>>, %arg2: memref<9x32xbf16, #tpu.memory_space<vmem>>, %arg3: memref<4x8xf32, #tpu.memory_space<vmem>>, %arg4: memref<4x8xf32, #tpu.memory_space<vmem>>, %arg5: memref<1x1x5xf32, #tpu.memory_space<vmem>>, %arg6: memref<1x5x32xbf16, #tpu.memory_space<vmem>>) attributes {dimension_semantics = [#tpu.dimension_semantics<parallel>], iteration_bounds = array<i64: 2>, scalar_prefetch = 0 : i64, scratch_operands = 0 : i64, tpu.core_type = #tpu.core_type<tc>, window_params = [{transform_indices = @transform_0, window_bounds = array<i64: 1, 5, 96>}, {pipeline_mode = #tpu.pipeline_mode<synchronous>, transform_indices = @transform_1, window_bounds = array<i64: 9, 32>}, {pipeline_mode = #tpu.pipeline_mode<synchronous>, transform_indices = @transform_2, window_bounds = array<i64: 4, 8>}, {pipeline_mode = #tpu.pipeline_mode<synchronous>, transform_indices = @transform_3, window_bounds = array<i64: 4, 8>}, {transform_indices = @transform_4, window_bounds = array<i64: 1, 1, 5>}, {transform_indices = @transform_5, window_bounds = array<i64: 1, 5, 32>}]} {
    %c0 = arith.constant 0 : index
    %c0_0 = arith.constant 0 : index
    %c0_1 = arith.constant 0 : index
    %0 = vector.load %arg5[%c0, %c0_0, %c0_1] : memref<1x1x5xf32, #tpu.memory_space<vmem>>, vector<1x1x5xf32>
    %1 = vector.shape_cast %0 : vector<1x1x5xf32> to vector<1x5xf32>
    %c0_2 = arith.constant 0 : index
    %c0_3 = arith.constant 0 : index
    %c0_4 = arith.constant 0 : index
    %2 = vector.load %arg1[%c0_2, %c0_3, %c0_4] : memref<1x5x96xbf16, #tpu.memory_space<vmem>>, vector<1x5x8xbf16>
    %3 = vector.shape_cast %2 : vector<1x5x8xbf16> to vector<5x8xbf16>
    %4 = arith.extf %3 : vector<5x8xbf16> to vector<5x8xf32>
    %c0_5 = arith.constant 0 : index
    %c0_6 = arith.constant 0 : index
    %c32 = arith.constant 32 : index
    %5 = vector.load %arg1[%c0_5, %c0_6, %c32] : memref<1x5x96xbf16, #tpu.memory_space<vmem>>, vector<1x5x8xbf16>
    %6 = vector.shape_cast %5 : vector<1x5x8xbf16> to vector<5x8xbf16>
    %c0_7 = arith.constant 0 : index
    %c0_8 = arith.constant 0 : index
    %c64 = arith.constant 64 : index
    %7 = vector.load %arg1[%c0_7, %c0_8, %c64] : memref<1x5x96xbf16, #tpu.memory_space<vmem>>, vector<1x5x8xbf16>
    %8 = vector.shape_cast %7 : vector<1x5x8xbf16> to vector<5x8xbf16>
    %c0_9 = arith.constant 0 : index
    %c0_10 = arith.constant 0 : index
    %9 = vector.load %arg2[%c0_9, %c0_10] : memref<9x32xbf16, #tpu.memory_space<vmem>>, vector<9x8xbf16>
    %c0_11 = arith.constant 0 : index
    %c0_12 = arith.constant 0 : index
    %10 = vector.load %arg3[%c0_11, %c0_12] : memref<4x8xf32, #tpu.memory_space<vmem>>, vector<1x8xf32>
    %11 = vector.broadcast %10 : vector<1x8xf32> to vector<5x8xf32>
    %12 = arith.addf %4, %11 : vector<5x8xf32>
    %13 = arith.truncf %12 : vector<5x8xf32> to vector<5x8xbf16>
    %c0_13 = arith.constant 0 : index
    %c0_14 = arith.constant 0 : index
    %14 = vector.load %arg4[%c0_13, %c0_14] : memref<4x8xf32, #tpu.memory_space<vmem>>, vector<1x8xf32>
    %15 = vector.broadcast %14 : vector<1x8xf32> to vector<5x8xf32>
    %16 = arith.addf %4, %15 : vector<5x8xf32>
    %17 = arith.truncf %16 : vector<5x8xf32> to vector<5x8xbf16>
    %cst = arith.constant dense<0.000000e+00> : vector<5x5xf32>
    %18 = tpu.matmul %13, %6, %cst {dimension_numbers = #tpu.dot_dimension_numbers<[1], [1], [0], [0], [0, 0, 1, 0], [], []>} : vector<5x8xbf16>, vector<5x8xbf16>, vector<5x5xf32> -> vector<5x5xf32>
    %cst_15 = arith.constant dense<0.000000e+00> : vector<5x9xf32>
    %19 = tpu.matmul %17, %9, %cst_15 {dimension_numbers = #tpu.dot_dimension_numbers<[1], [1], [0], [0], [0, 0, 1, 0], [], []>} : vector<5x8xbf16>, vector<9x8xbf16>, vector<5x9xf32> -> vector<5x9xf32>
    %20 = vector.extract_strided_slice %19 {offsets = [0, 4], sizes = [1, 5], strides = [1, 1]} : vector<5x9xf32> to vector<1x5xf32>
    %21 = vector.extract_strided_slice %19 {offsets = [1, 3], sizes = [1, 5], strides = [1, 1]} : vector<5x9xf32> to vector<1x5xf32>
    %22 = vector.extract_strided_slice %19 {offsets = [2, 2], sizes = [1, 5], strides = [1, 1]} : vector<5x9xf32> to vector<1x5xf32>
    %23 = vector.extract_strided_slice %19 {offsets = [3, 1], sizes = [1, 5], strides = [1, 1]} : vector<5x9xf32> to vector<1x5xf32>
    %24 = vector.extract_strided_slice %19 {offsets = [4, 0], sizes = [1, 5], strides = [1, 1]} : vector<5x9xf32> to vector<1x5xf32>
    %25 = tpu.concatenate %20, %21, %22, %23, %24 in 0 : vector<1x5xf32>, vector<1x5xf32>, vector<1x5xf32>, vector<1x5xf32>, vector<1x5xf32> -> vector<5x5xf32>
    %26 = arith.addf %18, %25 : vector<5x5xf32>
    %cst_16 = arith.constant 0.353553385 : f32
    %27 = vector.broadcast %cst_16 : f32 to vector<5x5xf32>
    %28 = arith.mulf %26, %27 : vector<5x5xf32>
    %cst_17 = arith.constant 0.000000e+00 : f32
    %29 = vector.broadcast %cst_17 : f32 to vector<1x5xf32>
    %30 = arith.cmpf ogt, %1, %29 : vector<1x5xf32>
    %cst_18 = arith.constant -1.000000e+30 : f32
    %31 = vector.shape_cast %30 : vector<1x5xi1> to vector<1x5xi1>
    %32 = vector.broadcast %31 : vector<1x5xi1> to vector<5x5xi1>
    %33 = vector.broadcast %cst_18 : f32 to vector<5x5xf32>
    %34 = arith.select %32, %28, %33 : vector<5x5xi1>, vector<5x5xf32>
    %cst_19 = arith.constant dense<0xFF800000> : vector<5xf32>
    %35 = vector.multi_reduction <maximumf>, %34, %cst_19 [1] : vector<5x5xf32> to vector<5xf32>
    %36 = vector.shape_cast %35 : vector<5xf32> to vector<5x1xf32>
    %37 = vector.broadcast %36 : vector<5x1xf32> to vector<5x5xf32>
    %38 = arith.subf %34, %37 : vector<5x5xf32>
    %39 = math.exp %38 : vector<5x5xf32>
    %cst_20 = arith.constant dense<0.000000e+00> : vector<5xf32>
    %40 = vector.multi_reduction <add>, %39, %cst_20 [1] : vector<5x5xf32> to vector<5xf32>
    %41 = vector.shape_cast %40 : vector<5xf32> to vector<5x1xf32>
    %42 = vector.broadcast %41 : vector<5x1xf32> to vector<5x5xf32>
    %43 = arith.divf %39, %42 : vector<5x5xf32>
    %cst_21 = arith.constant 0.000000e+00 : f32
    %44 = vector.broadcast %cst_21 : f32 to vector<1x5xf32>
    %45 = arith.cmpf ogt, %1, %44 : vector<1x5xf32>
    %cst_22 = arith.constant 0.000000e+00 : f32
    %46 = vector.shape_cast %45 : vector<1x5xi1> to vector<1x5xi1>
    %47 = vector.broadcast %46 : vector<1x5xi1> to vector<5x5xi1>
    %48 = vector.broadcast %cst_22 : f32 to vector<5x5xf32>
    %49 = arith.select %47, %43, %48 : vector<5x5xi1>, vector<5x5xf32>
    %50 = arith.truncf %49 : vector<5x5xf32> to vector<5x5xbf16>
    %cst_23 = arith.constant dense<0.000000e+00> : vector<5x8xf32>
    %51 = tpu.matmul %50, %8, %cst_23 {dimension_numbers = #tpu.dot_dimension_numbers<[1], [0], [0], [1], [0, 0, 1, 1], [], []>} : vector<5x5xbf16>, vector<5x8xbf16>, vector<5x8xf32> -> vector<5x8xf32>
    %c0_24 = arith.constant 0 : index
    %c0_25 = arith.constant 0 : index
    %c8 = arith.constant 8 : index
    %52 = vector.load %arg1[%c0_24, %c0_25, %c8] : memref<1x5x96xbf16, #tpu.memory_space<vmem>>, vector<1x5x8xbf16>
    %53 = vector.shape_cast %52 : vector<1x5x8xbf16> to vector<5x8xbf16>
    %54 = arith.extf %53 : vector<5x8xbf16> to vector<5x8xf32>
    %c0_26 = arith.constant 0 : index
    %c0_27 = arith.constant 0 : index
    %c40 = arith.constant 40 : index
    %55 = vector.load %arg1[%c0_26, %c0_27, %c40] : memref<1x5x96xbf16, #tpu.memory_space<vmem>>, vector<1x5x8xbf16>
    %56 = vector.shape_cast %55 : vector<1x5x8xbf16> to vector<5x8xbf16>
    %c0_28 = arith.constant 0 : index
    %c0_29 = arith.constant 0 : index
    %c72 = arith.constant 72 : index
    %57 = vector.load %arg1[%c0_28, %c0_29, %c72] : memref<1x5x96xbf16, #tpu.memory_space<vmem>>, vector<1x5x8xbf16>
    %58 = vector.shape_cast %57 : vector<1x5x8xbf16> to vector<5x8xbf16>
    %c0_30 = arith.constant 0 : index
    %c8_31 = arith.constant 8 : index
    %59 = vector.load %arg2[%c0_30, %c8_31] : memref<9x32xbf16, #tpu.memory_space<vmem>>, vector<9x8xbf16>
    %c1 = arith.constant 1 : index
    %c0_32 = arith.constant 0 : index
    %60 = vector.load %arg3[%c1, %c0_32] : memref<4x8xf32, #tpu.memory_space<vmem>>, vector<1x8xf32>
    %61 = vector.broadcast %60 : vector<1x8xf32> to vector<5x8xf32>
    %62 = arith.addf %54, %61 : vector<5x8xf32>
    %63 = arith.truncf %62 : vector<5x8xf32> to vector<5x8xbf16>
    %c1_33 = arith.constant 1 : index
    %c0_34 = arith.constant 0 : index
    %64 = vector.load %arg4[%c1_33, %c0_34] : memref<4x8xf32, #tpu.memory_space<vmem>>, vector<1x8xf32>
    %65 = vector.broadcast %64 : vector<1x8xf32> to vector<5x8xf32>
    %66 = arith.addf %54, %65 : vector<5x8xf32>
    %67 = arith.truncf %66 : vector<5x8xf32> to vector<5x8xbf16>
    %cst_35 = arith.constant dense<0.000000e+00> : vector<5x5xf32>
    %68 = tpu.matmul %63, %56, %cst_35 {dimension_numbers = #tpu.dot_dimension_numbers<[1], [1], [0], [0], [0, 0, 1, 0], [], []>} : vector<5x8xbf16>, vector<5x8xbf16>, vector<5x5xf32> -> vector<5x5xf32>
    %cst_36 = arith.constant dense<0.000000e+00> : vector<5x9xf32>
    %69 = tpu.matmul %67, %59, %cst_36 {dimension_numbers = #tpu.dot_dimension_numbers<[1], [1], [0], [0], [0, 0, 1, 0], [], []>} : vector<5x8xbf16>, vector<9x8xbf16>, vector<5x9xf32> -> vector<5x9xf32>
    %70 = vector.extract_strided_slice %69 {offsets = [0, 4], sizes = [1, 5], strides = [1, 1]} : vector<5x9xf32> to vector<1x5xf32>
    %71 = vector.extract_strided_slice %69 {offsets = [1, 3], sizes = [1, 5], strides = [1, 1]} : vector<5x9xf32> to vector<1x5xf32>
    %72 = vector.extract_strided_slice %69 {offsets = [2, 2], sizes = [1, 5], strides = [1, 1]} : vector<5x9xf32> to vector<1x5xf32>
    %73 = vector.extract_strided_slice %69 {offsets = [3, 1], sizes = [1, 5], strides = [1, 1]} : vector<5x9xf32> to vector<1x5xf32>
    %74 = vector.extract_strided_slice %69 {offsets = [4, 0], sizes = [1, 5], strides = [1, 1]} : vector<5x9xf32> to vector<1x5xf32>
    %75 = tpu.concatenate %70, %71, %72, %73, %74 in 0 : vector<1x5xf32>, vector<1x5xf32>, vector<1x5xf32>, vector<1x5xf32>, vector<1x5xf32> -> vector<5x5xf32>
    %76 = arith.addf %68, %75 : vector<5x5xf32>
    %cst_37 = arith.constant 0.353553385 : f32
    %77 = vector.broadcast %cst_37 : f32 to vector<5x5xf32>
    %78 = arith.mulf %76, %77 : vector<5x5xf32>
    %cst_38 = arith.constant 0.000000e+00 : f32
    %79 = vector.broadcast %cst_38 : f32 to vector<1x5xf32>
    %80 = arith.cmpf ogt, %1, %79 : vector<1x5xf32>
    %cst_39 = arith.constant -1.000000e+30 : f32
    %81 = vector.shape_cast %80 : vector<1x5xi1> to vector<1x5xi1>
    %82 = vector.broadcast %81 : vector<1x5xi1> to vector<5x5xi1>
    %83 = vector.broadcast %cst_39 : f32 to vector<5x5xf32>
    %84 = arith.select %82, %78, %83 : vector<5x5xi1>, vector<5x5xf32>
    %cst_40 = arith.constant dense<0xFF800000> : vector<5xf32>
    %85 = vector.multi_reduction <maximumf>, %84, %cst_40 [1] : vector<5x5xf32> to vector<5xf32>
    %86 = vector.shape_cast %85 : vector<5xf32> to vector<5x1xf32>
    %87 = vector.broadcast %86 : vector<5x1xf32> to vector<5x5xf32>
    %88 = arith.subf %84, %87 : vector<5x5xf32>
    %89 = math.exp %88 : vector<5x5xf32>
    %cst_41 = arith.constant dense<0.000000e+00> : vector<5xf32>
    %90 = vector.multi_reduction <add>, %89, %cst_41 [1] : vector<5x5xf32> to vector<5xf32>
    %91 = vector.shape_cast %90 : vector<5xf32> to vector<5x1xf32>
    %92 = vector.broadcast %91 : vector<5x1xf32> to vector<5x5xf32>
    %93 = arith.divf %89, %92 : vector<5x5xf32>
    %cst_42 = arith.constant 0.000000e+00 : f32
    %94 = vector.broadcast %cst_42 : f32 to vector<1x5xf32>
    %95 = arith.cmpf ogt, %1, %94 : vector<1x5xf32>
    %cst_43 = arith.constant 0.000000e+00 : f32
    %96 = vector.shape_cast %95 : vector<1x5xi1> to vector<1x5xi1>
    %97 = vector.broadcast %96 : vector<1x5xi1> to vector<5x5xi1>
    %98 = vector.broadcast %cst_43 : f32 to vector<5x5xf32>
    %99 = arith.select %97, %93, %98 : vector<5x5xi1>, vector<5x5xf32>
    %100 = arith.truncf %99 : vector<5x5xf32> to vector<5x5xbf16>
    %cst_44 = arith.constant dense<0.000000e+00> : vector<5x8xf32>
    %101 = tpu.matmul %100, %58, %cst_44 {dimension_numbers = #tpu.dot_dimension_numbers<[1], [0], [0], [1], [0, 0, 1, 1], [], []>} : vector<5x5xbf16>, vector<5x8xbf16>, vector<5x8xf32> -> vector<5x8xf32>
    %c0_45 = arith.constant 0 : index
    %c0_46 = arith.constant 0 : index
    %c16 = arith.constant 16 : index
    %102 = vector.load %arg1[%c0_45, %c0_46, %c16] : memref<1x5x96xbf16, #tpu.memory_space<vmem>>, vector<1x5x8xbf16>
    %103 = vector.shape_cast %102 : vector<1x5x8xbf16> to vector<5x8xbf16>
    %104 = arith.extf %103 : vector<5x8xbf16> to vector<5x8xf32>
    %c0_47 = arith.constant 0 : index
    %c0_48 = arith.constant 0 : index
    %c48 = arith.constant 48 : index
    %105 = vector.load %arg1[%c0_47, %c0_48, %c48] : memref<1x5x96xbf16, #tpu.memory_space<vmem>>, vector<1x5x8xbf16>
    %106 = vector.shape_cast %105 : vector<1x5x8xbf16> to vector<5x8xbf16>
    %c0_49 = arith.constant 0 : index
    %c0_50 = arith.constant 0 : index
    %c80 = arith.constant 80 : index
    %107 = vector.load %arg1[%c0_49, %c0_50, %c80] : memref<1x5x96xbf16, #tpu.memory_space<vmem>>, vector<1x5x8xbf16>
    %108 = vector.shape_cast %107 : vector<1x5x8xbf16> to vector<5x8xbf16>
    %c0_51 = arith.constant 0 : index
    %c16_52 = arith.constant 16 : index
    %109 = vector.load %arg2[%c0_51, %c16_52] : memref<9x32xbf16, #tpu.memory_space<vmem>>, vector<9x8xbf16>
    %c2 = arith.constant 2 : index
    %c0_53 = arith.constant 0 : index
    %110 = vector.load %arg3[%c2, %c0_53] : memref<4x8xf32, #tpu.memory_space<vmem>>, vector<1x8xf32>
    %111 = vector.broadcast %110 : vector<1x8xf32> to vector<5x8xf32>
    %112 = arith.addf %104, %111 : vector<5x8xf32>
    %113 = arith.truncf %112 : vector<5x8xf32> to vector<5x8xbf16>
    %c2_54 = arith.constant 2 : index
    %c0_55 = arith.constant 0 : index
    %114 = vector.load %arg4[%c2_54, %c0_55] : memref<4x8xf32, #tpu.memory_space<vmem>>, vector<1x8xf32>
    %115 = vector.broadcast %114 : vector<1x8xf32> to vector<5x8xf32>
    %116 = arith.addf %104, %115 : vector<5x8xf32>
    %117 = arith.truncf %116 : vector<5x8xf32> to vector<5x8xbf16>
    %cst_56 = arith.constant dense<0.000000e+00> : vector<5x5xf32>
    %118 = tpu.matmul %113, %106, %cst_56 {dimension_numbers = #tpu.dot_dimension_numbers<[1], [1], [0], [0], [0, 0, 1, 0], [], []>} : vector<5x8xbf16>, vector<5x8xbf16>, vector<5x5xf32> -> vector<5x5xf32>
    %cst_57 = arith.constant dense<0.000000e+00> : vector<5x9xf32>
    %119 = tpu.matmul %117, %109, %cst_57 {dimension_numbers = #tpu.dot_dimension_numbers<[1], [1], [0], [0], [0, 0, 1, 0], [], []>} : vector<5x8xbf16>, vector<9x8xbf16>, vector<5x9xf32> -> vector<5x9xf32>
    %120 = vector.extract_strided_slice %119 {offsets = [0, 4], sizes = [1, 5], strides = [1, 1]} : vector<5x9xf32> to vector<1x5xf32>
    %121 = vector.extract_strided_slice %119 {offsets = [1, 3], sizes = [1, 5], strides = [1, 1]} : vector<5x9xf32> to vector<1x5xf32>
    %122 = vector.extract_strided_slice %119 {offsets = [2, 2], sizes = [1, 5], strides = [1, 1]} : vector<5x9xf32> to vector<1x5xf32>
    %123 = vector.extract_strided_slice %119 {offsets = [3, 1], sizes = [1, 5], strides = [1, 1]} : vector<5x9xf32> to vector<1x5xf32>
    %124 = vector.extract_strided_slice %119 {offsets = [4, 0], sizes = [1, 5], strides = [1, 1]} : vector<5x9xf32> to vector<1x5xf32>
    %125 = tpu.concatenate %120, %121, %122, %123, %124 in 0 : vector<1x5xf32>, vector<1x5xf32>, vector<1x5xf32>, vector<1x5xf32>, vector<1x5xf32> -> vector<5x5xf32>
    %126 = arith.addf %118, %125 : vector<5x5xf32>
    %cst_58 = arith.constant 0.353553385 : f32
    %127 = vector.broadcast %cst_58 : f32 to vector<5x5xf32>
    %128 = arith.mulf %126, %127 : vector<5x5xf32>
    %cst_59 = arith.constant 0.000000e+00 : f32
    %129 = vector.broadcast %cst_59 : f32 to vector<1x5xf32>
    %130 = arith.cmpf ogt, %1, %129 : vector<1x5xf32>
    %cst_60 = arith.constant -1.000000e+30 : f32
    %131 = vector.shape_cast %130 : vector<1x5xi1> to vector<1x5xi1>
    %132 = vector.broadcast %131 : vector<1x5xi1> to vector<5x5xi1>
    %133 = vector.broadcast %cst_60 : f32 to vector<5x5xf32>
    %134 = arith.select %132, %128, %133 : vector<5x5xi1>, vector<5x5xf32>
    %cst_61 = arith.constant dense<0xFF800000> : vector<5xf32>
    %135 = vector.multi_reduction <maximumf>, %134, %cst_61 [1] : vector<5x5xf32> to vector<5xf32>
    %136 = vector.shape_cast %135 : vector<5xf32> to vector<5x1xf32>
    %137 = vector.broadcast %136 : vector<5x1xf32> to vector<5x5xf32>
    %138 = arith.subf %134, %137 : vector<5x5xf32>
    %139 = math.exp %138 : vector<5x5xf32>
    %cst_62 = arith.constant dense<0.000000e+00> : vector<5xf32>
    %140 = vector.multi_reduction <add>, %139, %cst_62 [1] : vector<5x5xf32> to vector<5xf32>
    %141 = vector.shape_cast %140 : vector<5xf32> to vector<5x1xf32>
    %142 = vector.broadcast %141 : vector<5x1xf32> to vector<5x5xf32>
    %143 = arith.divf %139, %142 : vector<5x5xf32>
    %cst_63 = arith.constant 0.000000e+00 : f32
    %144 = vector.broadcast %cst_63 : f32 to vector<1x5xf32>
    %145 = arith.cmpf ogt, %1, %144 : vector<1x5xf32>
    %cst_64 = arith.constant 0.000000e+00 : f32
    %146 = vector.shape_cast %145 : vector<1x5xi1> to vector<1x5xi1>
    %147 = vector.broadcast %146 : vector<1x5xi1> to vector<5x5xi1>
    %148 = vector.broadcast %cst_64 : f32 to vector<5x5xf32>
    %149 = arith.select %147, %143, %148 : vector<5x5xi1>, vector<5x5xf32>
    %150 = arith.truncf %149 : vector<5x5xf32> to vector<5x5xbf16>
    %cst_65 = arith.constant dense<0.000000e+00> : vector<5x8xf32>
    %151 = tpu.matmul %150, %108, %cst_65 {dimension_numbers = #tpu.dot_dimension_numbers<[1], [0], [0], [1], [0, 0, 1, 1], [], []>} : vector<5x5xbf16>, vector<5x8xbf16>, vector<5x8xf32> -> vector<5x8xf32>
    %c0_66 = arith.constant 0 : index
    %c0_67 = arith.constant 0 : index
    %c24 = arith.constant 24 : index
    %152 = vector.load %arg1[%c0_66, %c0_67, %c24] : memref<1x5x96xbf16, #tpu.memory_space<vmem>>, vector<1x5x8xbf16>
    %153 = vector.shape_cast %152 : vector<1x5x8xbf16> to vector<5x8xbf16>
    %154 = arith.extf %153 : vector<5x8xbf16> to vector<5x8xf32>
    %c0_68 = arith.constant 0 : index
    %c0_69 = arith.constant 0 : index
    %c56 = arith.constant 56 : index
    %155 = vector.load %arg1[%c0_68, %c0_69, %c56] : memref<1x5x96xbf16, #tpu.memory_space<vmem>>, vector<1x5x8xbf16>
    %156 = vector.shape_cast %155 : vector<1x5x8xbf16> to vector<5x8xbf16>
    %c0_70 = arith.constant 0 : index
    %c0_71 = arith.constant 0 : index
    %c88 = arith.constant 88 : index
    %157 = vector.load %arg1[%c0_70, %c0_71, %c88] : memref<1x5x96xbf16, #tpu.memory_space<vmem>>, vector<1x5x8xbf16>
    %158 = vector.shape_cast %157 : vector<1x5x8xbf16> to vector<5x8xbf16>
    %c0_72 = arith.constant 0 : index
    %c24_73 = arith.constant 24 : index
    %159 = vector.load %arg2[%c0_72, %c24_73] : memref<9x32xbf16, #tpu.memory_space<vmem>>, vector<9x8xbf16>
    %c3 = arith.constant 3 : index
    %c0_74 = arith.constant 0 : index
    %160 = vector.load %arg3[%c3, %c0_74] : memref<4x8xf32, #tpu.memory_space<vmem>>, vector<1x8xf32>
    %161 = vector.broadcast %160 : vector<1x8xf32> to vector<5x8xf32>
    %162 = arith.addf %154, %161 : vector<5x8xf32>
    %163 = arith.truncf %162 : vector<5x8xf32> to vector<5x8xbf16>
    %c3_75 = arith.constant 3 : index
    %c0_76 = arith.constant 0 : index
    %164 = vector.load %arg4[%c3_75, %c0_76] : memref<4x8xf32, #tpu.memory_space<vmem>>, vector<1x8xf32>
    %165 = vector.broadcast %164 : vector<1x8xf32> to vector<5x8xf32>
    %166 = arith.addf %154, %165 : vector<5x8xf32>
    %167 = arith.truncf %166 : vector<5x8xf32> to vector<5x8xbf16>
    %cst_77 = arith.constant dense<0.000000e+00> : vector<5x5xf32>
    %168 = tpu.matmul %163, %156, %cst_77 {dimension_numbers = #tpu.dot_dimension_numbers<[1], [1], [0], [0], [0, 0, 1, 0], [], []>} : vector<5x8xbf16>, vector<5x8xbf16>, vector<5x5xf32> -> vector<5x5xf32>
    %cst_78 = arith.constant dense<0.000000e+00> : vector<5x9xf32>
    %169 = tpu.matmul %167, %159, %cst_78 {dimension_numbers = #tpu.dot_dimension_numbers<[1], [1], [0], [0], [0, 0, 1, 0], [], []>} : vector<5x8xbf16>, vector<9x8xbf16>, vector<5x9xf32> -> vector<5x9xf32>
    %170 = vector.extract_strided_slice %169 {offsets = [0, 4], sizes = [1, 5], strides = [1, 1]} : vector<5x9xf32> to vector<1x5xf32>
    %171 = vector.extract_strided_slice %169 {offsets = [1, 3], sizes = [1, 5], strides = [1, 1]} : vector<5x9xf32> to vector<1x5xf32>
    %172 = vector.extract_strided_slice %169 {offsets = [2, 2], sizes = [1, 5], strides = [1, 1]} : vector<5x9xf32> to vector<1x5xf32>
    %173 = vector.extract_strided_slice %169 {offsets = [3, 1], sizes = [1, 5], strides = [1, 1]} : vector<5x9xf32> to vector<1x5xf32>
    %174 = vector.extract_strided_slice %169 {offsets = [4, 0], sizes = [1, 5], strides = [1, 1]} : vector<5x9xf32> to vector<1x5xf32>
    %175 = tpu.concatenate %170, %171, %172, %173, %174 in 0 : vector<1x5xf32>, vector<1x5xf32>, vector<1x5xf32>, vector<1x5xf32>, vector<1x5xf32> -> vector<5x5xf32>
    %176 = arith.addf %168, %175 : vector<5x5xf32>
    %cst_79 = arith.constant 0.353553385 : f32
    %177 = vector.broadcast %cst_79 : f32 to vector<5x5xf32>
    %178 = arith.mulf %176, %177 : vector<5x5xf32>
    %cst_80 = arith.constant 0.000000e+00 : f32
    %179 = vector.broadcast %cst_80 : f32 to vector<1x5xf32>
    %180 = arith.cmpf ogt, %1, %179 : vector<1x5xf32>
    %cst_81 = arith.constant -1.000000e+30 : f32
    %181 = vector.shape_cast %180 : vector<1x5xi1> to vector<1x5xi1>
    %182 = vector.broadcast %181 : vector<1x5xi1> to vector<5x5xi1>
    %183 = vector.broadcast %cst_81 : f32 to vector<5x5xf32>
    %184 = arith.select %182, %178, %183 : vector<5x5xi1>, vector<5x5xf32>
    %cst_82 = arith.constant dense<0xFF800000> : vector<5xf32>
    %185 = vector.multi_reduction <maximumf>, %184, %cst_82 [1] : vector<5x5xf32> to vector<5xf32>
    %186 = vector.shape_cast %185 : vector<5xf32> to vector<5x1xf32>
    %187 = vector.broadcast %186 : vector<5x1xf32> to vector<5x5xf32>
    %188 = arith.subf %184, %187 : vector<5x5xf32>
    %189 = math.exp %188 : vector<5x5xf32>
    %cst_83 = arith.constant dense<0.000000e+00> : vector<5xf32>
    %190 = vector.multi_reduction <add>, %189, %cst_83 [1] : vector<5x5xf32> to vector<5xf32>
    %191 = vector.shape_cast %190 : vector<5xf32> to vector<5x1xf32>
    %192 = vector.broadcast %191 : vector<5x1xf32> to vector<5x5xf32>
    %193 = arith.divf %189, %192 : vector<5x5xf32>
    %cst_84 = arith.constant 0.000000e+00 : f32
    %194 = vector.broadcast %cst_84 : f32 to vector<1x5xf32>
    %195 = arith.cmpf ogt, %1, %194 : vector<1x5xf32>
    %cst_85 = arith.constant 0.000000e+00 : f32
    %196 = vector.shape_cast %195 : vector<1x5xi1> to vector<1x5xi1>
    %197 = vector.broadcast %196 : vector<1x5xi1> to vector<5x5xi1>
    %198 = vector.broadcast %cst_85 : f32 to vector<5x5xf32>
    %199 = arith.select %197, %193, %198 : vector<5x5xi1>, vector<5x5xf32>
    %200 = arith.truncf %199 : vector<5x5xf32> to vector<5x5xbf16>
    %cst_86 = arith.constant dense<0.000000e+00> : vector<5x8xf32>
    %201 = tpu.matmul %200, %158, %cst_86 {dimension_numbers = #tpu.dot_dimension_numbers<[1], [0], [0], [1], [0, 0, 1, 1], [], []>} : vector<5x5xbf16>, vector<5x8xbf16>, vector<5x8xf32> -> vector<5x8xf32>
    %202 = tpu.concatenate %51, %101, %151, %201 in 1 : vector<5x8xf32>, vector<5x8xf32>, vector<5x8xf32>, vector<5x8xf32> -> vector<5x32xf32>
    %203 = arith.truncf %202 : vector<5x32xf32> to vector<5x32xbf16>
    %c0_87 = arith.constant 0 : index
    %c0_88 = arith.constant 0 : index
    %c0_89 = arith.constant 0 : index
    %204 = vector.load %arg6[%c0_87, %c0_88, %c0_89] : memref<1x5x32xbf16, #tpu.memory_space<vmem>>, vector<1x5x32xbf16>
    %205 = vector.shape_cast %204 : vector<1x5x32xbf16> to vector<5x32xbf16>
    %206 = vector.shape_cast %203 : vector<5x32xbf16> to vector<1x5x32xbf16>
    tpu.vector_store %arg6[%c0_87, %c0_88, %c0_89], %206 {strides = array<i32>} : memref<1x5x32xbf16, #tpu.memory_space<vmem>>, vector<1x5x32xbf16>,
    return
  }
  func.func @transform_0(%arg0: i32) -> (i32, i32, i32) {
    %c0_i32 = arith.constant 0 : i32
    %c0_i32_0 = arith.constant 0 : i32
    %c0_i32_1 = arith.constant 0 : i32
    return %arg0, %c0_i32, %c0_i32_0 : i32, i32, i32
  }
  func.func @transform_1(%arg0: i32) -> (i32, i32) {
    %c0_i32 = arith.constant 0 : i32
    %c0_i32_0 = arith.constant 0 : i32
    %c0_i32_1 = arith.constant 0 : i32
    return %c0_i32, %c0_i32_0 : i32, i32
  }
  func.func @transform_2(%arg0: i32) -> (i32, i32) {
    %c0_i32 = arith.constant 0 : i32
    %c0_i32_0 = arith.constant 0 : i32
    %c0_i32_1 = arith.constant 0 : i32
    return %c0_i32, %c0_i32_0 : i32, i32
  }
  func.func @transform_3(%arg0: i32) -> (i32, i32) {
    %c0_i32 = arith.constant 0 : i32
    %c0_i32_0 = arith.constant 0 : i32
    %c0_i32_1 = arith.constant 0 : i32
    return %c0_i32, %c0_i32_0 : i32, i32
  }
  func.func @transform_4(%arg0: i32) -> (i32, i32, i32) {
    %c0_i32 = arith.constant 0 : i32
    %c0_i32_0 = arith.constant 0 : i32
    %c0_i32_1 = arith.constant 0 : i32
    return %arg0, %c0_i32, %c0_i32_0 : i32, i32, i32
  }
  func.func @transform_5(%arg0: i32) -> (i32, i32, i32) {
    %c0_i32 = arith.constant 0 : i32
    %c0_i32_0 = arith.constant 0 : i32
    %c0_i32_1 = arith.constant 0 : i32
    return %arg0, %c0_i32, %c0_i32_0 : i32, i32, i32
  }
}

module attributes {stable_mosaic.version = 11 : i64} {
  func.func @_fused_linear_kernel(%arg0: i32, %arg1: i32, %arg2: i32, %arg3: memref<16x32xbf16, #tpu.memory_space<vmem>>, %arg4: memref<32x32xbf16, #tpu.memory_space<vmem>>, %arg5: memref<1x32xf32, #tpu.memory_space<vmem>>, %arg6: memref<16x32xbf16, #tpu.memory_space<vmem>>, %arg7: memref<16x32xbf16, #tpu.memory_space<vmem>>, %arg8: memref<16x32xf32, #tpu.memory_space<vmem>>) attributes {dimension_semantics = [#tpu.dimension_semantics<parallel>, #tpu.dimension_semantics<parallel>, #tpu.dimension_semantics<arbitrary>], iteration_bounds = array<i64: 1, 1, 1>, scalar_prefetch = 0 : i64, scratch_operands = 1 : i64, tpu.core_type = #tpu.core_type<tc>, window_params = [{transform_indices = @transform_0, window_bounds = array<i64: 16, 32>}, {transform_indices = @transform_1, window_bounds = array<i64: 32, 32>}, {transform_indices = @transform_2, window_bounds = array<i64: 1, 32>}, {transform_indices = @transform_3, window_bounds = array<i64: 16, 32>}, {transform_indices = @transform_4, window_bounds = array<i64: 16, 32>}]} {
    %c0_i32 = arith.constant 0 : i32
    %0 = arith.cmpi eq, %arg2, %c0_i32 : i32
    %1 = arith.extui %0 : i1 to i32
    %c0_i32_0 = arith.constant 0 : i32
    %2 = arith.cmpi ne, %1, %c0_i32_0 : i32
    scf.if %2 {
      %cst_10 = arith.constant 0.000000e+00 : f32
      %12 = vector.broadcast %cst_10 : f32 to vector<16x32xf32>
      %c0_11 = arith.constant 0 : index
      %c0_12 = arith.constant 0 : index
      %13 = vector.load %arg8[%c0_11, %c0_12] : memref<16x32xf32, #tpu.memory_space<vmem>>, vector<16x32xf32>
      tpu.vector_store %arg8[%c0_11, %c0_12], %12 {strides = array<i32>} : memref<16x32xf32, #tpu.memory_space<vmem>>, vector<16x32xf32>,
    } else {
    }
    %c0 = arith.constant 0 : index
    %c0_1 = arith.constant 0 : index
    %3 = vector.load %arg3[%c0, %c0_1] : memref<16x32xbf16, #tpu.memory_space<vmem>>, vector<16x32xbf16>
    %c0_2 = arith.constant 0 : index
    %c0_3 = arith.constant 0 : index
    %4 = vector.load %arg8[%c0_2, %c0_3] : memref<16x32xf32, #tpu.memory_space<vmem>>, vector<16x32xf32>
    %c0_4 = arith.constant 0 : index
    %c0_5 = arith.constant 0 : index
    %5 = vector.load %arg4[%c0_4, %c0_5] : memref<32x32xbf16, #tpu.memory_space<vmem>>, vector<32x32xbf16>
    %cst = arith.constant dense<0.000000e+00> : vector<16x32xf32>
    %6 = tpu.matmul %3, %5, %cst {dimension_numbers = #tpu.dot_dimension_numbers<[1], [0], [0], [1], [0, 0, 1, 1], [], []>} : vector<16x32xbf16>, vector<32x32xbf16>, vector<16x32xf32> -> vector<16x32xf32>
    %7 = arith.addf %4, %6 : vector<16x32xf32>
    %c0_6 = arith.constant 0 : index
    %c0_7 = arith.constant 0 : index
    %8 = vector.load %arg8[%c0_6, %c0_7] : memref<16x32xf32, #tpu.memory_space<vmem>>, vector<16x32xf32>
    tpu.vector_store %arg8[%c0_6, %c0_7], %7 {strides = array<i32>} : memref<16x32xf32, #tpu.memory_space<vmem>>, vector<16x32xf32>,
    %c0_i32_8 = arith.constant 0 : i32
    %9 = arith.cmpi eq, %arg2, %c0_i32_8 : i32
    %10 = arith.extui %9 : i1 to i32
    %c0_i32_9 = arith.constant 0 : i32
    %11 = arith.cmpi ne, %10, %c0_i32_9 : i32
    scf.if %11 {
      %c0_10 = arith.constant 0 : index
      %c0_11 = arith.constant 0 : index
      %12 = vector.load %arg8[%c0_10, %c0_11] : memref<16x32xf32, #tpu.memory_space<vmem>>, vector<16x32xf32>
      %c0_12 = arith.constant 0 : index
      %c0_13 = arith.constant 0 : index
      %13 = vector.load %arg5[%c0_12, %c0_13] : memref<1x32xf32, #tpu.memory_space<vmem>>, vector<1x32xf32>
      %14 = vector.broadcast %13 : vector<1x32xf32> to vector<16x32xf32>
      %15 = arith.addf %12, %14 : vector<16x32xf32>
      %c0_14 = arith.constant 0 : index
      %c0_15 = arith.constant 0 : index
      %16 = vector.load %arg6[%c0_14, %c0_15] : memref<16x32xbf16, #tpu.memory_space<vmem>>, vector<16x32xbf16>
      %17 = arith.extf %16 : vector<16x32xbf16> to vector<16x32xf32>
      %cst_16 = arith.constant 1.000000e+00 : f32
      %18 = vector.broadcast %cst_16 : f32 to vector<16x32xf32>
      %19 = arith.mulf %18, %15 : vector<16x32xf32>
      %20 = arith.addf %17, %19 : vector<16x32xf32>
      %21 = arith.truncf %20 : vector<16x32xf32> to vector<16x32xbf16>
      %c0_17 = arith.constant 0 : index
      %c0_18 = arith.constant 0 : index
      %22 = vector.load %arg7[%c0_17, %c0_18] : memref<16x32xbf16, #tpu.memory_space<vmem>>, vector<16x32xbf16>
      tpu.vector_store %arg7[%c0_17, %c0_18], %21 {strides = array<i32>} : memref<16x32xbf16, #tpu.memory_space<vmem>>, vector<16x32xbf16>,
    } else {
    }
    return
  }
  func.func @transform_0(%arg0: i32, %arg1: i32, %arg2: i32) -> (i32, i32) {
    %c0_i32 = arith.constant 0 : i32
    return %arg0, %arg2 : i32, i32
  }
  func.func @transform_1(%arg0: i32, %arg1: i32, %arg2: i32) -> (i32, i32) {
    %c0_i32 = arith.constant 0 : i32
    return %arg2, %arg1 : i32, i32
  }
  func.func @transform_2(%arg0: i32, %arg1: i32, %arg2: i32) -> (i32, i32) {
    %c0_i32 = arith.constant 0 : i32
    %c0_i32_0 = arith.constant 0 : i32
    return %c0_i32, %arg1 : i32, i32
  }
  func.func @transform_3(%arg0: i32, %arg1: i32, %arg2: i32) -> (i32, i32) {
    %c0_i32 = arith.constant 0 : i32
    return %arg0, %arg1 : i32, i32
  }
  func.func @transform_4(%arg0: i32, %arg1: i32, %arg2: i32) -> (i32, i32) {
    %c0_i32 = arith.constant 0 : i32
    return %arg0, %arg1 : i32, i32
  }
}

module attributes {stable_mosaic.version = 11 : i64} {
  func.func @_fused_linear_kernel(%arg0: i32, %arg1: i32, %arg2: i32, %arg3: memref<16x32xbf16, #tpu.memory_space<vmem>>, %arg4: memref<32x64xbf16, #tpu.memory_space<vmem>>, %arg5: memref<1x32xf32, #tpu.memory_space<vmem>>, %arg6: memref<1x32xf32, #tpu.memory_space<vmem>>, %arg7: memref<1x32xf32, #tpu.memory_space<vmem>>, %arg8: memref<1x32xf32, #tpu.memory_space<vmem>>, %arg9: memref<1x64xf32, #tpu.memory_space<vmem>>, %arg10: memref<16x32xbf16, #tpu.memory_space<vmem>>, %arg11: memref<16x64xf32, #tpu.memory_space<vmem>>) attributes {dimension_semantics = [#tpu.dimension_semantics<parallel>, #tpu.dimension_semantics<parallel>, #tpu.dimension_semantics<arbitrary>], iteration_bounds = array<i64: 1, 1, 1>, scalar_prefetch = 0 : i64, scratch_operands = 1 : i64, tpu.core_type = #tpu.core_type<tc>, window_params = [{transform_indices = @transform_0, window_bounds = array<i64: 16, 32>}, {transform_indices = @transform_1, window_bounds = array<i64: 32, 64>}, {pipeline_mode = #tpu.pipeline_mode<synchronous>, transform_indices = @transform_2, window_bounds = array<i64: 1, 32>}, {pipeline_mode = #tpu.pipeline_mode<synchronous>, transform_indices = @transform_3, window_bounds = array<i64: 1, 32>}, {pipeline_mode = #tpu.pipeline_mode<synchronous>, transform_indices = @transform_4, window_bounds = array<i64: 1, 32>}, {pipeline_mode = #tpu.pipeline_mode<synchronous>, transform_indices = @transform_5, window_bounds = array<i64: 1, 32>}, {transform_indices = @transform_6, window_bounds = array<i64: 1, 64>}, {transform_indices = @transform_7, window_bounds = array<i64: 16, 32>}]} {
    %c0_i32 = arith.constant 0 : i32
    %0 = arith.cmpi eq, %arg2, %c0_i32 : i32
    %1 = arith.extui %0 : i1 to i32
    %c0_i32_0 = arith.constant 0 : i32
    %2 = arith.cmpi ne, %1, %c0_i32_0 : i32
    scf.if %2 {
      %cst_28 = arith.constant 0.000000e+00 : f32
      %58 = vector.broadcast %cst_28 : f32 to vector<16x64xf32>
      %c0_29 = arith.constant 0 : index
      %c0_30 = arith.constant 0 : index
      %59 = vector.load %arg11[%c0_29, %c0_30] : memref<16x64xf32, #tpu.memory_space<vmem>>, vector<16x64xf32>
      tpu.vector_store %arg11[%c0_29, %c0_30], %58 {strides = array<i32>} : memref<16x64xf32, #tpu.memory_space<vmem>>, vector<16x64xf32>,
    } else {
    }
    %c0 = arith.constant 0 : index
    %c0_1 = arith.constant 0 : index
    %3 = vector.load %arg3[%c0, %c0_1] : memref<16x32xbf16, #tpu.memory_space<vmem>>, vector<16x32xbf16>
    %4 = arith.extf %3 : vector<16x32xbf16> to vector<16x32xf32>
    %c0_2 = arith.constant 0 : index
    %c0_3 = arith.constant 0 : index
    %5 = vector.load %arg5[%c0_2, %c0_3] : memref<1x32xf32, #tpu.memory_space<vmem>>, vector<1x32xf32>
    %c0_4 = arith.constant 0 : index
    %c0_5 = arith.constant 0 : index
    %6 = vector.load %arg6[%c0_4, %c0_5] : memref<1x32xf32, #tpu.memory_space<vmem>>, vector<1x32xf32>
    %cst = arith.constant dense<0.000000e+00> : vector<16xf32>
    %7 = vector.multi_reduction <add>, %4, %cst [1] : vector<16x32xf32> to vector<16xf32>
    %8 = vector.shape_cast %7 : vector<16xf32> to vector<16x1xf32>
    %cst_6 = arith.constant 3.200000e+01 : f32
    %9 = vector.broadcast %cst_6 : f32 to vector<16x1xf32>
    %10 = arith.divf %8, %9 : vector<16x1xf32>
    %11 = vector.broadcast %10 : vector<16x1xf32> to vector<16x32xf32>
    %12 = arith.subf %4, %11 : vector<16x32xf32>
    %13 = arith.mulf %12, %12 : vector<16x32xf32>
    %cst_7 = arith.constant dense<0.000000e+00> : vector<16xf32>
    %14 = vector.multi_reduction <add>, %13, %cst_7 [1] : vector<16x32xf32> to vector<16xf32>
    %15 = vector.shape_cast %14 : vector<16xf32> to vector<16x1xf32>
    %cst_8 = arith.constant 3.200000e+01 : f32
    %16 = vector.broadcast %cst_8 : f32 to vector<16x1xf32>
    %17 = arith.divf %15, %16 : vector<16x1xf32>
    %cst_9 = arith.constant 9.99999974E-6 : f32
    %18 = vector.broadcast %cst_9 : f32 to vector<16x1xf32>
    %19 = arith.addf %17, %18 : vector<16x1xf32>
    %20 = math.rsqrt %19 : vector<16x1xf32>
    %21 = vector.broadcast %20 : vector<16x1xf32> to vector<16x32xf32>
    %22 = arith.mulf %12, %21 : vector<16x32xf32>
    %23 = vector.broadcast %5 : vector<1x32xf32> to vector<16x32xf32>
    %24 = arith.mulf %22, %23 : vector<16x32xf32>
    %25 = vector.broadcast %6 : vector<1x32xf32> to vector<16x32xf32>
    %26 = arith.addf %24, %25 : vector<16x32xf32>
    %c0_10 = arith.constant 0 : index
    %c0_11 = arith.constant 0 : index
    %27 = vector.load %arg7[%c0_10, %c0_11] : memref<1x32xf32, #tpu.memory_space<vmem>>, vector<1x32xf32>
    %c0_12 = arith.constant 0 : index
    %c0_13 = arith.constant 0 : index
    %28 = vector.load %arg8[%c0_12, %c0_13] : memref<1x32xf32, #tpu.memory_space<vmem>>, vector<1x32xf32>
    %cst_14 = arith.constant dense<0.000000e+00> : vector<16xf32>
    %29 = vector.multi_reduction <add>, %26, %cst_14 [1] : vector<16x32xf32> to vector<16xf32>
    %30 = vector.shape_cast %29 : vector<16xf32> to vector<16x1xf32>
    %cst_15 = arith.constant 3.200000e+01 : f32
    %31 = vector.broadcast %cst_15 : f32 to vector<16x1xf32>
    %32 = arith.divf %30, %31 : vector<16x1xf32>
    %33 = vector.broadcast %32 : vector<16x1xf32> to vector<16x32xf32>
    %34 = arith.subf %26, %33 : vector<16x32xf32>
    %35 = arith.mulf %34, %34 : vector<16x32xf32>
    %cst_16 = arith.constant dense<0.000000e+00> : vector<16xf32>
    %36 = vector.multi_reduction <add>, %35, %cst_16 [1] : vector<16x32xf32> to vector<16xf32>
    %37 = vector.shape_cast %36 : vector<16xf32> to vector<16x1xf32>
    %cst_17 = arith.constant 3.200000e+01 : f32
    %38 = vector.broadcast %cst_17 : f32 to vector<16x1xf32>
    %39 = arith.divf %37, %38 : vector<16x1xf32>
    %cst_18 = arith.constant 9.99999974E-6 : f32
    %40 = vector.broadcast %cst_18 : f32 to vector<16x1xf32>
    %41 = arith.addf %39, %40 : vector<16x1xf32>
    %42 = math.rsqrt %41 : vector<16x1xf32>
    %43 = vector.broadcast %42 : vector<16x1xf32> to vector<16x32xf32>
    %44 = arith.mulf %34, %43 : vector<16x32xf32>
    %45 = vector.broadcast %27 : vector<1x32xf32> to vector<16x32xf32>
    %46 = arith.mulf %44, %45 : vector<16x32xf32>
    %47 = vector.broadcast %28 : vector<1x32xf32> to vector<16x32xf32>
    %48 = arith.addf %46, %47 : vector<16x32xf32>
    %49 = arith.truncf %48 : vector<16x32xf32> to vector<16x32xbf16>
    %c0_19 = arith.constant 0 : index
    %c0_20 = arith.constant 0 : index
    %50 = vector.load %arg11[%c0_19, %c0_20] : memref<16x64xf32, #tpu.memory_space<vmem>>, vector<16x64xf32>
    %c0_21 = arith.constant 0 : index
    %c0_22 = arith.constant 0 : index
    %51 = vector.load %arg4[%c0_21, %c0_22] : memref<32x64xbf16, #tpu.memory_space<vmem>>, vector<32x64xbf16>
    %cst_23 = arith.constant dense<0.000000e+00> : vector<16x64xf32>
    %52 = tpu.matmul %49, %51, %cst_23 {dimension_numbers = #tpu.dot_dimension_numbers<[1], [0], [0], [1], [0, 0, 1, 1], [], []>} : vector<16x32xbf16>, vector<32x64xbf16>, vector<16x64xf32> -> vector<16x64xf32>
    %53 = arith.addf %50, %52 : vector<16x64xf32>
    %c0_24 = arith.constant 0 : index
    %c0_25 = arith.constant 0 : index
    %54 = vector.load %arg11[%c0_24, %c0_25] : memref<16x64xf32, #tpu.memory_space<vmem>>, vector<16x64xf32>
    tpu.vector_store %arg11[%c0_24, %c0_25], %53 {strides = array<i32>} : memref<16x64xf32, #tpu.memory_space<vmem>>, vector<16x64xf32>,
    %c0_i32_26 = arith.constant 0 : i32
    %55 = arith.cmpi eq, %arg2, %c0_i32_26 : i32
    %56 = arith.extui %55 : i1 to i32
    %c0_i32_27 = arith.constant 0 : i32
    %57 = arith.cmpi ne, %56, %c0_i32_27 : i32
    scf.if %57 {
      %c0_28 = arith.constant 0 : index
      %c0_29 = arith.constant 0 : index
      %58 = vector.load %arg11[%c0_28, %c0_29] : memref<16x64xf32, #tpu.memory_space<vmem>>, vector<16x64xf32>
      %c0_30 = arith.constant 0 : index
      %c0_31 = arith.constant 0 : index
      %59 = vector.load %arg9[%c0_30, %c0_31] : memref<1x64xf32, #tpu.memory_space<vmem>>, vector<1x64xf32>
      %60 = vector.broadcast %59 : vector<1x64xf32> to vector<16x64xf32>
      %61 = arith.addf %58, %60 : vector<16x64xf32>
      %62 = vector.extract_strided_slice %61 {offsets = [0, 0], sizes = [16, 32], strides = [1, 1]} : vector<16x64xf32> to vector<16x32xf32>
      %63 = vector.extract_strided_slice %61 {offsets = [0, 32], sizes = [16, 32], strides = [1, 1]} : vector<16x64xf32> to vector<16x32xf32>
      %cst_32 = arith.constant 0.000000e+00 : f32
      %64 = vector.broadcast %cst_32 : f32 to vector<16x32xf32>
      %65 = arith.subf %64, %63 : vector<16x32xf32>
      %66 = math.exp %65 : vector<16x32xf32>
      %cst_33 = arith.constant 1.000000e+00 : f32
      %67 = vector.broadcast %cst_33 : f32 to vector<16x32xf32>
      %68 = arith.addf %67, %66 : vector<16x32xf32>
      %cst_34 = arith.constant 1.000000e+00 : f32
      %69 = vector.broadcast %cst_34 : f32 to vector<16x32xf32>
      %70 = arith.divf %69, %68 : vector<16x32xf32>
      %71 = arith.mulf %62, %70 : vector<16x32xf32>
      %72 = arith.truncf %71 : vector<16x32xf32> to vector<16x32xbf16>
      %c0_35 = arith.constant 0 : index
      %c0_36 = arith.constant 0 : index
      %73 = vector.load %arg10[%c0_35, %c0_36] : memref<16x32xbf16, #tpu.memory_space<vmem>>, vector<16x32xbf16>
      tpu.vector_store %arg10[%c0_35, %c0_36], %72 {strides = array<i32>} : memref<16x32xbf16, #tpu.memory_space<vmem>>, vector<16x32xbf16>,
    } else {
    }
    return
  }
  func.func @transform_0(%arg0: i32, %arg1: i32, %arg2: i32) -> (i32, i32) {
    %c0_i32 = arith.constant 0 : i32
    return %arg0, %arg2 : i32, i32
  }
  func.func @transform_1(%arg0: i32, %arg1: i32, %arg2: i32) -> (i32, i32) {
    %c0_i32 = arith.constant 0 : i32
    return %arg2, %arg1 : i32, i32
  }
  func.func @transform_2(%arg0: i32, %arg1: i32, %arg2: i32) -> (i32, i32) {
    %c0_i32 = arith.constant 0 : i32
    %c0_i32_0 = arith.constant 0 : i32
    %c0_i32_1 = arith.constant 0 : i32
    return %c0_i32, %c0_i32_0 : i32, i32
  }
  func.func @transform_3(%arg0: i32, %arg1: i32, %arg2: i32) -> (i32, i32) {
    %c0_i32 = arith.constant 0 : i32
    %c0_i32_0 = arith.constant 0 : i32
    %c0_i32_1 = arith.constant 0 : i32
    return %c0_i32, %c0_i32_0 : i32, i32
  }
  func.func @transform_4(%arg0: i32, %arg1: i32, %arg2: i32) -> (i32, i32) {
    %c0_i32 = arith.constant 0 : i32
    %c0_i32_0 = arith.constant 0 : i32
    %c0_i32_1 = arith.constant 0 : i32
    return %c0_i32, %c0_i32_0 : i32, i32
  }
  func.func @transform_5(%arg0: i32, %arg1: i32, %arg2: i32) -> (i32, i32) {
    %c0_i32 = arith.constant 0 : i32
    %c0_i32_0 = arith.constant 0 : i32
    %c0_i32_1 = arith.constant 0 : i32
    return %c0_i32, %c0_i32_0 : i32, i32
  }
  func.func @transform_6(%arg0: i32, %arg1: i32, %arg2: i32) -> (i32, i32) {
    %c0_i32 = arith.constant 0 : i32
    %c0_i32_0 = arith.constant 0 : i32
    return %c0_i32, %arg1 : i32, i32
  }
  func.func @transform_7(%arg0: i32, %arg1: i32, %arg2: i32) -> (i32, i32) {
    %c0_i32 = arith.constant 0 : i32
    return %arg0, %arg1 : i32, i32
  }
}

module attributes {stable_mosaic.version = 11 : i64} {
  func.func @_dwconv_kernel(%arg0: i32, %arg1: memref<1x16x32xbf16, #tpu.memory_space<vmem>>, %arg2: memref<7x32xf32, #tpu.memory_space<vmem>>, %arg3: memref<1x32xf32, #tpu.memory_space<vmem>>, %arg4: memref<1x32xf32, #tpu.memory_space<vmem>>, %arg5: memref<1x5x32xbf16, #tpu.memory_space<vmem>>) attributes {dimension_semantics = [#tpu.dimension_semantics<parallel>], iteration_bounds = array<i64: 2>, scalar_prefetch = 0 : i64, scratch_operands = 0 : i64, tpu.core_type = #tpu.core_type<tc>, window_params = [{transform_indices = @transform_0, window_bounds = array<i64: 1, 16, 32>}, {pipeline_mode = #tpu.pipeline_mode<synchronous>, transform_indices = @transform_1, window_bounds = array<i64: 7, 32>}, {pipeline_mode = #tpu.pipeline_mode<synchronous>, transform_indices = @transform_2, window_bounds = array<i64: 1, 32>}, {pipeline_mode = #tpu.pipeline_mode<synchronous>, transform_indices = @transform_3, window_bounds = array<i64: 1, 32>}, {transform_indices = @transform_4, window_bounds = array<i64: 1, 5, 32>}]} {
    %c0 = arith.constant 0 : index
    %c0_0 = arith.constant 0 : index
    %c0_1 = arith.constant 0 : index
    %0 = vector.load %arg1[%c0, %c0_0, %c0_1] : memref<1x16x32xbf16, #tpu.memory_space<vmem>>, vector<1x5x32xbf16>
    %1 = vector.shape_cast %0 : vector<1x5x32xbf16> to vector<5x32xbf16>
    %2 = arith.extf %1 : vector<5x32xbf16> to vector<5x32xf32>
    %c0_2 = arith.constant 0 : index
    %c0_3 = arith.constant 0 : index
    %3 = vector.load %arg2[%c0_2, %c0_3] : memref<7x32xf32, #tpu.memory_space<vmem>>, vector<1x32xf32>
    %4 = vector.broadcast %3 : vector<1x32xf32> to vector<5x32xf32>
    %5 = arith.mulf %2, %4 : vector<5x32xf32>
    %c0_4 = arith.constant 0 : index
    %c1 = arith.constant 1 : index
    %c0_5 = arith.constant 0 : index
    %6 = vector.load %arg1[%c0_4, %c1, %c0_5] : memref<1x16x32xbf16, #tpu.memory_space<vmem>>, vector<1x5x32xbf16>
    %7 = vector.shape_cast %6 : vector<1x5x32xbf16> to vector<5x32xbf16>
    %8 = arith.extf %7 : vector<5x32xbf16> to vector<5x32xf32>
    %c1_6 = arith.constant 1 : index
    %c0_7 = arith.constant 0 : index
    %9 = vector.load %arg2[%c1_6, %c0_7] : memref<7x32xf32, #tpu.memory_space<vmem>>, vector<1x32xf32>
    %10 = vector.broadcast %9 : vector<1x32xf32> to vector<5x32xf32>
    %11 = arith.mulf %8, %10 : vector<5x32xf32>
    %12 = arith.addf %5, %11 : vector<5x32xf32>
    %c0_8 = arith.constant 0 : index
    %c2 = arith.constant 2 : index
    %c0_9 = arith.constant 0 : index
    %13 = vector.load %arg1[%c0_8, %c2, %c0_9] : memref<1x16x32xbf16, #tpu.memory_space<vmem>>, vector<1x5x32xbf16>
    %14 = vector.shape_cast %13 : vector<1x5x32xbf16> to vector<5x32xbf16>
    %15 = arith.extf %14 : vector<5x32xbf16> to vector<5x32xf32>
    %c2_10 = arith.constant 2 : index
    %c0_11 = arith.constant 0 : index
    %16 = vector.load %arg2[%c2_10, %c0_11] : memref<7x32xf32, #tpu.memory_space<vmem>>, vector<1x32xf32>
    %17 = vector.broadcast %16 : vector<1x32xf32> to vector<5x32xf32>
    %18 = arith.mulf %15, %17 : vector<5x32xf32>
    %19 = arith.addf %12, %18 : vector<5x32xf32>
    %c0_12 = arith.constant 0 : index
    %c3 = arith.constant 3 : index
    %c0_13 = arith.constant 0 : index
    %20 = vector.load %arg1[%c0_12, %c3, %c0_13] : memref<1x16x32xbf16, #tpu.memory_space<vmem>>, vector<1x5x32xbf16>
    %21 = vector.shape_cast %20 : vector<1x5x32xbf16> to vector<5x32xbf16>
    %22 = arith.extf %21 : vector<5x32xbf16> to vector<5x32xf32>
    %c3_14 = arith.constant 3 : index
    %c0_15 = arith.constant 0 : index
    %23 = vector.load %arg2[%c3_14, %c0_15] : memref<7x32xf32, #tpu.memory_space<vmem>>, vector<1x32xf32>
    %24 = vector.broadcast %23 : vector<1x32xf32> to vector<5x32xf32>
    %25 = arith.mulf %22, %24 : vector<5x32xf32>
    %26 = arith.addf %19, %25 : vector<5x32xf32>
    %c0_16 = arith.constant 0 : index
    %c4 = arith.constant 4 : index
    %c0_17 = arith.constant 0 : index
    %27 = vector.load %arg1[%c0_16, %c4, %c0_17] : memref<1x16x32xbf16, #tpu.memory_space<vmem>>, vector<1x5x32xbf16>
    %28 = vector.shape_cast %27 : vector<1x5x32xbf16> to vector<5x32xbf16>
    %29 = arith.extf %28 : vector<5x32xbf16> to vector<5x32xf32>
    %c4_18 = arith.constant 4 : index
    %c0_19 = arith.constant 0 : index
    %30 = vector.load %arg2[%c4_18, %c0_19] : memref<7x32xf32, #tpu.memory_space<vmem>>, vector<1x32xf32>
    %31 = vector.broadcast %30 : vector<1x32xf32> to vector<5x32xf32>
    %32 = arith.mulf %29, %31 : vector<5x32xf32>
    %33 = arith.addf %26, %32 : vector<5x32xf32>
    %c0_20 = arith.constant 0 : index
    %c5 = arith.constant 5 : index
    %c0_21 = arith.constant 0 : index
    %34 = vector.load %arg1[%c0_20, %c5, %c0_21] : memref<1x16x32xbf16, #tpu.memory_space<vmem>>, vector<1x5x32xbf16>
    %35 = vector.shape_cast %34 : vector<1x5x32xbf16> to vector<5x32xbf16>
    %36 = arith.extf %35 : vector<5x32xbf16> to vector<5x32xf32>
    %c5_22 = arith.constant 5 : index
    %c0_23 = arith.constant 0 : index
    %37 = vector.load %arg2[%c5_22, %c0_23] : memref<7x32xf32, #tpu.memory_space<vmem>>, vector<1x32xf32>
    %38 = vector.broadcast %37 : vector<1x32xf32> to vector<5x32xf32>
    %39 = arith.mulf %36, %38 : vector<5x32xf32>
    %40 = arith.addf %33, %39 : vector<5x32xf32>
    %c0_24 = arith.constant 0 : index
    %c6 = arith.constant 6 : index
    %c0_25 = arith.constant 0 : index
    %41 = vector.load %arg1[%c0_24, %c6, %c0_25] : memref<1x16x32xbf16, #tpu.memory_space<vmem>>, vector<1x5x32xbf16>
    %42 = vector.shape_cast %41 : vector<1x5x32xbf16> to vector<5x32xbf16>
    %43 = arith.extf %42 : vector<5x32xbf16> to vector<5x32xf32>
    %c6_26 = arith.constant 6 : index
    %c0_27 = arith.constant 0 : index
    %44 = vector.load %arg2[%c6_26, %c0_27] : memref<7x32xf32, #tpu.memory_space<vmem>>, vector<1x32xf32>
    %45 = vector.broadcast %44 : vector<1x32xf32> to vector<5x32xf32>
    %46 = arith.mulf %43, %45 : vector<5x32xf32>
    %47 = arith.addf %40, %46 : vector<5x32xf32>
    %c0_28 = arith.constant 0 : index
    %c0_29 = arith.constant 0 : index
    %48 = vector.load %arg3[%c0_28, %c0_29] : memref<1x32xf32, #tpu.memory_space<vmem>>, vector<1x32xf32>
    %49 = vector.broadcast %48 : vector<1x32xf32> to vector<5x32xf32>
    %50 = arith.mulf %47, %49 : vector<5x32xf32>
    %c0_30 = arith.constant 0 : index
    %c0_31 = arith.constant 0 : index
    %51 = vector.load %arg4[%c0_30, %c0_31] : memref<1x32xf32, #tpu.memory_space<vmem>>, vector<1x32xf32>
    %52 = vector.broadcast %51 : vector<1x32xf32> to vector<5x32xf32>
    %53 = arith.addf %50, %52 : vector<5x32xf32>
    %cst = arith.constant 0.000000e+00 : f32
    %54 = vector.broadcast %cst : f32 to vector<5x32xf32>
    %55 = arith.subf %54, %53 : vector<5x32xf32>
    %56 = math.exp %55 : vector<5x32xf32>
    %cst_32 = arith.constant 1.000000e+00 : f32
    %57 = vector.broadcast %cst_32 : f32 to vector<5x32xf32>
    %58 = arith.addf %57, %56 : vector<5x32xf32>
    %cst_33 = arith.constant 1.000000e+00 : f32
    %59 = vector.broadcast %cst_33 : f32 to vector<5x32xf32>
    %60 = arith.divf %59, %58 : vector<5x32xf32>
    %61 = arith.mulf %53, %60 : vector<5x32xf32>
    %62 = arith.truncf %61 : vector<5x32xf32> to vector<5x32xbf16>
    %c0_34 = arith.constant 0 : index
    %c0_35 = arith.constant 0 : index
    %c0_36 = arith.constant 0 : index
    %63 = vector.load %arg5[%c0_34, %c0_35, %c0_36] : memref<1x5x32xbf16, #tpu.memory_space<vmem>>, vector<1x5x32xbf16>
    %64 = vector.shape_cast %63 : vector<1x5x32xbf16> to vector<5x32xbf16>
    %65 = vector.shape_cast %62 : vector<5x32xbf16> to vector<1x5x32xbf16>
    tpu.vector_store %arg5[%c0_34, %c0_35, %c0_36], %65 {strides = array<i32>} : memref<1x5x32xbf16, #tpu.memory_space<vmem>>, vector<1x5x32xbf16>,
    return
  }
  func.func @transform_0(%arg0: i32) -> (i32, i32, i32) {
    %c0_i32 = arith.constant 0 : i32
    %c0_i32_0 = arith.constant 0 : i32
    %c0_i32_1 = arith.constant 0 : i32
    return %arg0, %c0_i32, %c0_i32_0 : i32, i32, i32
  }
  func.func @transform_1(%arg0: i32) -> (i32, i32) {
    %c0_i32 = arith.constant 0 : i32
    %c0_i32_0 = arith.constant 0 : i32
    %c0_i32_1 = arith.constant 0 : i32
    return %c0_i32, %c0_i32_0 : i32, i32
  }
  func.func @transform_2(%arg0: i32) -> (i32, i32) {
    %c0_i32 = arith.constant 0 : i32
    %c0_i32_0 = arith.constant 0 : i32
    %c0_i32_1 = arith.constant 0 : i32
    return %c0_i32, %c0_i32_0 : i32, i32
  }
  func.func @transform_3(%arg0: i32) -> (i32, i32) {
    %c0_i32 = arith.constant 0 : i32
    %c0_i32_0 = arith.constant 0 : i32
    %c0_i32_1 = arith.constant 0 : i32
    return %c0_i32, %c0_i32_0 : i32, i32
  }
  func.func @transform_4(%arg0: i32) -> (i32, i32, i32) {
    %c0_i32 = arith.constant 0 : i32
    %c0_i32_0 = arith.constant 0 : i32
    %c0_i32_1 = arith.constant 0 : i32
    return %arg0, %c0_i32, %c0_i32_0 : i32, i32, i32
  }
}

module attributes {stable_mosaic.version = 11 : i64} {
  func.func @_fused_linear_kernel(%arg0: i32, %arg1: i32, %arg2: i32, %arg3: memref<16x128xbf16, #tpu.memory_space<vmem>>, %arg4: memref<128x32xbf16, #tpu.memory_space<vmem>>, %arg5: memref<1x32xf32, #tpu.memory_space<vmem>>, %arg6: memref<16x32xbf16, #tpu.memory_space<vmem>>, %arg7: memref<1x32xf32, #tpu.memory_space<vmem>>, %arg8: memref<1x32xf32, #tpu.memory_space<vmem>>, %arg9: memref<16x32xbf16, #tpu.memory_space<vmem>>, %arg10: memref<16x32xf32, #tpu.memory_space<vmem>>) attributes {dimension_semantics = [#tpu.dimension_semantics<parallel>, #tpu.dimension_semantics<parallel>, #tpu.dimension_semantics<arbitrary>], iteration_bounds = array<i64: 1, 1, 1>, scalar_prefetch = 0 : i64, scratch_operands = 1 : i64, tpu.core_type = #tpu.core_type<tc>, window_params = [{transform_indices = @transform_0, window_bounds = array<i64: 16, 128>}, {transform_indices = @transform_1, window_bounds = array<i64: 128, 32>}, {transform_indices = @transform_2, window_bounds = array<i64: 1, 32>}, {transform_indices = @transform_3, window_bounds = array<i64: 16, 32>}, {pipeline_mode = #tpu.pipeline_mode<synchronous>, transform_indices = @transform_4, window_bounds = array<i64: 1, 32>}, {pipeline_mode = #tpu.pipeline_mode<synchronous>, transform_indices = @transform_5, window_bounds = array<i64: 1, 32>}, {transform_indices = @transform_6, window_bounds = array<i64: 16, 32>}]} {
    %c0_i32 = arith.constant 0 : i32
    %0 = arith.cmpi eq, %arg2, %c0_i32 : i32
    %1 = arith.extui %0 : i1 to i32
    %c0_i32_0 = arith.constant 0 : i32
    %2 = arith.cmpi ne, %1, %c0_i32_0 : i32
    scf.if %2 {
      %cst_10 = arith.constant 0.000000e+00 : f32
      %12 = vector.broadcast %cst_10 : f32 to vector<16x32xf32>
      %c0_11 = arith.constant 0 : index
      %c0_12 = arith.constant 0 : index
      %13 = vector.load %arg10[%c0_11, %c0_12] : memref<16x32xf32, #tpu.memory_space<vmem>>, vector<16x32xf32>
      tpu.vector_store %arg10[%c0_11, %c0_12], %12 {strides = array<i32>} : memref<16x32xf32, #tpu.memory_space<vmem>>, vector<16x32xf32>,
    } else {
    }
    %c0 = arith.constant 0 : index
    %c0_1 = arith.constant 0 : index
    %3 = vector.load %arg3[%c0, %c0_1] : memref<16x128xbf16, #tpu.memory_space<vmem>>, vector<16x128xbf16>
    %c0_2 = arith.constant 0 : index
    %c0_3 = arith.constant 0 : index
    %4 = vector.load %arg10[%c0_2, %c0_3] : memref<16x32xf32, #tpu.memory_space<vmem>>, vector<16x32xf32>
    %c0_4 = arith.constant 0 : index
    %c0_5 = arith.constant 0 : index
    %5 = vector.load %arg4[%c0_4, %c0_5] : memref<128x32xbf16, #tpu.memory_space<vmem>>, vector<128x32xbf16>
    %cst = arith.constant dense<0.000000e+00> : vector<16x32xf32>
    %6 = tpu.matmul %3, %5, %cst {dimension_numbers = #tpu.dot_dimension_numbers<[1], [0], [0], [1], [0, 0, 1, 1], [], []>} : vector<16x128xbf16>, vector<128x32xbf16>, vector<16x32xf32> -> vector<16x32xf32>
    %7 = arith.addf %4, %6 : vector<16x32xf32>
    %c0_6 = arith.constant 0 : index
    %c0_7 = arith.constant 0 : index
    %8 = vector.load %arg10[%c0_6, %c0_7] : memref<16x32xf32, #tpu.memory_space<vmem>>, vector<16x32xf32>
    tpu.vector_store %arg10[%c0_6, %c0_7], %7 {strides = array<i32>} : memref<16x32xf32, #tpu.memory_space<vmem>>, vector<16x32xf32>,
    %c0_i32_8 = arith.constant 0 : i32
    %9 = arith.cmpi eq, %arg2, %c0_i32_8 : i32
    %10 = arith.extui %9 : i1 to i32
    %c0_i32_9 = arith.constant 0 : i32
    %11 = arith.cmpi ne, %10, %c0_i32_9 : i32
    scf.if %11 {
      %c0_10 = arith.constant 0 : index
      %c0_11 = arith.constant 0 : index
      %12 = vector.load %arg10[%c0_10, %c0_11] : memref<16x32xf32, #tpu.memory_space<vmem>>, vector<16x32xf32>
      %c0_12 = arith.constant 0 : index
      %c0_13 = arith.constant 0 : index
      %13 = vector.load %arg5[%c0_12, %c0_13] : memref<1x32xf32, #tpu.memory_space<vmem>>, vector<1x32xf32>
      %14 = vector.broadcast %13 : vector<1x32xf32> to vector<16x32xf32>
      %15 = arith.addf %12, %14 : vector<16x32xf32>
      %c0_14 = arith.constant 0 : index
      %c0_15 = arith.constant 0 : index
      %16 = vector.load %arg6[%c0_14, %c0_15] : memref<16x32xbf16, #tpu.memory_space<vmem>>, vector<16x32xbf16>
      %17 = arith.extf %16 : vector<16x32xbf16> to vector<16x32xf32>
      %cst_16 = arith.constant 5.000000e-01 : f32
      %18 = vector.broadcast %cst_16 : f32 to vector<16x32xf32>
      %19 = arith.mulf %18, %15 : vector<16x32xf32>
      %20 = arith.addf %17, %19 : vector<16x32xf32>
      %c0_17 = arith.constant 0 : index
      %c0_18 = arith.constant 0 : index
      %21 = vector.load %arg7[%c0_17, %c0_18] : memref<1x32xf32, #tpu.memory_space<vmem>>, vector<1x32xf32>
      %c0_19 = arith.constant 0 : index
      %c0_20 = arith.constant 0 : index
      %22 = vector.load %arg8[%c0_19, %c0_20] : memref<1x32xf32, #tpu.memory_space<vmem>>, vector<1x32xf32>
      %cst_21 = arith.constant dense<0.000000e+00> : vector<16xf32>
      %23 = vector.multi_reduction <add>, %20, %cst_21 [1] : vector<16x32xf32> to vector<16xf32>
      %24 = vector.shape_cast %23 : vector<16xf32> to vector<16x1xf32>
      %cst_22 = arith.constant 3.200000e+01 : f32
      %25 = vector.broadcast %cst_22 : f32 to vector<16x1xf32>
      %26 = arith.divf %24, %25 : vector<16x1xf32>
      %27 = vector.broadcast %26 : vector<16x1xf32> to vector<16x32xf32>
      %28 = arith.subf %20, %27 : vector<16x32xf32>
      %29 = arith.mulf %28, %28 : vector<16x32xf32>
      %cst_23 = arith.constant dense<0.000000e+00> : vector<16xf32>
      %30 = vector.multi_reduction <add>, %29, %cst_23 [1] : vector<16x32xf32> to vector<16xf32>
      %31 = vector.shape_cast %30 : vector<16xf32> to vector<16x1xf32>
      %cst_24 = arith.constant 3.200000e+01 : f32
      %32 = vector.broadcast %cst_24 : f32 to vector<16x1xf32>
      %33 = arith.divf %31, %32 : vector<16x1xf32>
      %cst_25 = arith.constant 9.99999974E-6 : f32
      %34 = vector.broadcast %cst_25 : f32 to vector<16x1xf32>
      %35 = arith.addf %33, %34 : vector<16x1xf32>
      %36 = math.rsqrt %35 : vector<16x1xf32>
      %37 = vector.broadcast %36 : vector<16x1xf32> to vector<16x32xf32>
      %38 = arith.mulf %28, %37 : vector<16x32xf32>
      %39 = vector.broadcast %21 : vector<1x32xf32> to vector<16x32xf32>
      %40 = arith.mulf %38, %39 : vector<16x32xf32>
      %41 = vector.broadcast %22 : vector<1x32xf32> to vector<16x32xf32>
      %42 = arith.addf %40, %41 : vector<16x32xf32>
      %43 = arith.truncf %42 : vector<16x32xf32> to vector<16x32xbf16>
      %c0_26 = arith.constant 0 : index
      %c0_27 = arith.constant 0 : index
      %44 = vector.load %arg9[%c0_26, %c0_27] : memref<16x32xbf16, #tpu.memory_space<vmem>>, vector<16x32xbf16>
      tpu.vector_store %arg9[%c0_26, %c0_27], %43 {strides = array<i32>} : memref<16x32xbf16, #tpu.memory_space<vmem>>, vector<16x32xbf16>,
    } else {
    }
    return
  }
  func.func @transform_0(%arg0: i32, %arg1: i32, %arg2: i32) -> (i32, i32) {
    %c0_i32 = arith.constant 0 : i32
    return %arg0, %arg2 : i32, i32
  }
  func.func @transform_1(%arg0: i32, %arg1: i32, %arg2: i32) -> (i32, i32) {
    %c0_i32 = arith.constant 0 : i32
    return %arg2, %arg1 : i32, i32
  }
  func.func @transform_2(%arg0: i32, %arg1: i32, %arg2: i32) -> (i32, i32) {
    %c0_i32 = arith.constant 0 : i32
    %c0_i32_0 = arith.constant 0 : i32
    return %c0_i32, %arg1 : i32, i32
  }
  func.func @transform_3(%arg0: i32, %arg1: i32, %arg2: i32) -> (i32, i32) {
    %c0_i32 = arith.constant 0 : i32
    return %arg0, %arg1 : i32, i32
  }
  func.func @transform_4(%arg0: i32, %arg1: i32, %arg2: i32) -> (i32, i32) {
    %c0_i32 = arith.constant 0 : i32
    %c0_i32_0 = arith.constant 0 : i32
    %c0_i32_1 = arith.constant 0 : i32
    return %c0_i32, %c0_i32_0 : i32, i32
  }
  func.func @transform_5(%arg0: i32, %arg1: i32, %arg2: i32) -> (i32, i32) {
    %c0_i32 = arith.constant 0 : i32
    %c0_i32_0 = arith.constant 0 : i32
    %c0_i32_1 = arith.constant 0 : i32
    return %c0_i32, %c0_i32_0 : i32, i32
  }
  func.func @transform_6(%arg0: i32, %arg1: i32, %arg2: i32) -> (i32, i32) {
    %c0_i32 = arith.constant 0 : i32
    return %arg0, %arg1 : i32, i32
  }
}

</mosaic_0001>

<bundles_post_ra>
// kernel: conformer_encoder.25
= control target key start
LH: loop header
LB: loop body
LE: loop exit
PB: predicated region body
PF: predicated region fallthrough
CT: control target
= control target key end

     0   :  { %vm168_vm0 = vcmask 1043456   ;;  %vm169_vm1 = vcmask 1044480   ;;  %vm137_vm2 = vcmask 72704   ;;  %v614_v1 = vmov 65535   ;;  %s824_s1 = inlined_call_operand.vmem [shape: bf16[9,32], index: 1, kind: input, shape index: {}]   ;;  %s825_s0 = inlined_call_operand.vmem [shape: bf16[160,9], index: 0, kind: input, shape index: {}]   ;;  %s826_s2 = inlined_call_operand.vmem [shape: f32[1,32], index: 2, kind: input, shape index: {}]   ;;  %s827_s3 = inlined_call_operand.vmem [shape: bf16[160,32], index: 3, kind: output, shape index: {}]  }
   0x1   :  { %v603_v0 = vld [vmem:[%s824_s1] sm:$0x1f]   ;;  %v170_v2 = vsel %vm168_vm0, 4294967295, %v614_v1  ;;  %v606_v6 = vld [vmem:[%s825_s0 + $0x30] sm:$0xff]   ;;  %vm19_vm3 = vcmask 261120   ;;  %v605_v7 = vld [vmem:[%s825_s0 + $0x8] sm:$0xff]  }
   0x2   :  { %v604_v3 = vld [vmem:[%s825_s0] sm:$0xff]   ;;  %v171_v4 = vsel %vm169_vm1, %v170_v2, 0  ;;  %v607_v8 = vld [vmem:[%s825_s0 + $0x38] sm:$0xff]   ;;  %v615_v9 = vmov 0.0   ;;  %v608_v10 = vld [vmem:[%s825_s0 + $0x10] sm:$0xff]   ;;  %591 = vmatprep.mubr.msk.bf16.mxu1 %vm137_vm2, %v606_v6  ;;  %vm479_vm4 = vcmask 257024  }
   0x3   :  { %v173_v5 = vand.u32 %v603_v0, %v171_v4  ;;  %579 = vmatprep.mubr.msk.bf16.mxu0 %vm137_vm2, %v604_v3  ;;  %22 = vst.msk [vmem:[#allocation2 + $0x10] sm:$0xff] %vm19_vm3, %v615_v9  ;;  %20 = vst.msk [vmem:[#allocation2] sm:$0xff] %vm19_vm3, %v615_v9  ;;  %v610_v11 = vld [vmem:[%s825_s0 + $0x40] sm:$0xff]   ;;  %v609_v12 = vld [vmem:[%s825_s0 + $0x18] sm:$0xff]  }
   0x4   :  { %21 = vst.msk [vmem:[#allocation2 + $0x8] sm:$0xff] %vm19_vm3, %v615_v9  ;;  %23 = vst.msk [vmem:[#allocation2 + $0x18] sm:$0xff] %vm19_vm3, %v615_v9  ;;  %v611_v13 = vld [vmem:[%s825_s0 + $0x48] sm:$0xff]   ;;  %v612_v14 = vld [vmem:[%s825_s0 + $0x20] sm:$0xff]  }
   0x5   :  { %577 = vmatprep.subr.bf16.mxu0 %v173_v5  ;;  %599 = vmatprep.subr.bf16.mxu1 %v173_v5  ;;  %24 = vst.msk [vmem:[#allocation2 + $0x20] sm:$0xff] %vm19_vm3, %v615_v9  ;;  %25 = vst.msk [vmem:[#allocation2 + $0x28] sm:$0xff] %vm19_vm3, %v615_v9  ;;  %v613_v15 = vld [vmem:[%s825_s0 + $0x28] sm:$0xff]   ;;  %v708_v42 = vld [vmem:[%s826_s2] ss:$0 sm:$0xff] }
   0x6   :  { %26 = vst.msk [vmem:[#allocation2 + $0x30] sm:$0xff] %vm19_vm3, %v615_v9  ;;  %27 = vst.msk [vmem:[#allocation2 + $0x38] sm:$0xff] %vm19_vm3, %v615_v9  ;;  %578 = vmatpush3.bf16.msra.mxu0 %v173_v5  ;;  %600 = vmatpush3.bf16.msra.mxu1 %v173_v5 }
   0x7   :  { %28 = vst.msk [vmem:[#allocation2 + $0x40] sm:$0xff] %vm19_vm3, %v615_v9  ;;  %29 = vst.msk [vmem:[#allocation2 + $0x48] sm:$0xff] %vm19_vm3, %v615_v9 }
   0x8   :  { %30 = vst.msk [vmem:[#allocation2 + $0x50] sm:$0xff] %vm19_vm3, %v615_v9  ;;  %31 = vst.msk [vmem:[#allocation2 + $0x58] sm:$0xff] %vm19_vm3, %v615_v9 }
   0x9   :  { %32 = vst.msk [vmem:[#allocation2 + $0x60] sm:$0xff] %vm19_vm3, %v615_v9  ;;  %33 = vst.msk [vmem:[#allocation2 + $0x68] sm:$0xff] %vm19_vm3, %v615_v9  ;;  %580 = vmatmul.mubr.msk.bf16.vlgmr.msra.gmra.mxu0 %vm137_vm2, %v605_v7  ;;  %592 = vmatmul.mubr.msk.bf16.vlgmr.msra.gmra.mxu1 %vm137_vm2, %v607_v8 }
   0xa   :  { %34 = vst.msk [vmem:[#allocation2 + $0x70] sm:$0xff] %vm19_vm3, %v615_v9  ;;  %35 = vst.msk [vmem:[#allocation2 + $0x78] sm:$0xff] %vm19_vm3, %v615_v9  ;;  %583 = vmatprep.mubr.msk.bf16.mxu0 %vm137_vm2, %v608_v10  ;;  %595 = vmatprep.mubr.msk.bf16.mxu1 %vm137_vm2, %v610_v11  ;;  %v62_v16 = vld [vmem:[#allocation2 + $0x10] sm:$0xff]  ;;  %v60_v19 = vld [vmem:[#allocation2] sm:$0xff] }
   0xb   :  { %36 = vst.msk [vmem:[#allocation2 + $0x80] sm:$0xff] %vm19_vm3, %v615_v9  ;;  %37 = vst.msk [vmem:[#allocation2 + $0x88] sm:$0xff] %vm19_vm3, %v615_v9  ;;  %v63_v25 = vld [vmem:[#allocation2 + $0x18] sm:$0xff]  ;;  %v61_v31 = vld [vmem:[#allocation2 + $0x8] sm:$0xff] }
   0xc   :  { %38 = vst.msk [vmem:[#allocation2 + $0x90] sm:$0xff] %vm19_vm3, %v615_v9  ;;  %39 = vst.msk [vmem:[#allocation2 + $0x98] sm:$0xff] %vm19_vm3, %v615_v9  ;;  %v64_v44 = vld [vmem:[#allocation2 + $0x20] sm:$0xff]  ;;  %v65_v3 = vld [vmem:[#allocation2 + $0x28] sm:$0xff] }
   0xd   :  { %v66_v37 = vld [vmem:[#allocation2 + $0x30] sm:$0xff]  ;;  %v67_v56 = vld [vmem:[#allocation2 + $0x38] sm:$0xff] }
  0x10   :  { %v72_v21 = vld [vmem:[#allocation2 + $0x60] sm:$0xff]  ;;  %v73_v33 = vld [vmem:[#allocation2 + $0x68] sm:$0xff] }
  0x11   :  { %584 = vmatmul.mubr.msk.bf16.gmra.mxu0 %vm137_vm2, %v609_v12  ;;  %596 = vmatmul.mubr.msk.bf16.gmra.mxu1 %vm137_vm2, %v611_v13  ;;  %v74_v17 = vld [vmem:[#allocation2 + $0x70] sm:$0xff]  ;;  %v75_v27 = vld [vmem:[#allocation2 + $0x78] sm:$0xff] }
  0x12   :  { %587 = vmatprep.mubr.msk.bf16.mxu0 %vm137_vm2, %v612_v14  ;;  %v76_v46 = vld [vmem:[#allocation2 + $0x80] sm:$0xff]  ;;  %v77_v4 = vld [vmem:[#allocation2 + $0x88] sm:$0xff] }
  0x13   :  { %v78_v39 = vld [vmem:[#allocation2 + $0x90] sm:$0xff]  ;;  %v79_v58 = vld [vmem:[#allocation2 + $0x98] sm:$0xff] }
  0x19   :  { %588 = vmatmul.mubr.msk.bf16.gmra.mxu0 %vm137_vm2, %v613_v15  ;;  %v70_v15 = vld [vmem:[#allocation2 + $0x50] sm:$0xff] }
  0xc9   :  { %v581_v18 = vpop.f32.mrf.mxu0  ;;  %v593_v20 = vpop.f32.mrf.mxu1 }
  0xca   :  { %v290_v22 = vadd.f32 %v581_v18, %v62_v16  ;;  %v302_v23 = vadd.f32 %v593_v20, %v74_v17 }
  0xcb   :  { %v209_v24 = vpop.f32.mrf.mxu0  ;;  %v257_v26 = vpop.f32.mrf.mxu1 }
  0xcc   :  { %311 = vst.msk [vmem:[#allocation2 + $0x10] sm:$0xff] %vm19_vm3, %v290_v22  ;;  %v288_v28 = vadd.f32 %v209_v24, %v60_v19  ;;  %323 = vst.msk [vmem:[#allocation2 + $0x70] sm:$0xff] %vm19_vm3, %v302_v23  ;;  %v300_v29 = vadd.f32 %v257_v26, %v72_v21 }
  0xcd   :  { %v582_v30 = vpop.f32.mrf.mxu0  ;;  %v594_v32 = vpop.f32.mrf.mxu1 }
  0xce   :  { %309 = vst.msk [vmem:[#allocation2] sm:$0xff] %vm19_vm3, %v288_v28  ;;  %v291_v34 = vadd.f32 %v582_v30, %v63_v25  ;;  %321 = vst.msk [vmem:[#allocation2 + $0x60] sm:$0xff] %vm19_vm3, %v300_v29  ;;  %v303_v35 = vadd.f32 %v594_v32, %v75_v27  ;;  %v68_v27 = vld [vmem:[#allocation2 + $0x40] sm:$0xff] }
  0xcf   :  { %v212_v36 = vpop.f32.mrf.mxu0  ;;  %v260_v38 = vpop.f32.mrf.mxu1 }
  0xd0   :  { %312 = vst.msk [vmem:[#allocation2 + $0x18] sm:$0xff] %vm19_vm3, %v291_v34  ;;  %v289_v40 = vadd.f32 %v212_v36, %v61_v31  ;;  %324 = vst.msk [vmem:[#allocation2 + $0x78] sm:$0xff] %vm19_vm3, %v303_v35  ;;  %v301_v41 = vadd.f32 %v260_v38, %v73_v33  ;;  %v71_v38 = vld [vmem:[#allocation2 + $0x58] sm:$0xff] }
  0xd1   :  { %v585_v43 = vpop.f32.mrf.mxu0  ;;  %v597_v45 = vpop.f32.mrf.mxu1 }
  0xd2   :  { %310 = vst.msk [vmem:[#allocation2 + $0x8] sm:$0xff] %vm19_vm3, %v289_v40  ;;  %v294_v47 = vadd.f32 %v585_v43, %v66_v37  ;;  %322 = vst.msk [vmem:[#allocation2 + $0x68] sm:$0xff] %vm19_vm3, %v301_v41  ;;  %v306_v48 = vadd.f32 %v597_v45, %v78_v39 }
  0xd3   :  { %v334_v49 = vld [vmem:[#allocation2 + $0x10] sm:$0xff]  ;;  %v225_v51 = vpop.f32.mrf.mxu0  ;;  %v273_v52 = vpop.f32.mrf.mxu1 }
  0xd4   :  { %v346_v50 = vld [vmem:[#allocation2 + $0x70] sm:$0xff]  ;;  %v361_v53 = vadd.f32 %v708_v42, %v334_v49  ;;  %315 = vst.msk [vmem:[#allocation2 + $0x30] sm:$0xff] %vm19_vm3, %v294_v47  ;;  %v292_v55 = vadd.f32 %v225_v51, %v64_v44  ;;  %327 = vst.msk [vmem:[#allocation2 + $0x90] sm:$0xff] %vm19_vm3, %v306_v48  ;;  %v304_v57 = vadd.f32 %v273_v52, %v76_v46  ;;  %v69_v46 = vld [vmem:[#allocation2 + $0x48] sm:$0xff] }
  0xd5   :  { %v373_v54 = vadd.f32 %v708_v42, %v346_v50  ;;  %v332_v59 = vld [vmem:[#allocation2] sm:$0xff]  ;;  %v586_v61 = vpop.f32.mrf.mxu0  ;;  %v598_v62 = vpop.f32.mrf.mxu1 }
  0xd6   :  { %v344_v60 = vld [vmem:[#allocation2 + $0x60] sm:$0xff]  ;;  %v381_v63 = vmax.f32 %v361_v53, 0.0  ;;  %v359_v0 = vadd.f32 %v708_v42, %v332_v59  ;;  %313 = vst.msk [vmem:[#allocation2 + $0x20] sm:$0xff] %vm19_vm3, %v292_v55  ;;  %325 = vst.msk [vmem:[#allocation2 + $0x80] sm:$0xff] %vm19_vm3, %v304_v57  ;;  %v295_v7 = vadd.f32 %v586_v61, %v67_v56  ;;  %v307_v9 = vadd.f32 %v598_v62, %v79_v58 }
  0xd7   :  { %v393_v1 = vmax.f32 %v373_v54, 0.0  ;;  %v371_v2 = vadd.f32 %v708_v42, %v344_v60  ;;  %v335_v5 = vld [vmem:[#allocation2 + $0x18] sm:$0xff]  ;;  %v228_v8 = vpop.f32.mrf.mxu0  ;;  %v276_v10 = vpop.f32.mrf.mxu1 }
  0xd8   :  { %v347_v6 = vld [vmem:[#allocation2 + $0x78] sm:$0xff]  ;;  %v548_v11 = vpack.c.bf16 %v381_v63, %v381_v63  ;;  %v379_v12 = vmax.f32 %v359_v0, 0.0  ;;  %v362_v14 = vadd.f32 %v708_v42, %v335_v5  ;;  %316 = vst.msk [vmem:[#allocation2 + $0x38] sm:$0xff] %vm19_vm3, %v295_v7  ;;  %v293_v20 = vadd.f32 %v228_v8, %v65_v3  ;;  %328 = vst.msk [vmem:[#allocation2 + $0x98] sm:$0xff] %vm19_vm3, %v307_v9 }
  0xd9   :  { %v560_v13 = vpack.c.bf16 %v393_v1, %v393_v1  ;;  %v391_v16 = vmax.f32 %v371_v2, 0.0  ;;  %v333_v17 = vld [vmem:[#allocation2 + $0x8] sm:$0xff]  ;;  %v374_v18 = vadd.f32 %v708_v42, %v347_v6  ;;  %v589_v21 = vpop.f32.mrf.mxu0  ;;  %v305_v22 = vadd.f32 %v276_v10, %v77_v4 }
  0xda   :  { %v345_v19 = vld [vmem:[#allocation2 + $0x68] sm:$0xff]  ;;  %482 = vst.msk [vmem:[%s827_s3 + $0x8] sm:$0xf] %vm479_vm4, %v548_v11  ;;  %v546_v23 = vpack.c.bf16 %v379_v12, %v379_v12  ;;  %v382_v24 = vmax.f32 %v362_v14, 0.0  ;;  %v360_v25 = vadd.f32 %v708_v42, %v333_v17  ;;  %v298_v32 = vadd.f32 %v589_v21, %v70_v15 }
  0xdb   :  { %494 = vst.msk [vmem:[%s827_s3 + $0x38] sm:$0xf] %vm479_vm4, %v560_v13  ;;  %v372_v26 = vadd.f32 %v708_v42, %v345_v19  ;;  %v558_v28 = vpack.c.bf16 %v391_v16, %v391_v16  ;;  %v394_v29 = vmax.f32 %v374_v18, 0.0  ;;  %v338_v30 = vld [vmem:[#allocation2 + $0x30] sm:$0xff]  ;;  %v241_v33 = vpop.f32.mrf.mxu0 }
  0xdc   :  { %v350_v31 = vld [vmem:[#allocation2 + $0x90] sm:$0xff]  ;;  %314 = vst.msk [vmem:[#allocation2 + $0x28] sm:$0xff] %vm19_vm3, %v293_v20  ;;  %326 = vst.msk [vmem:[#allocation2 + $0x88] sm:$0xff] %vm19_vm3, %v305_v22  ;;  %v549_v34 = vpack.c.bf16 %v382_v24, %v382_v24  ;;  %v380_v35 = vmax.f32 %v360_v25, 0.0  ;;  %v365_v36 = vadd.f32 %v708_v42, %v338_v30  ;;  %v296_v44 = vadd.f32 %v241_v33, %v68_v27 }
  0xdd   :  { %480 = vst.msk [vmem:[%s827_s3] sm:$0xf] %vm479_vm4, %v546_v23  ;;  %v392_v37 = vmax.f32 %v372_v26, 0.0  ;;  %492 = vst.msk [vmem:[%s827_s3 + $0x30] sm:$0xf] %vm479_vm4, %v558_v28  ;;  %v561_v39 = vpack.c.bf16 %v394_v29, %v394_v29  ;;  %v336_v40 = vld [vmem:[#allocation2 + $0x20] sm:$0xff]  ;;  %v377_v41 = vadd.f32 %v708_v42, %v350_v31  ;;  %v590_v45 = vpop.f32.mrf.mxu0 }
  0xde   :  { %v348_v43 = vld [vmem:[#allocation2 + $0x80] sm:$0xff]  ;;  %319 = vst.msk [vmem:[#allocation2 + $0x50] sm:$0xff] %vm19_vm3, %v298_v32  ;;  %v547_v47 = vpack.c.bf16 %v380_v35, %v380_v35  ;;  %v385_v48 = vmax.f32 %v365_v36, 0.0  ;;  %v363_v50 = vadd.f32 %v708_v42, %v336_v40  ;;  %317 = vst.msk [vmem:[#allocation2 + $0x40] sm:$0xff] %vm19_vm3, %v296_v44  ;;  %v299_v53 = vadd.f32 %v590_v45, %v71_v38 }
  0xdf   :  { %483 = vst.msk [vmem:[%s827_s3 + $0xc] sm:$0xf] %vm479_vm4, %v549_v34  ;;  %v559_v49 = vpack.c.bf16 %v392_v37, %v392_v37  ;;  %495 = vst.msk [vmem:[%s827_s3 + $0x3c] sm:$0xf] %vm479_vm4, %v561_v39  ;;  %v397_v51 = vmax.f32 %v377_v41, 0.0  ;;  %v375_v52 = vadd.f32 %v708_v42, %v348_v43  ;;  %v244_v54 = vpop.f32.mrf.mxu0  ;;  %v339_v57 = vld [vmem:[#allocation2 + $0x38] sm:$0xff] }
  0xe0   :  { %481 = vst.msk [vmem:[%s827_s3 + $0x4] sm:$0xf] %vm479_vm4, %v547_v47  ;;  %v552_v55 = vpack.c.bf16 %v385_v48, %v385_v48  ;;  %v383_v56 = vmax.f32 %v363_v50, 0.0  ;;  %v351_v58 = vld [vmem:[#allocation2 + $0x98] sm:$0xff]  ;;  %v297_v59 = vadd.f32 %v244_v54, %v69_v46  ;;  %v366_v61 = vadd.f32 %v708_v42, %v339_v57 }
  0xe1   :  { %493 = vst.msk [vmem:[%s827_s3 + $0x34] sm:$0xf] %vm479_vm4, %v559_v49  ;;  %v564_v60 = vpack.c.bf16 %v397_v51, %v397_v51  ;;  %v395_v62 = vmax.f32 %v375_v52, 0.0  ;;  %v378_v63 = vadd.f32 %v708_v42, %v351_v58 }
  0xe2   :  { %320 = vst.msk [vmem:[#allocation2 + $0x58] sm:$0xff] %vm19_vm3, %v299_v53  ;;  %v550_v0 = vpack.c.bf16 %v383_v56, %v383_v56  ;;  %318 = vst.msk [vmem:[#allocation2 + $0x48] sm:$0xff] %vm19_vm3, %v297_v59  ;;  %v386_v3 = vmax.f32 %v366_v61, 0.0 }
  0xe3   :  { %486 = vst.msk [vmem:[%s827_s3 + $0x18] sm:$0xf] %vm479_vm4, %v552_v55  ;;  %v337_v1 = vld [vmem:[#allocation2 + $0x28] sm:$0xff]  ;;  %498 = vst.msk [vmem:[%s827_s3 + $0x48] sm:$0xf] %vm479_vm4, %v564_v60  ;;  %v562_v4 = vpack.c.bf16 %v395_v62, %v395_v62  ;;  %v398_v6 = vmax.f32 %v378_v63, 0.0 }
  0xe4   :  { %v349_v2 = vld [vmem:[#allocation2 + $0x88] sm:$0xff]  ;;  %v364_v5 = vadd.f32 %v708_v42, %v337_v1  ;;  %484 = vst.msk [vmem:[%s827_s3 + $0x10] sm:$0xf] %vm479_vm4, %v550_v0  ;;  %v553_v9 = vpack.c.bf16 %v386_v3, %v386_v3 }
  0xe5   :  { %v342_v7 = vld [vmem:[#allocation2 + $0x50] sm:$0xff]  ;;  %v376_v8 = vadd.f32 %v708_v42, %v349_v2  ;;  %496 = vst.msk [vmem:[%s827_s3 + $0x40] sm:$0xf] %vm479_vm4, %v562_v4  ;;  %v565_v11 = vpack.c.bf16 %v398_v6, %v398_v6  ;;  %v340_v14 = vld [vmem:[#allocation2 + $0x40] sm:$0xff] }
  0xe6   :  { %v384_v10 = vmax.f32 %v364_v5, 0.0  ;;  %v369_v12 = vadd.f32 %v708_v42, %v342_v7  ;;  %487 = vst.msk [vmem:[%s827_s3 + $0x1c] sm:$0xf] %vm479_vm4, %v553_v9  ;;  %v367_v17 = vadd.f32 %v708_v42, %v340_v14 }
  0xe7   :  { %v396_v13 = vmax.f32 %v376_v8, 0.0  ;;  %499 = vst.msk [vmem:[%s827_s3 + $0x4c] sm:$0xf] %vm479_vm4, %v565_v11 }
  0xe8   :  { %v551_v15 = vpack.c.bf16 %v384_v10, %v384_v10  ;;  %v389_v16 = vmax.f32 %v369_v12, 0.0  ;;  %v387_v21 = vmax.f32 %v367_v17, 0.0 }
  0xe9   :  { %v563_v18 = vpack.c.bf16 %v396_v13, %v396_v13  ;;  %v343_v19 = vld [vmem:[#allocation2 + $0x58] sm:$0xff]  ;;  %v341_v23 = vld [vmem:[#allocation2 + $0x48] sm:$0xff] }
  0xea   :  { %485 = vst.msk [vmem:[%s827_s3 + $0x14] sm:$0xf] %vm479_vm4, %v551_v15  ;;  %v556_v20 = vpack.c.bf16 %v389_v16, %v389_v16  ;;  %v370_v22 = vadd.f32 %v708_v42, %v343_v19  ;;  %v368_v24 = vadd.f32 %v708_v42, %v341_v23  ;;  %v554_v25 = vpack.c.bf16 %v387_v21, %v387_v21 }
  0xeb   :  { %497 = vst.msk [vmem:[%s827_s3 + $0x44] sm:$0xf] %vm479_vm4, %v563_v18 }
  0xec   :  { %490 = vst.msk [vmem:[%s827_s3 + $0x28] sm:$0xf] %vm479_vm4, %v556_v20  ;;  %v390_v26 = vmax.f32 %v370_v22, 0.0  ;;  %v388_v27 = vmax.f32 %v368_v24, 0.0  ;;  %488 = vst.msk [vmem:[%s827_s3 + $0x20] sm:$0xf] %vm479_vm4, %v554_v25 }
  0xee   :  { %v557_v28 = vpack.c.bf16 %v390_v26, %v390_v26  ;;  %v555_v29 = vpack.c.bf16 %v388_v27, %v388_v27 }
  0xf0   :  { %491 = vst.msk [vmem:[%s827_s3 + $0x2c] sm:$0xf] %vm479_vm4, %v557_v28  ;;  %489 = vst.msk [vmem:[%s827_s3 + $0x24] sm:$0xf] %vm479_vm4, %v555_v29 }

// kernel: conformer_encoder.26
= control target key start
LH: loop header
LB: loop body
LE: loop exit
PB: predicated region body
PF: predicated region fallthrough
CT: control target
= control target key end

     0   :  { %vm19_vm0 = vcmask 261120   ;;  %v472_v24 = vmov 0.0   ;;  %vm361_vm1 = vcmask 257024   ;;  %s594_s1 = inlined_call_operand.vmem [shape: bf16[288,32], index: 1, kind: input, shape index: {}]   ;;  %s595_s0 = inlined_call_operand.vmem [shape: bf16[32,288], index: 0, kind: input, shape index: {}]   ;;  %s596_s2 = inlined_call_operand.vmem [shape: f32[1,32], index: 2, kind: input, shape index: {}]   ;;  %s597_s3 = inlined_call_operand.vmem [shape: bf16[32,32], index: 3, kind: output, shape index: {}]  }
   0x1   :  { %v446_v0 = vld [vmem:[%s594_s1 + $0x78] sm:$0xff]   ;;  %v448_v2 = vld [vmem:[%s594_s1 + $0x70] sm:$0xff]   ;;  %v450_v4 = vld [vmem:[%s594_s1 + $0x68] sm:$0xff]   ;;  %20 = vst.msk [vmem:[#allocation2] sm:$0xff] %vm19_vm0, %v472_v24 }
   0x2   :  { %v447_v1 = vld [vmem:[%s594_s1 + $0x38] sm:$0xff]   ;;  %405 = vmatprep.subr.bf16.mxu0 %v446_v0  ;;  %v449_v3 = vld [vmem:[%s594_s1 + $0x30] sm:$0xff]   ;;  %v451_v5 = vld [vmem:[%s594_s1 + $0x28] sm:$0xff]   ;;  %21 = vst.msk [vmem:[#allocation2 + $0x8] sm:$0xff] %vm19_vm0, %v472_v24 }
   0x3   :  { %406 = vmatpush3.bf16.msra.mxu0 %v447_v1  ;;  %v452_v6 = vld [vmem:[%s594_s1 + $0x60] sm:$0xff]   ;;  %v454_v8 = vld [vmem:[%s594_s1 + $0x58] sm:$0xff]   ;;  %v460_v9 = vld [vmem:[%s594_s1 + $0x88] sm:$0xff]   ;;  %22 = vst.msk [vmem:[#allocation2 + $0x10] sm:$0xff] %vm19_vm0, %v472_v24 }
   0x4   :  { %407 = vmatprep.subr.bf16.mxu0 %v448_v2  ;;  %v453_v7 = vld [vmem:[%s594_s1 + $0x20] sm:$0xff]   ;;  %v455_v10 = vld [vmem:[%s594_s1 + $0x18] sm:$0xff]   ;;  %v456_v11 = vld [vmem:[%s594_s1 + $0x50] sm:$0xff]   ;;  %437 = vmatprep.subr.bf16.mxu1 %v460_v9  ;;  %23 = vst.msk [vmem:[#allocation2 + $0x18] sm:$0xff] %vm19_vm0, %v472_v24 }
   0x5   :  { %v457_v12 = vld [vmem:[%s594_s1 + $0x10] sm:$0xff]   ;;  %438 = vmatpush3.bf16.msra.mxu1 %v460_v9  ;;  %v463_v13 = vld [vmem:[%s594_s1 + $0x80] sm:$0xff]   ;;  %v458_v14 = vld [vmem:[%s594_s1 + $0x48] sm:$0xff]  }
   0x6   :  { %439 = vmatprep.subr.bf16.mxu1 %v463_v13  ;;  %v466_v15 = vld [vmem:[%s595_s0 + $0x4] ss:$12 sps:$4 sm:$0xff]   ;;  %v467_v16 = vld [vmem:[%s595_s0 + $0x8] ss:$12 sps:$4 sm:$0xff]   ;;  %v468_v17 = vld [vmem:[%s595_s0 + $0x20] ss:$12 sps:$4 sm:$0xff]  }
   0x7   :  { %408 = vmatpush3.bf16.msra.mxu0 %v449_v3  ;;  %249 = vmatprep.mubr.bf16.mxu0 %v466_v15  ;;  %v459_v18 = vld [vmem:[%s594_s1 + $0x8] sm:$0xff]   ;;  %v461_v19 = vld [vmem:[%s594_s1 + $0x40] sm:$0xff]  }
   0x8   :  { %409 = vmatprep.subr.bf16.mxu0 %v450_v4  ;;  %441 = vmatprep.mubr.msk.bf16.mxu1 %vm19_vm0, %v467_v16  ;;  %v462_v20 = vld [vmem:[%s594_s1] sm:$0xff]   ;;  %v469_v22 = vld [vmem:[%s595_s0 + $0x1c] ss:$12 sps:$4 sm:$0xff]  }
   0x9   :  { %440 = vmatpush3.bf16.msra.mxu1 %v463_v13  ;;  %v464_v21 = vld [vmem:[%s595_s0] ss:$12 sps:$4 sm:$0xff]   ;;  %v471_v23 = vld [vmem:[%s595_s0 + $0x18] ss:$12 sps:$4 sm:$0xff]  }
   0xa   :  { %v32_v32 = vld [vmem:[#allocation2] sm:$0xff]  ;;  %v33_v39 = vld [vmem:[#allocation2 + $0x8] sm:$0xff]  ;;  %v34_v44 = vld [vmem:[#allocation2 + $0x10] sm:$0xff] }
   0xb   :  { %410 = vmatpush3.bf16.msra.mxu0 %v451_v5  ;;  %v396_v47 = vld [vmem:[%s596_s2] ss:$0 sm:$0xff]  ;;  %v35_v52 = vld [vmem:[#allocation2 + $0x18] sm:$0xff] }
   0xc   :  { %411 = vmatprep.subr.bf16.mxu0 %v452_v6  ;;  %442 = vmatmul.mubr.msk.bf16.vlgmr.msra.gmra.mxu1 %vm19_vm0, %v468_v17 }
   0xf   :  { %412 = vmatpush3.bf16.msra.mxu0 %v453_v7 }
  0x10   :  { %413 = vmatprep.subr.bf16.mxu0 %v454_v8 }
  0x13   :  { %414 = vmatpush3.bf16.msra.mxu0 %v455_v10 }
  0x14   :  { %415 = vmatprep.subr.bf16.mxu0 %v456_v11 }
  0x17   :  { %416 = vmatpush3.bf16.msra.mxu0 %v457_v12 }
  0x18   :  { %417 = vmatprep.subr.bf16.mxu0 %v458_v14 }
  0x1b   :  { %418 = vmatpush3.bf16.msra.mxu0 %v459_v18 }
  0x1c   :  { %419 = vmatprep.subr.bf16.mxu0 %v461_v19 }
  0x1f   :  { %420 = vmatpush3.bf16.msra.mxu0 %v462_v20 }
  0x22   :  { %250 = vmatmul.mubr.bf16.vlgmr.msra.gmra.mxu0 %v464_v21 }
  0x23   :  { %257 = vmatprep.mubr.bf16.mxu0 %v469_v22 }
  0x2a   :  { %258 = vmatmul.mubr.bf16.gmra.mxu0 %v471_v23 }
  0xcc   :  { %v443_v25 = vpop.f32.mrf.mxu1 }
  0xce   :  { %v300_v26 = vpop.f32.mrf.mxu1 }
  0xd0   :  { %v444_v29 = vpop.f32.mrf.mxu1 }
  0xd2   :  { %v303_v35 = vpop.f32.mrf.mxu1 }
  0xe2   :  { %v421_v27 = vpop.f32.mrf.mxu0 }
  0xe4   :  { %v422_v28 = vpop.f32.mrf.mxu0 }
  0xe5   :  { %v423_v30 = vadd.f32 %v422_v28, %v421_v27 }
  0xe6   :  { %v424_v31 = vpop.f32.mrf.mxu0 }
  0xe7   :  { %v301_v33 = vadd.f32 %v423_v30, %v300_v26 }
  0xe8   :  { %v425_v34 = vpop.f32.mrf.mxu0 }
  0xe9   :  { %v315_v36 = vadd.f32 %v301_v33, %v32_v32  ;;  %v426_v37 = vadd.f32 %v425_v34, %v424_v31 }
  0xea   :  { %v427_v38 = vpop.f32.mrf.mxu0 }
  0xeb   :  { %319 = vst.msk [vmem:[#allocation2] sm:$0xff] %vm19_vm0, %v315_v36  ;;  %v304_v40 = vadd.f32 %v426_v37, %v303_v35 }
  0xec   :  { %v428_v41 = vpop.f32.mrf.mxu0 }
  0xed   :  { %v316_v42 = vadd.f32 %v304_v40, %v33_v39  ;;  %v429_v43 = vadd.f32 %v428_v41, %v427_v38 }
  0xee   :  { %v430_v45 = vpop.f32.mrf.mxu0 }
  0xef   :  { %320 = vst.msk [vmem:[#allocation2 + $0x8] sm:$0xff] %vm19_vm0, %v316_v42  ;;  %v309_v46 = vadd.f32 %v443_v25, %v429_v43 }
  0xf0   :  { %v431_v48 = vpop.f32.mrf.mxu0 }
  0xf1   :  { %v317_v49 = vadd.f32 %v309_v46, %v34_v44  ;;  %v432_v50 = vadd.f32 %v431_v48, %v430_v45 }
  0xf2   :  { %v326_v51 = vld [vmem:[#allocation2] sm:$0xff] }
  0xf3   :  { %v337_v53 = vadd.f32 %v396_v47, %v326_v51  ;;  %321 = vst.msk [vmem:[#allocation2 + $0x10] sm:$0xff] %vm19_vm0, %v317_v49  ;;  %v312_v54 = vadd.f32 %v444_v29, %v432_v50 }
  0xf5   :  { %v341_v55 = vmax.f32 %v337_v53, 0.0  ;;  %v318_v56 = vadd.f32 %v312_v54, %v35_v52 }
  0xf6   :  { %v327_v57 = vld [vmem:[#allocation2 + $0x8] sm:$0xff] }
  0xf7   :  { %v401_v58 = vpack.c.bf16 %v341_v55, %v341_v55  ;;  %v338_v59 = vadd.f32 %v396_v47, %v327_v57  ;;  %322 = vst.msk [vmem:[#allocation2 + $0x18] sm:$0xff] %vm19_vm0, %v318_v56 }
  0xf9   :  { %362 = vst.msk [vmem:[%s597_s3] sm:$0xf] %vm361_vm1, %v401_v58  ;;  %v342_v60 = vmax.f32 %v338_v59, 0.0 }
  0xfa   :  { %v328_v61 = vld [vmem:[#allocation2 + $0x10] sm:$0xff] }
  0xfb   :  { %v402_v62 = vpack.c.bf16 %v342_v60, %v342_v60  ;;  %v339_v63 = vadd.f32 %v396_v47, %v328_v61 }
  0xfd   :  { %363 = vst.msk [vmem:[%s597_s3 + $0x4] sm:$0xf] %vm361_vm1, %v402_v62  ;;  %v343_v0 = vmax.f32 %v339_v63, 0.0 }
  0xfe   :  { %v329_v1 = vld [vmem:[#allocation2 + $0x18] sm:$0xff] }
  0xff   :  { %v403_v2 = vpack.c.bf16 %v343_v0, %v343_v0  ;;  %v340_v3 = vadd.f32 %v396_v47, %v329_v1 }
 0x101   :  { %364 = vst.msk [vmem:[%s597_s3 + $0x8] sm:$0xf] %vm361_vm1, %v403_v2  ;;  %v344_v4 = vmax.f32 %v340_v3, 0.0 }
 0x103   :  { %v404_v5 = vpack.c.bf16 %v344_v4, %v344_v4 }
 0x105   :  { %365 = vst.msk [vmem:[%s597_s3 + $0xc] sm:$0xf] %vm361_vm1, %v404_v5 }

// kernel: conformer_encoder.27
= control target key start
LH: loop header
LB: loop body
LE: loop exit
PB: predicated region body
PF: predicated region fallthrough
CT: control target
= control target key end

     0   :  { %vm19_vm0 = vcmask 261120   ;;  %v205_v0 = vmov 0.0   ;;  %vm206_vm1 = vmmov 0   ;;  %vm79_vm2 = vcmask 785408   ;;  %s261_s1 = inlined_call_operand.vmem [shape: bf16[96,32], index: 1, kind: input, shape index: {}]   ;;  %s262_s0 = inlined_call_operand.vmem [shape: bf16[16,96], index: 0, kind: input, shape index: {}]   ;;  %s263_s2 = inlined_call_operand.vmem [shape: f32[1,32], index: 2, kind: input, shape index: {}]   ;;  %s264_s3 = inlined_call_operand.vmem [shape: bf16[16,32], index: 3, kind: output, shape index: {}]  }
   0x1   :  { %180 = vmatprep.subr.bf16.mxu0 %v205_v0  ;;  %v198_v1 = vld [vmem:[%s261_s1 + $0x28] sm:$0xff]   ;;  %192 = vmatprep.mubr.msk.bf16.mxu0 %vm206_vm1, %v205_v0  ;;  %20 = vst.msk [vmem:[#allocation2] sm:$0xff] %vm19_vm0, %v205_v0  ;;  %21 = vst.msk [vmem:[#allocation2 + $0x8] sm:$0xff] %vm19_vm0, %v205_v0  ;;  %v199_v2 = vld [vmem:[%s261_s1 + $0x20] sm:$0xff]   ;;  %vm153_vm3 = vcmask 257024  }
   0x2   :  { %181 = vmatpush3.bf16.msra.mxu0 %v198_v1  ;;  %v200_v3 = vld [vmem:[%s261_s1 + $0x18] sm:$0xff]   ;;  %v201_v4 = vld [vmem:[%s261_s1 + $0x10] sm:$0xff]   ;;  %v202_v5 = vld [vmem:[%s261_s1 + $0x8] sm:$0xff]  }
   0x3   :  { %182 = vmatprep.subr.bf16.mxu0 %v205_v0  ;;  %v203_v6 = vld [vmem:[%s261_s1] sm:$0xff]  }
   0x4   :  { %v204_v7 = vld [vmem:[%s262_s0] sm:$0xff]  }
   0x5   :  { %v168_v16 = vld [vmem:[%s263_s2] ss:$0 sm:$0xff] }
   0x6   :  { %183 = vmatpush3.bf16.msra.mxu0 %v199_v2 }
   0x7   :  { %184 = vmatprep.subr.bf16.mxu0 %v205_v0 }
   0x8   :  { %v24_v8 = vld [vmem:[#allocation2] sm:$0xff]  ;;  %v25_v12 = vld [vmem:[#allocation2 + $0x8] sm:$0xff] }
   0xa   :  { %185 = vmatpush3.bf16.msra.mxu0 %v200_v3 }
   0xb   :  { %186 = vmatprep.subr.bf16.mxu0 %v205_v0 }
   0xe   :  { %187 = vmatpush3.bf16.msra.mxu0 %v201_v4 }
   0xf   :  { %188 = vmatprep.subr.bf16.mxu0 %v205_v0 }
  0x12   :  { %189 = vmatpush3.bf16.msra.mxu0 %v202_v5 }
  0x13   :  { %190 = vmatprep.subr.bf16.mxu0 %v205_v0 }
  0x16   :  { %191 = vmatpush3.bf16.msra.mxu0 %v203_v6 }
  0x19   :  { %193 = vmatmul.mubr.msk.bf16.vlgmr.msra.gmra.mxu0 %vm79_vm2, %v204_v7 }
  0xd9   :  { %v117_v9 = vpop.f32.mrf.mxu0 }
  0xda   :  { %v124_v10 = vadd.f32 %v117_v9, %v24_v8 }
  0xdb   :  { %v194_v11 = vpop.f32.mrf.mxu0 }
  0xdc   :  { %127 = vst.msk [vmem:[#allocation2] sm:$0xff] %vm19_vm0, %v124_v10 }
  0xdd   :  { %v120_v13 = vpop.f32.mrf.mxu0 }
  0xde   :  { %v125_v14 = vadd.f32 %v120_v13, %v25_v12 }
  0xdf   :  { %v195_v15 = vpop.f32.mrf.mxu0 }
  0xe0   :  { %128 = vst.msk [vmem:[#allocation2 + $0x8] sm:$0xff] %vm19_vm0, %v125_v14 }
  0xe3   :  { %v132_v17 = vld [vmem:[#allocation2] sm:$0xff] }
  0xe4   :  { %v141_v18 = vadd.f32 %v168_v16, %v132_v17 }
  0xe6   :  { %v143_v19 = vmul.f32 5.656854, %v141_v18 }
  0xe7   :  { %v133_v20 = vld [vmem:[#allocation2 + $0x8] sm:$0xff] }
  0xe8   :  { %v171_v21 = vpack.c.bf16 %v143_v19, %v143_v19  ;;  %v142_v22 = vadd.f32 %v168_v16, %v133_v20 }
  0xea   :  { %154 = vst.msk [vmem:[%s264_s3] sm:$0xf] %vm153_vm3, %v171_v21  ;;  %v144_v23 = vmul.f32 5.656854, %v142_v22 }
  0xec   :  { %v172_v24 = vpack.c.bf16 %v144_v23, %v144_v23 }
  0xee   :  { %155 = vst.msk [vmem:[%s264_s3 + $0x4] sm:$0xf] %vm153_vm3, %v172_v24 }

// kernel: conformer_encoder.29
= control target key start
LH: loop header
LB: loop body
LE: loop exit
PB: predicated region body
PF: predicated region fallthrough
CT: control target
= control target key end

     0   :  { %vm22_vm0 = vcmask 261120   ;;  %v240_v0 = vmov 0.0   ;;  %vm241_vm1 = vmmov 0   ;;  %vm175_vm2 = vcmask 257024   ;;  %s310_s1 = inlined_call_operand.vmem [shape: bf16[128,32], index: 1, kind: input, shape index: {}]   ;;  %s311_s0 = inlined_call_operand.vmem [shape: bf16[16,128], index: 0, kind: input, shape index: {}]   ;;  %s312_s2 = inlined_call_operand.vmem [shape: f32[1,32], index: 2, kind: input, shape index: {}]   ;;  %s313_s3 = inlined_call_operand.vmem [shape: bf16[16,32], index: 3, kind: input, shape index: {}]   ;;  %s314_s4 = inlined_call_operand.vmem [shape: bf16[16,32], index: 4, kind: output, shape index: {}]  }
   0x1   :  { %209 = vmatprep.subr.bf16.mxu0 %v240_v0  ;;  %v231_v1 = vld [vmem:[%s310_s1 + $0x38] sm:$0xff]   ;;  %225 = vmatprep.mubr.msk.bf16.mxu0 %vm241_vm1, %v240_v0  ;;  %23 = vst.msk [vmem:[#allocation2] sm:$0xff] %vm22_vm0, %v240_v0  ;;  %24 = vst.msk [vmem:[#allocation2 + $0x8] sm:$0xff] %vm22_vm0, %v240_v0  ;;  %v232_v2 = vld [vmem:[%s310_s1 + $0x30] sm:$0xff]  }
   0x2   :  { %210 = vmatpush3.bf16.msra.mxu0 %v231_v1  ;;  %v233_v3 = vld [vmem:[%s310_s1 + $0x28] sm:$0xff]   ;;  %v234_v4 = vld [vmem:[%s310_s1 + $0x20] sm:$0xff]   ;;  %v235_v5 = vld [vmem:[%s310_s1 + $0x18] sm:$0xff]  }
   0x3   :  { %211 = vmatprep.subr.bf16.mxu0 %v240_v0  ;;  %v236_v6 = vld [vmem:[%s310_s1 + $0x10] sm:$0xff]   ;;  %v237_v7 = vld [vmem:[%s310_s1 + $0x8] sm:$0xff]   ;;  %v238_v8 = vld [vmem:[%s310_s1] sm:$0xff]  }
   0x4   :  { %v239_v9 = vld [vmem:[%s311_s0] sm:$0xff]  }
   0x5   :  { %v191_v18 = vld [vmem:[%s312_s2] ss:$0 sm:$0xff] }
   0x6   :  { %212 = vmatpush3.bf16.msra.mxu0 %v232_v2  ;;  %v197_v19 = vld [vmem:[%s313_s3] sm:$0xff]  }
   0x7   :  { %213 = vmatprep.subr.bf16.mxu0 %v240_v0  ;;  %v198_v22 = vunpack.c.l.bf16 %v197_v19  ;;  %v199_v27 = vunpack.c.h.bf16 %v197_v19 }
   0x8   :  { %v27_v10 = vld [vmem:[#allocation2] sm:$0xff]  ;;  %v28_v14 = vld [vmem:[#allocation2 + $0x8] sm:$0xff] }
   0xa   :  { %214 = vmatpush3.bf16.msra.mxu0 %v233_v3 }
   0xb   :  { %215 = vmatprep.subr.bf16.mxu0 %v240_v0 }
   0xe   :  { %216 = vmatpush3.bf16.msra.mxu0 %v234_v4 }
   0xf   :  { %217 = vmatprep.subr.bf16.mxu0 %v240_v0 }
  0x12   :  { %218 = vmatpush3.bf16.msra.mxu0 %v235_v5 }
  0x13   :  { %219 = vmatprep.subr.bf16.mxu0 %v240_v0 }
  0x16   :  { %220 = vmatpush3.bf16.msra.mxu0 %v236_v6 }
  0x17   :  { %221 = vmatprep.subr.bf16.mxu0 %v240_v0 }
  0x1a   :  { %222 = vmatpush3.bf16.msra.mxu0 %v237_v7 }
  0x1b   :  { %223 = vmatprep.subr.bf16.mxu0 %v240_v0 }
  0x1e   :  { %224 = vmatpush3.bf16.msra.mxu0 %v238_v8 }
  0x21   :  { %226 = vmatmul.mubr.bf16.vlgmr.msra.gmra.mxu0 %v239_v9 }
  0xe1   :  { %v133_v11 = vpop.f32.mrf.mxu0 }
  0xe2   :  { %v140_v12 = vadd.f32 %v133_v11, %v27_v10 }
  0xe3   :  { %v227_v13 = vpop.f32.mrf.mxu0 }
  0xe4   :  { %143 = vst.msk [vmem:[#allocation2] sm:$0xff] %vm22_vm0, %v140_v12 }
  0xe5   :  { %v136_v15 = vpop.f32.mrf.mxu0 }
  0xe6   :  { %v141_v16 = vadd.f32 %v136_v15, %v28_v14 }
  0xe7   :  { %v228_v17 = vpop.f32.mrf.mxu0 }
  0xe8   :  { %144 = vst.msk [vmem:[#allocation2 + $0x8] sm:$0xff] %vm22_vm0, %v141_v16 }
  0xeb   :  { %v148_v20 = vld [vmem:[#allocation2] sm:$0xff] }
  0xec   :  { %v157_v21 = vadd.f32 %v191_v18, %v148_v20 }
  0xee   :  { %v163_v23 = vmul.f32 0.5, %v157_v21 }
  0xef   :  { %v149_v24 = vld [vmem:[#allocation2 + $0x8] sm:$0xff] }
  0xf0   :  { %v165_v25 = vadd.f32 %v198_v22, %v163_v23  ;;  %v158_v26 = vadd.f32 %v191_v18, %v149_v24 }
  0xf2   :  { %v194_v28 = vpack.c.bf16 %v165_v25, %v165_v25  ;;  %v164_v29 = vmul.f32 0.5, %v158_v26 }
  0xf4   :  { %176 = vst.msk [vmem:[%s314_s4] sm:$0xf] %vm175_vm2, %v194_v28  ;;  %v166_v30 = vadd.f32 %v199_v27, %v164_v29 }
  0xf6   :  { %v195_v31 = vpack.c.bf16 %v166_v30, %v166_v30 }
  0xf8   :  { %177 = vst.msk [vmem:[%s314_s4 + $0x4] sm:$0xf] %vm175_vm2, %v195_v31 }

// kernel: conformer_encoder.28
= control target key start
LH: loop header
LB: loop body
LE: loop exit
PB: predicated region body
PF: predicated region fallthrough
CT: control target
= control target key end

     0   :  { %vm33_vm0 = vcmask 261120   ;;  %v232_v15 = vmov 0.0   ;;  %vm233_vm1 = vmmov 0   ;;  %s290_s0 = inlined_call_operand.vmem [shape: bf16[16,32], index: 0, kind: input, shape index: {}]   ;;  %s291_s1 = inlined_call_operand.vmem [shape: bf16[32,128], index: 1, kind: input, shape index: {}]   ;;  %s292_s2 = inlined_call_operand.vmem [shape: f32[1,32], index: 2, kind: input, shape index: {}]   ;;  %s293_s3 = inlined_call_operand.vmem [shape: f32[1,32], index: 3, kind: input, shape index: {}]   ;;  %s294_s4 = inlined_call_operand.vmem [shape: f32[1,128], index: 4, kind: input, shape index: {}]   ;;  %s295_s5 = inlined_call_operand.vmem [shape: bf16[16,128], index: 5, kind: output, shape index: {}]  }
   0x1   :  { %v197_v0 = vld [vmem:[%s290_s0] sm:$0xff]   ;;  %208 = vmatprep.subr.bf16.mxu0 %v232_v15  ;;  %v218_v16 = vld [vmem:[%s291_s1 + $0x8] sm:$0xff]   ;;  %212 = vmatprep.mubr.msk.bf16.mxu0 %vm233_vm1, %v232_v15 }
   0x2   :  { %v198_v1 = vunpack.c.l.bf16 %v197_v0  ;;  %v199_v2 = vunpack.c.h.bf16 %v197_v0  ;;  %209 = vmatpush3.bf16.msra.mxu0 %v218_v16  ;;  %v219_v17 = vld [vmem:[%s291_s1] sm:$0xff]  }
   0x3   :  { %210 = vmatprep.subr.bf16.mxu0 %v232_v15  ;;  %v186_v26 = vld [vmem:[%s292_s2] ss:$0 sm:$0xff] }
   0x4   :  { %v34_v3 = vsel %vm33_vm0, %v198_v1, 0.0  ;;  %v37_v4 = vsel %vm33_vm0, %v199_v2, 0.0  ;;  %v187_v30 = vld [vmem:[%s293_s3] ss:$0 sm:$0xff] }
   0x5   :  { %35 = vadd.xlane.f32.xlu0 %v34_v3  ;;  %v191_v35 = vld [vmem:[%s294_s4] ss:$0 sm:$0xff] }
   0x6   :  { %211 = vmatpush3.bf16.msra.mxu0 %v219_v17 }
   0x9   :  { %38 = vadd.xlane.f32.xlu0 %v37_v4 }
  0x8e   :  { %v36_v5 = vpop.xlane.xlu0 %35 }
  0x8f   :  { %v41_v6 = vmul.f32 0.03125, %v36_v5 }
  0x91   :  { %v43_v7 = vsub.f32 %v198_v1, %v41_v6 }
  0x92   :  { %v39_v8 = vpop.xlane.xlu0 %38 }
  0x93   :  { %v42_v9 = vmul.f32 0.03125, %v39_v8  ;;  %v45_v10 = vmul.f32 %v43_v7, %v43_v7 }
  0x95   :  { %v44_v11 = vsub.f32 %v199_v2, %v42_v9  ;;  %v47_v12 = vsel %vm33_vm0, %v45_v10, 0.0 }
  0x96   :  { %48 = vadd.xlane.f32.xlu1 %v47_v12 }
  0x97   :  { %v46_v13 = vmul.f32 %v44_v11, %v44_v11 }
  0x99   :  { %v50_v14 = vsel %vm33_vm0, %v46_v13, 0.0 }
  0x9a   :  { %51 = vadd.xlane.f32.xlu1 %v50_v14 }
 0x11f   :  { %v49_v18 = vpop.xlane.xlu1 %48 }
 0x120   :  { %v53_v19 = vmul.f32 0.03125, %v49_v18 }
 0x122   :  { %v55_v20 = vadd.f32 1e-05, %v53_v19 }
 0x123   :  { %v52_v21 = vpop.xlane.xlu1 %51 }
 0x124   :  { %220 = vrsqrt.f32 %v55_v20  ;;  %v54_v22 = vmul.f32 0.03125, %v52_v21 }
 0x126   :  { %v56_v23 = vadd.f32 1e-05, %v54_v22 }
 0x128   :  { %222 = vrsqrt.f32 %v56_v23 }
 0x131   :  { %v221_v24 = vpop.eup %220 }
 0x132   :  { %v59_v25 = vmul.f32 %v221_v24, %v43_v7 }
 0x134   :  { %v67_v29 = vmul.f32 %v186_v26, %v59_v25 }
 0x135   :  { %v223_v27 = vpop.eup %222 }
 0x136   :  { %v60_v28 = vmul.f32 %v223_v27, %v44_v11  ;;  %v75_v32 = vadd.f32 %v187_v30, %v67_v29 }
 0x138   :  { %v68_v31 = vmul.f32 %v186_v26, %v60_v28 }
 0x13a   :  { %v76_v33 = vadd.f32 %v187_v30, %v68_v31 }
 0x13c   :  { %v77_v34 = vpack.c.bf16 %v76_v33, %v75_v32 }
 0x13e   :  { %213 = vmatmul.mubr.msk.bf16.vlgmr.msra.gmra.mxu0 %vm33_vm0, %v77_v34 }
 0x1fe   :  { %v133_v36 = vpop.f32.mrf.mxu0 }
 0x1ff   :  { %v156_v37 = vadd.f32 %v191_v35, %v133_v36 }
 0x200   :  { %v214_v38 = vpop.f32.mrf.mxu0 }
 0x201   :  { %v158_v39 = vsub.f32 0.0, %v156_v37 }
 0x202   :  { %v136_v40 = vpop.f32.mrf.mxu0 }
 0x203   :  { %v160_v41 = vmul.f32 1.442695, %v158_v39  ;;  %v157_v42 = vadd.f32 %v191_v35, %v136_v40 }
 0x204   :  { %v215_v43 = vpop.f32.mrf.mxu0 }
 0x205   :  { %224 = vpow2.f32 %v160_v41  ;;  %v159_v44 = vsub.f32 0.0, %v157_v42 }
 0x207   :  { %v162_v45 = vmul.f32 1.442695, %v159_v44 }
 0x209   :  { %226 = vpow2.f32 %v162_v45 }
 0x212   :  { %v225_v46 = vpop.eup %224 }
 0x213   :  { %v164_v47 = vadd.f32 1.0, %v225_v46 }
 0x215   :  { %228 = vrcp.f32 %v164_v47 }
 0x216   :  { %v227_v48 = vpop.eup %226 }
 0x217   :  { %v165_v49 = vadd.f32 1.0, %v227_v48 }
 0x219   :  { %230 = vrcp.f32 %v165_v49 }
 0x222   :  { %v229_v50 = vpop.eup %228 }
 0x223   :  { %v170_v52 = vmul.f32 %v229_v50, %v156_v37 }
 0x226   :  { %v231_v51 = vpop.eup %230 }
 0x227   :  { %v171_v53 = vmul.f32 %v231_v51, %v157_v42 }
 0x229   :  { %v203_v54 = vpack.c.bf16 %v171_v53, %v170_v52 }
 0x22b   :  { %204 = vst [vmem:[%s295_s5] sm:$0xff] %v203_v54  }

// kernel: conformer_encoder.30
= control target key start
LH: loop header
LB: loop body
LE: loop exit
PB: predicated region body
PF: predicated region fallthrough
CT: control target
= control target key end

     0   :  { %vm34_vm0 = vcmask 261120   ;;  %v208_v15 = vmov 0.0   ;;  %vm209_vm1 = vmmov 0   ;;  %vm25_vm2 = vcmask 785408   ;;  %s273_s0 = inlined_call_operand.vmem [shape: bf16[16,32], index: 0, kind: input, shape index: {}]   ;;  %s274_s1 = inlined_call_operand.vmem [shape: bf16[32,96], index: 1, kind: input, shape index: {}]   ;;  %s275_s2 = inlined_call_operand.vmem [shape: f32[1,32], index: 2, kind: input, shape index: {}]   ;;  %s276_s3 = inlined_call_operand.vmem [shape: f32[1,32], index: 3, kind: input, shape index: {}]   ;;  %s277_s4 = inlined_call_operand.vmem [shape: f32[1,96], index: 4, kind: input, shape index: {}]   ;;  %s278_s5 = inlined_call_operand.vmem [shape: bf16[16,96], index: 5, kind: output, shape index: {}]  }
   0x1   :  { %v186_v0 = vld [vmem:[%s273_s0] sm:$0xff]   ;;  %192 = vmatprep.subr.bf16.mxu0 %v208_v15  ;;  %v202_v16 = vld [vmem:[%s274_s1 + $0x8] sm:$0xff]   ;;  %196 = vmatprep.mubr.msk.bf16.mxu0 %vm209_vm1, %v208_v15  ;;  %26 = vst.msk [vmem:[#allocation2] sm:$0xff] %vm25_vm2, %v208_v15  ;;  %27 = vst.msk [vmem:[#allocation2 + $0x8] sm:$0xff] %vm25_vm2, %v208_v15  ;;  %vm168_vm3 = vcmask 781312  }
   0x2   :  { %v187_v1 = vunpack.c.l.bf16 %v186_v0  ;;  %v188_v2 = vunpack.c.h.bf16 %v186_v0  ;;  %193 = vmatpush3.bf16.msra.mxu0 %v202_v16  ;;  %v203_v17 = vld [vmem:[%s274_s1] sm:$0xff]  }
   0x3   :  { %194 = vmatprep.subr.bf16.mxu0 %v208_v15  ;;  %v175_v26 = vld [vmem:[%s275_s2] ss:$0 sm:$0xff] }
   0x4   :  { %v35_v3 = vsel %vm34_vm0, %v187_v1, 0.0  ;;  %v38_v4 = vsel %vm34_vm0, %v188_v2, 0.0  ;;  %v176_v30 = vld [vmem:[%s276_s3] ss:$0 sm:$0xff] }
   0x5   :  { %36 = vadd.xlane.f32.xlu0 %v35_v3  ;;  %v180_v43 = vld [vmem:[%s277_s4] ss:$0 sm:$0xff] }
   0x6   :  { %195 = vmatpush3.bf16.msra.mxu0 %v203_v17 }
   0x8   :  { %v79_v35 = vld [vmem:[#allocation2] sm:$0xff]  ;;  %v80_v39 = vld [vmem:[#allocation2 + $0x8] sm:$0xff] }
   0x9   :  { %39 = vadd.xlane.f32.xlu0 %v38_v4 }
  0x8e   :  { %v37_v5 = vpop.xlane.xlu0 %36 }
  0x8f   :  { %v42_v6 = vmul.f32 0.03125, %v37_v5 }
  0x91   :  { %v44_v7 = vsub.f32 %v187_v1, %v42_v6 }
  0x92   :  { %v40_v8 = vpop.xlane.xlu0 %39 }
  0x93   :  { %v43_v9 = vmul.f32 0.03125, %v40_v8  ;;  %v46_v10 = vmul.f32 %v44_v7, %v44_v7 }
  0x95   :  { %v45_v11 = vsub.f32 %v188_v2, %v43_v9  ;;  %v48_v12 = vsel %vm34_vm0, %v46_v10, 0.0 }
  0x96   :  { %49 = vadd.xlane.f32.xlu1 %v48_v12 }
  0x97   :  { %v47_v13 = vmul.f32 %v45_v11, %v45_v11 }
  0x99   :  { %v51_v14 = vsel %vm34_vm0, %v47_v13, 0.0 }
  0x9a   :  { %52 = vadd.xlane.f32.xlu1 %v51_v14 }
 0x11f   :  { %v50_v18 = vpop.xlane.xlu1 %49 }
 0x120   :  { %v54_v19 = vmul.f32 0.03125, %v50_v18 }
 0x122   :  { %v56_v20 = vadd.f32 1e-05, %v54_v19 }
 0x123   :  { %v53_v21 = vpop.xlane.xlu1 %52 }
 0x124   :  { %204 = vrsqrt.f32 %v56_v20  ;;  %v55_v22 = vmul.f32 0.03125, %v53_v21 }
 0x126   :  { %v57_v23 = vadd.f32 1e-05, %v55_v22 }
 0x128   :  { %206 = vrsqrt.f32 %v57_v23 }
 0x131   :  { %v205_v24 = vpop.eup %204 }
 0x132   :  { %v60_v25 = vmul.f32 %v205_v24, %v44_v7 }
 0x134   :  { %v68_v29 = vmul.f32 %v175_v26, %v60_v25 }
 0x135   :  { %v207_v27 = vpop.eup %206 }
 0x136   :  { %v61_v28 = vmul.f32 %v207_v27, %v45_v11  ;;  %v76_v32 = vadd.f32 %v176_v30, %v68_v29 }
 0x138   :  { %v69_v31 = vmul.f32 %v175_v26, %v61_v28 }
 0x13a   :  { %v77_v33 = vadd.f32 %v176_v30, %v69_v31 }
 0x13c   :  { %v78_v34 = vpack.c.bf16 %v77_v33, %v76_v32 }
 0x13e   :  { %197 = vmatmul.mubr.msk.bf16.vlgmr.msra.gmra.mxu0 %vm34_vm0, %v78_v34 }
 0x1fe   :  { %v134_v36 = vpop.f32.mrf.mxu0 }
 0x1ff   :  { %v141_v37 = vadd.f32 %v134_v36, %v79_v35 }
 0x200   :  { %v198_v38 = vpop.f32.mrf.mxu0 }
 0x201   :  { %144 = vst.msk [vmem:[#allocation2] sm:$0xff] %vm25_vm2, %v141_v37 }
 0x202   :  { %v137_v40 = vpop.f32.mrf.mxu0 }
 0x203   :  { %v142_v41 = vadd.f32 %v137_v40, %v80_v39 }
 0x204   :  { %v199_v42 = vpop.f32.mrf.mxu0 }
 0x205   :  { %145 = vst.msk [vmem:[#allocation2 + $0x8] sm:$0xff] %vm25_vm2, %v142_v41 }
 0x208   :  { %v149_v44 = vld [vmem:[#allocation2] sm:$0xff] }
 0x209   :  { %v158_v45 = vadd.f32 %v180_v43, %v149_v44 }
 0x20b   :  { %v183_v46 = vpack.c.bf16 %v158_v45, %v158_v45 }
 0x20c   :  { %v150_v47 = vld [vmem:[#allocation2 + $0x8] sm:$0xff] }
 0x20d   :  { %169 = vst.msk [vmem:[%s278_s5] sm:$0xf] %vm168_vm3, %v183_v46  ;;  %v159_v48 = vadd.f32 %v180_v43, %v150_v47 }
 0x20f   :  { %v184_v49 = vpack.c.bf16 %v159_v48, %v159_v48 }
 0x211   :  { %170 = vst.msk [vmem:[%s278_s5 + $0x4] sm:$0xf] %vm168_vm3, %v184_v49 }

// kernel: conformer_encoder.31
= control target key start
LH: loop header
LB: loop body
LE: loop exit
PB: predicated region body
PF: predicated region fallthrough
CT: control target
= control target key end

     0   :  { %vm16_vm0 = vcmask 261120   ;;  %v137_v0 = vmov 0.0   ;;  %vm138_vm1 = vmmov 0   ;;  %vm106_vm2 = vcmask 257024   ;;  %s174_s1 = inlined_call_operand.vmem [shape: bf16[32,32], index: 1, kind: input, shape index: {}]   ;;  %s175_s0 = inlined_call_operand.vmem [shape: bf16[16,32], index: 0, kind: input, shape index: {}]   ;;  %s176_s2 = inlined_call_operand.vmem [shape: bf16[16,32], index: 2, kind: output, shape index: {}]  }
   0x1   :  { %124 = vmatprep.subr.bf16.mxu0 %v137_v0  ;;  %v134_v1 = vld [vmem:[%s174_s1 + $0x8] sm:$0xff]   ;;  %128 = vmatprep.mubr.msk.bf16.mxu0 %vm138_vm1, %v137_v0  ;;  %17 = vst.msk [vmem:[#allocation2] sm:$0xff] %vm16_vm0, %v137_v0  ;;  %18 = vst.msk [vmem:[#allocation2 + $0x8] sm:$0xff] %vm16_vm0, %v137_v0  ;;  %v135_v2 = vld [vmem:[%s174_s1] sm:$0xff]  }
   0x2   :  { %125 = vmatpush3.bf16.msra.mxu0 %v134_v1  ;;  %v136_v3 = vld [vmem:[%s175_s0] sm:$0xff]  }
   0x3   :  { %126 = vmatprep.subr.bf16.mxu0 %v137_v0 }
   0x6   :  { %127 = vmatpush3.bf16.msra.mxu0 %v135_v2 }
   0x8   :  { %v21_v4 = vld [vmem:[#allocation2] sm:$0xff]  ;;  %v22_v8 = vld [vmem:[#allocation2 + $0x8] sm:$0xff] }
   0x9   :  { %129 = vmatmul.mubr.msk.bf16.vlgmr.msra.gmra.mxu0 %vm16_vm0, %v136_v3 }
  0xc9   :  { %v82_v5 = vpop.f32.mrf.mxu0 }
  0xca   :  { %v89_v6 = vadd.f32 %v82_v5, %v21_v4 }
  0xcb   :  { %v130_v7 = vpop.f32.mrf.mxu0 }
  0xcc   :  { %91 = vst.msk [vmem:[#allocation2] sm:$0xff] %vm16_vm0, %v89_v6 }
  0xcd   :  { %v85_v9 = vpop.f32.mrf.mxu0 }
  0xce   :  { %v90_v10 = vadd.f32 %v85_v9, %v22_v8 }
  0xcf   :  { %v131_v11 = vpop.f32.mrf.mxu0 }
  0xd0   :  { %92 = vst.msk [vmem:[#allocation2 + $0x8] sm:$0xff] %vm16_vm0, %v90_v10 }
  0xd3   :  { %v96_v12 = vld [vmem:[#allocation2] sm:$0xff] }
  0xd4   :  { %v119_v13 = vpack.c.bf16 %v96_v12, %v96_v12 }
  0xd6   :  { %107 = vst.msk [vmem:[%s176_s2] sm:$0xf] %vm106_vm2, %v119_v13 }
  0xd7   :  { %v97_v14 = vld [vmem:[#allocation2 + $0x8] sm:$0xff] }
  0xd8   :  { %v120_v15 = vpack.c.bf16 %v97_v14, %v97_v14 }
  0xda   :  { %108 = vst.msk [vmem:[%s176_s2 + $0x4] sm:$0xf] %vm106_vm2, %v120_v15 }

// kernel: conformer_encoder.33
= control target key start
LH: loop header
LB: loop body
LE: loop exit
PB: predicated region body
PF: predicated region fallthrough
CT: control target
= control target key end

     0   :  { %vm22_vm0 = vcmask 261120   ;;  %v163_v0 = vmov 0.0   ;;  %vm164_vm1 = vmmov 0   ;;  %vm127_vm2 = vcmask 257024   ;;  %s216_s1 = inlined_call_operand.vmem [shape: bf16[32,32], index: 1, kind: input, shape index: {}]   ;;  %s217_s0 = inlined_call_operand.vmem [shape: bf16[16,32], index: 0, kind: input, shape index: {}]   ;;  %s218_s3 = inlined_call_operand.vmem [shape: bf16[16,32], index: 3, kind: input, shape index: {}]   ;;  %s219_s2 = inlined_call_operand.vmem [shape: f32[1,32], index: 2, kind: input, shape index: {}]   ;;  %s220_s4 = inlined_call_operand.vmem [shape: bf16[16,32], index: 4, kind: output, shape index: {}]  }
   0x1   :  { %150 = vmatprep.subr.bf16.mxu0 %v163_v0  ;;  %v160_v1 = vld [vmem:[%s216_s1 + $0x8] sm:$0xff]   ;;  %154 = vmatprep.mubr.msk.bf16.mxu0 %vm164_vm1, %v163_v0  ;;  %23 = vst.msk [vmem:[#allocation2] sm:$0xff] %vm22_vm0, %v163_v0  ;;  %24 = vst.msk [vmem:[#allocation2 + $0x8] sm:$0xff] %vm22_vm0, %v163_v0  ;;  %v161_v2 = vld [vmem:[%s216_s1] sm:$0xff]  }
   0x2   :  { %151 = vmatpush3.bf16.msra.mxu0 %v160_v1  ;;  %v162_v3 = vld [vmem:[%s217_s0] sm:$0xff]  }
   0x3   :  { %152 = vmatprep.subr.bf16.mxu0 %v163_v0  ;;  %v144_v11 = vld [vmem:[%s218_s3] sm:$0xff]  }
   0x4   :  { %v138_v13 = vld [vmem:[%s219_s2] ss:$0 sm:$0xff]  ;;  %v145_v14 = vunpack.c.l.bf16 %v144_v11  ;;  %v146_v18 = vunpack.c.h.bf16 %v144_v11 }
   0x6   :  { %153 = vmatpush3.bf16.msra.mxu0 %v161_v2 }
   0x8   :  { %v27_v4 = vld [vmem:[#allocation2] sm:$0xff]  ;;  %v28_v8 = vld [vmem:[#allocation2 + $0x8] sm:$0xff] }
   0x9   :  { %155 = vmatmul.mubr.msk.bf16.vlgmr.msra.gmra.mxu0 %vm22_vm0, %v162_v3 }
  0xc9   :  { %v88_v5 = vpop.f32.mrf.mxu0 }
  0xca   :  { %v95_v6 = vadd.f32 %v88_v5, %v27_v4 }
  0xcb   :  { %v156_v7 = vpop.f32.mrf.mxu0 }
  0xcc   :  { %97 = vst.msk [vmem:[#allocation2] sm:$0xff] %vm22_vm0, %v95_v6 }
  0xcd   :  { %v91_v9 = vpop.f32.mrf.mxu0 }
  0xce   :  { %v96_v10 = vadd.f32 %v91_v9, %v28_v8 }
  0xcf   :  { %v157_v12 = vpop.f32.mrf.mxu0 }
  0xd0   :  { %98 = vst.msk [vmem:[#allocation2 + $0x8] sm:$0xff] %vm22_vm0, %v96_v10 }
  0xd3   :  { %v102_v15 = vld [vmem:[#allocation2] sm:$0xff] }
  0xd4   :  { %v111_v16 = vadd.f32 %v138_v13, %v102_v15 }
  0xd6   :  { %v117_v17 = vadd.f32 %v145_v14, %v111_v16 }
  0xd7   :  { %v103_v19 = vld [vmem:[#allocation2 + $0x8] sm:$0xff] }
  0xd8   :  { %v141_v20 = vpack.c.bf16 %v117_v17, %v117_v17  ;;  %v112_v21 = vadd.f32 %v138_v13, %v103_v19 }
  0xda   :  { %128 = vst.msk [vmem:[%s220_s4] sm:$0xf] %vm127_vm2, %v141_v20  ;;  %v118_v22 = vadd.f32 %v146_v18, %v112_v21 }
  0xdc   :  { %v142_v23 = vpack.c.bf16 %v118_v22, %v118_v22 }
  0xde   :  { %129 = vst.msk [vmem:[%s220_s4 + $0x4] sm:$0xf] %vm127_vm2, %v142_v23 }

// kernel: conformer_encoder.32
= control target key start
LH: loop header
LB: loop body
LE: loop exit
PB: predicated region body
PF: predicated region fallthrough
CT: control target
= control target key end

     0   :  { %s1403_s18 = smov 0   ;;  %s1636_s0 = inlined_call_operand.vmem [shape: bf16[2,5,96], index: 0, kind: input, shape index: {}]   ;;  %s1637_s1 = inlined_call_operand.vmem [shape: bf16[9,32], index: 1, kind: input, shape index: {}]   ;;  %s1638_s2 = inlined_call_operand.vmem [shape: f32[4,8], index: 2, kind: input, shape index: {}]   ;;  %s1639_s3 = inlined_call_operand.vmem [shape: f32[4,8], index: 3, kind: input, shape index: {}]   ;;  %s1640_s4 = inlined_call_operand.vmem [shape: f32[2,1,5], index: 4, kind: input, shape index: {}]   ;;  %s1641_s5 = inlined_call_operand.vmem [shape: bf16[2,5,32], index: 5, kind: output, shape index: {}]  }
   0x1 LB: > { %s1166_s19 = sadd.s32 4294967295, %s1348_s18   ;;  %p1170_p0 = scmp.ge.s32.totalorder %s1348_s18, 1  ;;  %s1348_s18 = sphi %s1403_s18, %s15_s18  }
   0x2   : > { %p194_p1 = scmp.lt.s32.totalorder %s1348_s18, 3 }
   0x4   : > { %p195_p2 = pnand %p1170_p0, %p194_p1 }
   0x5   : > { %p223_p3 = scmp.lt.s32.totalorder (!%p195_p2), %s1166_s19, 1  ;;  %s1352_s28 = smov (!%p195_p2), 96  }
   0x6   : > { %198 = sbr.rel (%p195_p2) target bundleno = 2646 (0xa56), region = 40  ;;  %s1353_s6 = smov (!%p195_p2), 2  }
   0x7   : > { %s1354_s7 = smov (!%p195_p2), 1   ;;  %s1355_s8 = smov (!%p195_p2), 3  }
   0x8   : > { %s1356_s9 = smov (!%p195_p2), 4   ;;  %s1357_s12 = smov (!%p195_p2), 8  }
   0x9   : > { %s1358_s13 = smov (!%p195_p2), 120   ;;  %s1359_s14 = smov (!%p195_p2), 124  }
   0xa   : > { %s1361_s23 = smov (!%p195_p2), 64   ;;  %s1363_s24 = smov (!%p195_p2), 88  }
   0xb   : > { %vm259_vm0 = vcmask 64512   ;;  %v1350_v0 = vmov 0.0   ;;  %v1415_v1 = vld [vmem:[%s1637_s1] sm:$0x1f]   ;;  %vm1351_vm1 = vmmov 0   ;;  %s1643_s19 = smov (!%p223_p3, %s1166_s19), 1  ;;  %v385_v37 = vlaneseq }
   0xc   : > { %1221 = vmatprep.subr.bf16.mxu0 %v1350_v0  ;;  %1227 = vmatprep.subr.bf16.mxu1 %v1350_v0  ;;  %v264_v2 = vsel %vm259_vm0, %v1415_v1, 0  ;;  %s1171_s22 = sshll.u32 %s1643_s19, 2  ;;  %v1174_v4 = vld [vmem:[%s1639_s3] ss:$0 sm:$0xff]  ;;  %v1181_v18 = vld [vmem:[%s1639_s3 + $0x1] ss:$0 sm:$0xff]  ;;  %s229_s21 = scalar_lea.vmem %s1640_s4, %s1643_s19 }
   0xd   : > { %1223 = vmatprep.mubr.msk.bf16.mxu0 %vm1351_vm1, %v1350_v0  ;;  %1229 = vmatprep.mubr.msk.bf16.mxu1 %vm1351_vm1, %v1350_v0  ;;  %s226_s25 = scalar_lea.vmem %s1636_s0, %s1171_s22  ;;  %v1173_v9 = vld [vmem:[%s1638_s2] ss:$0 sm:$0xff]  ;;  %vm319_vm2 = vcmask 1040384   ;;  %vm321_vm3 = vcmask 1041408   ;;  %vm323_vm4 = vcmask 1042432   ;;  %vm325_vm5 = vcmask 1043456  }
   0xe   : > { %1222 = vmatpush3.bf16.xpose.msra.mxu0 %v264_v2  ;;  %v236_v3 = vld [vmem:[%s226_s25] sm:$0x7]  ;;  %v386_v39 = vshrl.u32 %v385_v37, 7  ;;  %v1360_v41 = vmov 0   ;;  %vm391_vm8 = vcmask 36864   ;;  %v1362_v58 = vmov 65535  }
   0xf   : > { %1233 = vmatprep.subr.bf16.mxu0 %v1350_v0  ;;  %v1436_v5 = vunpack.c.l.bf16 %v236_v3  ;;  %v1438_v6 = vcombine.low %v236_v3, %v236_v3  ;;  %v1180_v36 = vld [vmem:[%s1638_s2 + $0x1] ss:$0 sm:$0xff]  ;;  %v235_v38 = vld [vmem:[%s229_s21] sm:$0x1]  ;;  %v411_v59 = vsel %vm321_vm3, 4294967295, %v1362_v58  ;;  %s1364_s27 = smov 16  }
  0x10   : > { %vm383_vm6 = vcmp.gt.f32.partialorder %v235_v38, 0.0  ;;  %v387_v40 = vsub.s32 0, %v386_v39  ;;  %v1496_v60 = vsel %vm323_vm4, %v411_v59, 0  ;;  %v1186_v2 = vld [vmem:[%s1639_s3 + $0x2] ss:$0 sm:$0xff]  ;;  %vm407_vm9 = vcmask 39936  }
  0x11   : > { %v252_v7 = vadd.f32 %v1174_v4, %v1436_v5  ;;  %330 = vrot.lane.b32.xlu0 %v1438_v6, %s1352_s28  ;;  %v245_v12 = vadd.f32 %v1173_v9, %v1436_v5  ;;  %v384_v42 = vsel %vm383_vm6, 1, %v1360_v41  ;;  %s1365_s28 = smov 112   ;;  %s1366_s10 = smov 56   ;;  %v1191_v59 = vld [vmem:[%s1639_s3 + $0x3] ss:$0 sm:$0xff]  ;;  %vm1093_vm10 = vcmask 130048  }
  0x12   : > { %v1481_v43 = vrot.slane %v384_v42, %v387_v40  ;;  %s1367_s11 = smov 80   ;;  %s1368_s16 = smov 24   ;;  %vm1095_vm11 = vcmask 195584   ;;  %vm1098_vm12 = vcmask 256000   ;;  %vm1099_vm13 = vsmask.f32 2304 }
  0x13   : > { %v253_v8 = vpack.c.bf16 %v252_v7, %v252_v7  ;;  %v246_v13 = vpack.c.bf16 %v245_v12, %v245_v12  ;;  %s1369_s17 = smov 104   ;;  %vm1100_vm14 = vmand %vm1098_vm12, %vm1099_vm13 }
  0x14   : > { %vm389_vm7 = vcmp.eq.s32.totalorder %v1481_v43, 1 }
  0x15   : > { %1224 = vmatmul.mubr.msk.bf16.vlgmr.msra.gmra.mxu0 %vm259_vm0, %v253_v8 }
  0x16   : > { %1235 = vmatprep.mubr.msk.bf16.mxu0 %vm1351_vm1, %v1350_v0 }
  0x83   : > { %v331_v10 = vpop.permute.xlu0 %330 }
  0x84   : > { %v340_v11 = vsel %vm259_vm0, %v331_v10, 0 }
  0x85   : > { %1228 = vmatpush3.bf16.xpose.msra.mxu1 %v340_v11 }
  0x86   : > { %1239 = vmatprep.subr.bf16.mxu1 %v1350_v0 }
  0x8c   : > { %1230 = vmatmul.mubr.msk.bf16.vlgmr.msra.gmra.mxu1 %vm259_vm0, %v246_v13 }
  0x8d   : > { %1241 = vmatprep.mubr.msk.bf16.mxu1 %vm1351_vm1, %v1350_v0 }
  0xd5   : > { %v300_v14 = vpop.f32.mrf.mxu0 }
  0xd6   : > { %310 = vrot.lane.b32.xlu1 %v300_v14, %s1353_s6  ;;  %307 = vrot.lane.b32.xlu0 %v300_v14, %s1354_s7 }
  0xd7   : > { %v1225_v15 = vpop.f32.mrf.mxu0 }
  0xd9   : > { %v303_v16 = vpop.f32.mrf.mxu0 }
  0xda   : > { %313 = vrot.lane.b32.xlu1 %v300_v14, %s1355_s8  ;;  %316 = vrot.lane.b32.xlu0 %v300_v14, %s1356_s9 }
  0xdb   : > { %v1226_v17 = vpop.f32.mrf.mxu0 }
  0xde   : > { %473 = vrot.lane.b32.xlu0 %v1181_v18, %s1357_s12 }
  0xe2   : > { %481 = vrot.lane.b32.xlu0 %v1415_v1, %s1358_s13 }
 0x148   : > { %v311_v19 = vpop.permute.xlu1 %310  ;;  %v308_v20 = vpop.permute.xlu0 %307 }
 0x149   : > { %v320_v21 = vsel %vm319_vm2, %v300_v14, %v308_v20 }
 0x14a   : > { %v322_v23 = vsel %vm321_vm3, %v320_v21, %v311_v19 }
 0x14c   : > { %v314_v22 = vpop.permute.xlu1 %313  ;;  %v317_v24 = vpop.permute.xlu0 %316 }
 0x14d   : > { %v324_v25 = vsel %vm323_vm4, %v322_v23, %v314_v22  ;;  %v376_v26 = vpop.f32.mrf.mxu1 }
 0x14e   : > { %v326_v27 = vsel %vm325_vm5, %v324_v25, %v317_v24 }
 0x14f   : > { %333 = vrot.lane.b32.xlu1 %v326_v27, %s1359_s14  ;;  %v1231_v28 = vpop.f32.mrf.mxu1 }
 0x150   : > { %v474_v29 = vpop.permute.xlu0 %473 }
 0x151   : > { %v476_v30 = vadd.f32 %v474_v29, %v1436_v5  ;;  %v379_v31 = vpop.f32.mrf.mxu1  ;;  %v1185_v29 = vld [vmem:[%s1638_s2 + $0x2] ss:$0 sm:$0xff] }
 0x153   : > { %v477_v32 = vpack.c.bf16 %v476_v30, %v476_v30  ;;  %v1232_v33 = vpop.f32.mrf.mxu1 }
 0x154   : > { %v482_v34 = vpop.permute.xlu0 %481 }
 0x155   : > { %479 = vrot.lane.b32.xlu0 %v477_v32, %s1358_s13  ;;  %v487_v35 = vsel %vm259_vm0, %v482_v34, 0 }
 0x156   : > { %1240 = vmatpush3.bf16.xpose.msra.mxu1 %v487_v35 }
 0x157   : > { %1251 = vmatprep.subr.bf16.mxu1 %v1350_v0 }
 0x159   : > { %462 = vrot.lane.b32.xlu0 %v1180_v36, %s1357_s12 }
 0x1c1   : > { %v334_v44 = vpop.permute.xlu1 %333 }
 0x1c2   : > { %v377_v45 = vadd.f32 %v376_v26, %v334_v44 }
 0x1c4   : > { %v382_v46 = vmul.f32 0.35355338, %v377_v45 }
 0x1c6   : > { %v390_v47 = vsel %vm389_vm7, %v382_v46, -1e+30 }
 0x1c7   : > { %v480_v48 = vpop.permute.xlu0 %479  ;;  %v392_v49 = vsel %vm391_vm8, %v390_v47, -inf }
 0x1c8   : > { %1242 = vmatmul.mubr.msk.bf16.vlgmr.msra.gmra.mxu1 %vm259_vm0, %v480_v48  ;;  %393 = vmax.xlane.f32.xlu1 %v392_v49 }
 0x1c9   : > { %1253 = vmatprep.mubr.msk.bf16.mxu1 %vm1351_vm1, %v1350_v0 }
 0x1cb   : > { %v463_v50 = vpop.permute.xlu0 %462 }
 0x1cc   : > { %v465_v51 = vadd.f32 %v463_v50, %v1436_v5 }
 0x1ce   : > { %v466_v52 = vpack.c.bf16 %v465_v51, %v465_v51 }
 0x1d9   : > { %405 = vrot.lane.b32.xlu1 %v1438_v6, %s1361_s23  ;;  %s1370_s23 = smov 48  }
 0x1dd   : > { %547 = vrot.lane.b32.xlu1 %v466_v52, %s1358_s13 }
 0x251   : > { %v394_v53 = vpop.xlane.xlu1 %393 }
 0x252   : > { %v395_v54 = vsub.f32 %v390_v47, %v394_v53 }
 0x254   : > { %v396_v55 = vmul.f32 1.442695, %v395_v54 }
 0x255   : > { %v406_v61 = vpop.permute.xlu1 %405 }
 0x256   : > { %1326 = vpow2.f32 %v396_v55  ;;  %v414_v62 = vand.u32 %v1496_v60, %v406_v61 }
 0x258   : > { %1234 = vmatpush3.bf16.msra.mxu0 %v414_v62 }
 0x259   : > { %1245 = vmatprep.subr.bf16.mxu0 %v1350_v0  ;;  %v548_v9 = vpop.permute.xlu1 %547 }
 0x263   : > { %v1327_v56 = vpop.eup %1326 }
 0x264   : > { %v398_v57 = vsel %vm391_vm8, %v1327_v56, 0.0 }
 0x265   : > { %399 = vadd.xlane.f32.xlu0 %v398_v57 }
 0x27b   : > { %549 = vrot.lane.b32.xlu0 %v1438_v6, %s1363_s24 }
 0x288   : > { %v523_v63 = vpop.f32.mrf.mxu1 }
 0x289   : > { %530 = vrot.lane.b32.xlu1 %v523_v63, %s1354_s7  ;;  %539 = vrot.lane.b32.xlu0 %v523_v63, %s1356_s9 }
 0x28a   : > { %v1243_v3 = vpop.f32.mrf.mxu1 }
 0x28c   : > { %v526_v4 = vpop.f32.mrf.mxu1 }
 0x28d   : > { %533 = vrot.lane.b32.xlu1 %v523_v63, %s1353_s6  ;;  %681 = vrot.lane.b32.xlu0 %v1186_v2, %s1364_s27 }
 0x28e   : > { %v1244_v7 = vpop.f32.mrf.mxu1 }
 0x291   : > { %536 = vrot.lane.b32.xlu1 %v523_v63, %s1355_s8  ;;  %689 = vrot.lane.b32.xlu0 %v1415_v1, %s1365_s28 }
 0x2ee   : > { %v400_v8 = vpop.xlane.xlu0 %399 }
 0x2ef   : > { %1328 = vrcp.f32 %v400_v8 }
 0x2f2   : > { %v550_v10 = vpop.permute.xlu0 %549 }
 0x2f3   : > { %v559_v18 = vsel %vm259_vm0, %v550_v10, 0 }
 0x2fb   : > { %v531_v11 = vpop.permute.xlu1 %530  ;;  %v540_v12 = vpop.permute.xlu0 %539 }
 0x2fc   : > { %v1329_v13 = vpop.eup %1328  ;;  %v542_v21 = vsel %vm319_vm2, %v523_v63, %v531_v11 }
 0x2fd   : > { %v402_v14 = vmul.f32 %v1329_v13, %v1327_v56 }
 0x2ff   : > { %v534_v15 = vpop.permute.xlu1 %533  ;;  %v403_v16 = vsel %vm389_vm7, %v402_v14, 0.0  ;;  %v682_v17 = vpop.permute.xlu0 %681 }
 0x300   : > { %v404_v19 = vpack.c.bf16 %v403_v16, %v403_v16  ;;  %v684_v20 = vadd.f32 %v682_v17, %v1436_v5  ;;  %v543_v23 = vsel %vm321_vm3, %v542_v21, %v534_v15  ;;  %v1190_v21 = vld [vmem:[%s1638_s2 + $0x3] ss:$0 sm:$0xff] }
 0x302   : > { %1236 = vmatmul.mubr.msk.bf16.vlgmr.msra.gmra.mxu0 %vm407_vm9, %v404_v19  ;;  %v685_v22 = vpack.c.bf16 %v684_v20, %v684_v20 }
 0x303   : > { %1246 = vmatpush3.bf16.xpose.msra.mxu0 %v559_v18  ;;  %v537_v24 = vpop.permute.xlu1 %536  ;;  %1247 = vmatprep.mubr.msk.bf16.mxu0 %vm1351_vm1, %v1350_v0  ;;  %v690_v27 = vpop.permute.xlu0 %689 }
 0x304   : > { %v544_v25 = vsel %vm323_vm4, %v543_v23, %v537_v24  ;;  %687 = vrot.lane.b32.xlu0 %v685_v22, %s1365_s28  ;;  %1257 = vmatprep.subr.bf16.mxu0 %v1350_v0  ;;  %v695_v28 = vsel %vm259_vm0, %v690_v27, 0 }
 0x305   : > { %v545_v26 = vsel %vm325_vm5, %v544_v25, %v540_v12 }
 0x306   : > { %552 = vrot.lane.b32.xlu1 %v545_v26, %s1359_s14 }
 0x308   : > { %670 = vrot.lane.b32.xlu0 %v1185_v29, %s1364_s27 }
 0x30a   : > { %1248 = vmatmul.mubr.msk.bf16.vlgmr.msra.gmra.mxu0 %vm259_vm0, %v548_v9 }
 0x30b   : > { %1258 = vmatpush3.bf16.xpose.msra.mxu0 %v695_v28  ;;  %1259 = vmatprep.mubr.msk.bf16.mxu0 %vm1351_vm1, %v1350_v0 }
 0x30c   : > { %1269 = vmatprep.subr.bf16.mxu0 %v1350_v0 }
 0x376   : > { %v688_v30 = vpop.permute.xlu0 %687 }
 0x377   : > { %1260 = vmatmul.mubr.msk.bf16.vlgmr.msra.gmra.mxu0 %vm259_vm0, %v688_v30 }
 0x378   : > { %1271 = vmatprep.mubr.msk.bf16.mxu0 %vm1351_vm1, %v1350_v0  ;;  %v553_v35 = vpop.permute.xlu1 %552 }
 0x37a   : > { %v671_v45 = vpop.permute.xlu0 %670 }
 0x37b   : > { %v673_v46 = vadd.f32 %v671_v45, %v1436_v5 }
 0x37d   : > { %v674_v47 = vpack.c.bf16 %v673_v46, %v673_v46 }
 0x3c2   : > { %v1537_v31 = vpop.f32.mrf.mxu0 }
 0x3c4   : > { %v1237_v32 = vpop.f32.mrf.mxu0 }
 0x3c6   : > { %v453_v33 = vpop.f32.mrf.mxu0 }
 0x3c8   : > { %v1238_v34 = vpop.f32.mrf.mxu0 }
 0x3ca   : > { %v595_v36 = vpop.f32.mrf.mxu0 }
 0x3cb   : > { %v596_v37 = vadd.f32 %v595_v36, %v553_v35 }
 0x3cc   : > { %v1249_v38 = vpop.f32.mrf.mxu0 }
 0x3cd   : > { %v601_v39 = vmul.f32 0.35355338, %v596_v37 }
 0x3ce   : > { %v598_v40 = vpop.f32.mrf.mxu0 }
 0x3cf   : > { %v602_v41 = vsel %vm389_vm7, %v601_v39, -1e+30 }
 0x3d0   : > { %v1250_v42 = vpop.f32.mrf.mxu0  ;;  %v603_v44 = vsel %vm391_vm8, %v602_v41, -inf }
 0x3d1   : > { %604 = vmax.xlane.f32.xlu1 %v603_v44 }
 0x3e2   : > { %616 = vrot.lane.b32.xlu1 %v1438_v6, %s1366_s10 }
 0x3e6   : > { %755 = vrot.lane.b32.xlu1 %v674_v47, %s1365_s28 }
 0x437   : > { %v731_v48 = vpop.f32.mrf.mxu0 }
 0x438   : > { %738 = vrot.lane.b32.xlu1 %v731_v48, %s1354_s7 }
 0x439   : > { %v1261_v49 = vpop.f32.mrf.mxu0 }
 0x43b   : > { %v734_v50 = vpop.f32.mrf.mxu0 }
 0x43c   : > { %741 = vrot.lane.b32.xlu1 %v731_v48, %s1353_s6 }
 0x43d   : > { %v1262_v51 = vpop.f32.mrf.mxu0 }
 0x440   : > { %744 = vrot.lane.b32.xlu1 %v731_v48, %s1355_s8 }
 0x45a   : > { %v605_v52 = vpop.xlane.xlu1 %604 }
 0x45b   : > { %v606_v53 = vsub.f32 %v602_v41, %v605_v52 }
 0x45d   : > { %v607_v54 = vmul.f32 1.442695, %v606_v53 }
 0x45e   : > { %v617_v55 = vpop.permute.xlu1 %616 }
 0x45f   : > { %1330 = vpow2.f32 %v607_v54  ;;  %v622_v56 = vand.u32 %v617_v55, %v1496_v60 }
 0x461   : > { %1252 = vmatpush3.bf16.msra.mxu1 %v622_v56 }
 0x462   : > { %1263 = vmatprep.subr.bf16.mxu1 %v1350_v0  ;;  %v756_v61 = vpop.permute.xlu1 %755 }
 0x46c   : > { %v1331_v57 = vpop.eup %1330 }
 0x46d   : > { %v609_v58 = vsel %vm391_vm8, %v1331_v57, 0.0 }
 0x46e   : > { %610 = vadd.xlane.f32.xlu0 %v609_v58 }
 0x484   : > { %757 = vrot.lane.b32.xlu0 %v1438_v6, %s1367_s11 }
 0x488   : > { %747 = vrot.lane.b32.xlu0 %v731_v48, %s1356_s9 }
 0x48c   : > { %889 = vrot.lane.b32.xlu0 %v1191_v59, %s1368_s16 }
 0x490   : > { %897 = vrot.lane.b32.xlu0 %v1415_v1, %s1369_s17 }
 0x4aa   : > { %v739_v62 = vpop.permute.xlu1 %738 }
 0x4ab   : > { %v750_v3 = vsel %vm319_vm2, %v731_v48, %v739_v62 }
 0x4ae   : > { %v742_v63 = vpop.permute.xlu1 %741 }
 0x4af   : > { %v751_v7 = vsel %vm321_vm3, %v750_v3, %v742_v63 }
 0x4b2   : > { %v745_v8 = vpop.permute.xlu1 %744 }
 0x4b3   : > { %v752_v9 = vsel %vm323_vm4, %v751_v7, %v745_v8 }
 0x4f7   : > { %v611_v2 = vpop.xlane.xlu0 %610 }
 0x4f8   : > { %1332 = vrcp.f32 %v611_v2 }
 0x4fb   : > { %v758_v4 = vpop.permute.xlu0 %757 }
 0x4fc   : > { %v767_v17 = vsel %vm259_vm0, %v758_v4, 0 }
 0x4ff   : > { %v748_v10 = vpop.permute.xlu0 %747 }
 0x500   : > { %v753_v11 = vsel %vm325_vm5, %v752_v9, %v748_v10 }
 0x501   : > { %760 = vrot.lane.b32.xlu1 %v753_v11, %s1359_s14 }
 0x503   : > { %v890_v12 = vpop.permute.xlu0 %889 }
 0x504   : > { %v892_v1 = vadd.f32 %v890_v12, %v1436_v5 }
 0x505   : > { %v1333_v13 = vpop.eup %1332 }
 0x506   : > { %v613_v14 = vmul.f32 %v1333_v13, %v1331_v57  ;;  %v893_v15 = vpack.c.bf16 %v892_v1, %v892_v1 }
 0x507   : > { %v898_v19 = vpop.permute.xlu0 %897 }
 0x508   : > { %v614_v16 = vsel %vm389_vm7, %v613_v14, 0.0  ;;  %895 = vrot.lane.b32.xlu0 %v893_v15, %s1369_s17  ;;  %v903_v20 = vsel %vm259_vm0, %v898_v19, 0 }
 0x509   : > { %v615_v18 = vpack.c.bf16 %v614_v16, %v614_v16 }
 0x50b   : > { %1254 = vmatmul.mubr.msk.bf16.vlgmr.msra.gmra.mxu1 %vm407_vm9, %v615_v18 }
 0x50c   : > { %1264 = vmatpush3.bf16.xpose.msra.mxu1 %v767_v17  ;;  %1265 = vmatprep.mubr.msk.bf16.mxu1 %vm1351_vm1, %v1350_v0 }
 0x50d   : > { %1275 = vmatprep.subr.bf16.mxu1 %v1350_v0  ;;  %878 = vrot.lane.b32.xlu0 %v1190_v21, %s1368_s16 }
 0x513   : > { %1266 = vmatmul.mubr.msk.bf16.vlgmr.msra.gmra.mxu1 %vm259_vm0, %v756_v61 }
 0x514   : > { %1276 = vmatpush3.bf16.xpose.msra.mxu1 %v903_v20  ;;  %1277 = vmatprep.mubr.msk.bf16.mxu1 %vm1351_vm1, %v1350_v0 }
 0x515   : > { %1287 = vmatprep.subr.bf16.mxu1 %v1350_v0 }
 0x573   : > { %v761_v27 = vpop.permute.xlu1 %760 }
 0x57a   : > { %v896_v22 = vpop.permute.xlu0 %895 }
 0x57b   : > { %1278 = vmatmul.mubr.msk.bf16.vlgmr.msra.gmra.mxu1 %vm259_vm0, %v896_v22 }
 0x57c   : > { %1289 = vmatprep.mubr.msk.bf16.mxu1 %vm1351_vm1, %v1350_v0 }
 0x57f   : > { %v879_v37 = vpop.permute.xlu0 %878 }
 0x580   : > { %v881_v38 = vadd.f32 %v879_v37, %v1436_v5 }
 0x582   : > { %v882_v39 = vpack.c.bf16 %v881_v38, %v881_v38 }
 0x5cb   : > { %v1585_v23 = vpop.f32.mrf.mxu1 }
 0x5cd   : > { %v1255_v24 = vpop.f32.mrf.mxu1 }
 0x5cf   : > { %v661_v25 = vpop.f32.mrf.mxu1 }
 0x5d1   : > { %v1256_v26 = vpop.f32.mrf.mxu1 }
 0x5d3   : > { %v803_v28 = vpop.f32.mrf.mxu1 }
 0x5d4   : > { %v804_v29 = vadd.f32 %v803_v28, %v761_v27 }
 0x5d5   : > { %v1267_v30 = vpop.f32.mrf.mxu1 }
 0x5d6   : > { %v809_v32 = vmul.f32 0.35355338, %v804_v29 }
 0x5d7   : > { %v806_v33 = vpop.f32.mrf.mxu1 }
 0x5d8   : > { %v810_v34 = vsel %vm389_vm7, %v809_v32, -1e+30 }
 0x5d9   : > { %v1268_v35 = vpop.f32.mrf.mxu1  ;;  %v811_v36 = vsel %vm391_vm8, %v810_v34, -inf }
 0x5da   : > { %812 = vmax.xlane.f32.xlu1 %v811_v36 }
 0x5eb   : > { %824 = vrot.lane.b32.xlu1 %v1438_v6, %s1370_s23 }
 0x5ef   : > { %963 = vrot.lane.b32.xlu1 %v882_v39, %s1369_s17 }
 0x63b   : > { %v939_v40 = vpop.f32.mrf.mxu1 }
 0x63c   : > { %946 = vrot.lane.b32.xlu1 %v939_v40, %s1354_s7  ;;  %s1371_s7 = smov 72  }
 0x63d   : > { %v1279_v41 = vpop.f32.mrf.mxu1 }
 0x63f   : > { %v942_v42 = vpop.f32.mrf.mxu1 }
 0x640   : > { %949 = vrot.lane.b32.xlu1 %v939_v40, %s1353_s6  ;;  %s1372_s6 = smov 40  }
 0x641   : > { %v1280_v44 = vpop.f32.mrf.mxu1 }
 0x644   : > { %952 = vrot.lane.b32.xlu1 %v939_v40, %s1355_s8 }
 0x663   : > { %v813_v45 = vpop.xlane.xlu1 %812 }
 0x664   : > { %v814_v46 = vsub.f32 %v810_v34, %v813_v45 }
 0x666   : > { %v815_v47 = vmul.f32 1.442695, %v814_v46 }
 0x667   : > { %v825_v5 = vpop.permute.xlu1 %824 }
 0x668   : > { %1334 = vpow2.f32 %v815_v47  ;;  %v830_v48 = vand.u32 %v825_v5, %v1496_v60 }
 0x66a   : > { %1270 = vmatpush3.bf16.msra.mxu0 %v830_v48 }
 0x66b   : > { %1281 = vmatprep.subr.bf16.mxu0 %v1350_v0  ;;  %v964_v51 = vpop.permute.xlu1 %963 }
 0x675   : > { %v1335_v49 = vpop.eup %1334 }
 0x676   : > { %v817_v50 = vsel %vm391_vm8, %v1335_v49, 0.0 }
 0x677   : > { %818 = vadd.xlane.f32.xlu0 %v817_v50 }
 0x68d   : > { %965 = vrot.lane.b32.xlu0 %v1438_v6, %s1371_s7 }
 0x691   : > { %955 = vrot.lane.b32.xlu0 %v939_v40, %s1356_s9 }
 0x6ae   : > { %v947_v52 = vpop.permute.xlu1 %946 }
 0x6af   : > { %v958_v55 = vsel %vm319_vm2, %v939_v40, %v947_v52 }
 0x6b2   : > { %v950_v53 = vpop.permute.xlu1 %949 }
 0x6b3   : > { %v959_v57 = vsel %vm321_vm3, %v958_v55, %v950_v53 }
 0x6b6   : > { %v953_v58 = vpop.permute.xlu1 %952 }
 0x6b7   : > { %v960_v59 = vsel %vm323_vm4, %v959_v57, %v953_v58 }
 0x700   : > { %v819_v54 = vpop.xlane.xlu0 %818 }
 0x701   : > { %1336 = vrcp.f32 %v819_v54 }
 0x704   : > { %v966_v56 = vpop.permute.xlu0 %965 }
 0x705   : > { %v975_v4 = vsel %vm259_vm0, %v966_v56, 0 }
 0x708   : > { %v956_v61 = vpop.permute.xlu0 %955 }
 0x709   : > { %v961_v62 = vsel %vm325_vm5, %v960_v59, %v956_v61 }
 0x70a   : > { %968 = vrot.lane.b32.xlu1 %v961_v62, %s1359_s14 }
 0x70e   : > { %v1337_v63 = vpop.eup %1336 }
 0x70f   : > { %v821_v2 = vmul.f32 %v1337_v63, %v1335_v49 }
 0x711   : > { %v822_v3 = vsel %vm389_vm7, %v821_v2, 0.0 }
 0x712   : > { %v823_v7 = vpack.c.bf16 %v822_v3, %v822_v3 }
 0x714   : > { %1272 = vmatmul.mubr.msk.bf16.vlgmr.msra.gmra.mxu0 %vm407_vm9, %v823_v7 }
 0x715   : > { %1282 = vmatpush3.bf16.xpose.msra.mxu0 %v975_v4  ;;  %1283 = vmatprep.mubr.msk.bf16.mxu0 %vm1351_vm1, %v1350_v0 }
 0x71c   : > { %1284 = vmatmul.mubr.msk.bf16.vlgmr.msra.gmra.mxu0 %vm259_vm0, %v964_v51 }
 0x77c   : > { %v969_v12 = vpop.permute.xlu1 %968 }
 0x7d4   : > { %v866_v8 = vpop.f32.mrf.mxu0 }
 0x7d6   : > { %v1273_v9 = vpop.f32.mrf.mxu0 }
 0x7d8   : > { %v869_v10 = vpop.f32.mrf.mxu0 }
 0x7da   : > { %v1274_v11 = vpop.f32.mrf.mxu0 }
 0x7dc   : > { %v1011_v1 = vpop.f32.mrf.mxu0 }
 0x7dd   : > { %v1012_v13 = vadd.f32 %v1011_v1, %v969_v12 }
 0x7de   : > { %v1285_v14 = vpop.f32.mrf.mxu0 }
 0x7df   : > { %v1017_v15 = vmul.f32 0.35355338, %v1012_v13 }
 0x7e0   : > { %v1014_v16 = vpop.f32.mrf.mxu0 }
 0x7e1   : > { %v1018_v17 = vsel %vm389_vm7, %v1017_v15, -1e+30 }
 0x7e2   : > { %v1286_v18 = vpop.f32.mrf.mxu0  ;;  %v1019_v19 = vsel %vm391_vm8, %v1018_v17, -inf }
 0x7e3   : > { %1020 = vmax.xlane.f32.xlu0 %v1019_v19 }
 0x7f9   : > { %1032 = vrot.lane.b32.xlu0 %v1438_v6, %s1372_s6 }
 0x7fd   : > { %1085 = vrot.lane.b32.xlu0 %v866_v8, %s1364_s27 }
 0x86c   : > { %v1021_v0 = vpop.xlane.xlu0 %1020 }
 0x86d   : > { %v1022_v20 = vsub.f32 %v1018_v17, %v1021_v0 }
 0x86f   : > { %v1023_v21 = vmul.f32 1.442695, %v1022_v20 }
 0x870   : > { %v1033_v22 = vpop.permute.xlu0 %1032 }
 0x871   : > { %1338 = vpow2.f32 %v1023_v21  ;;  %v1038_v24 = vand.u32 %v1033_v22, %v1496_v60 }
 0x873   : > { %1288 = vmatpush3.bf16.msra.mxu1 %v1038_v24 }
 0x874   : > { %v1086_v43 = vpop.permute.xlu0 %1085 }
 0x87e   : > { %v1339_v25 = vpop.eup %1338 }
 0x87f   : > { %v1025_v26 = vsel %vm391_vm8, %v1339_v25, 0.0 }
 0x880   : > { %1026 = vadd.xlane.f32.xlu1 %v1025_v26 }
 0x891   : > { %1081 = vrot.lane.b32.xlu1 %v1585_v23, %s1357_s12  ;;  %s233_s12 = scalar_lea.vmem %s1641_s5, %s1171_s22 }
 0x892   : > { %v1101_v38 = vld [vmem:[%s233_s12] sm:$0x7] }
 0x909   : > { %v1027_v27 = vpop.xlane.xlu1 %1026 }
 0x90a   : > { %1340 = vrcp.f32 %v1027_v27 }
 0x90d   : > { %v1082_v35 = vpop.permute.xlu1 %1081 }
 0x90e   : > { %v1092_v23 = vsel %vm259_vm0, %v1537_v31, %v1082_v35 }
 0x90f   : > { %v1094_v36 = vsel %vm1093_vm10, %v1092_v23, %v1086_v43 }
 0x917   : > { %v1341_v6 = vpop.eup %1340 }
 0x918   : > { %v1029_v28 = vmul.f32 %v1341_v6, %v1339_v25 }
 0x91a   : > { %v1030_v29 = vsel %vm389_vm7, %v1029_v28, 0.0 }
 0x91b   : > { %v1031_v30 = vpack.c.bf16 %v1030_v29, %v1030_v29 }
 0x91d   : > { %1290 = vmatmul.mubr.msk.bf16.vlgmr.msra.gmra.mxu1 %vm407_vm9, %v1031_v30 }
 0x9dd   : > { %v1074_v60 = vpop.f32.mrf.mxu1 }
 0x9de   : > { %1089 = vrot.lane.b32.xlu1 %v1074_v60, %s1368_s16 }
 0x9df   : > { %v1291_v32 = vpop.f32.mrf.mxu1 }
 0x9e1   : > { %v1077_v33 = vpop.f32.mrf.mxu1 }
 0x9e3   : > { %v1292_v34 = vpop.f32.mrf.mxu1 }
 0xa50   : > { %v1090_v37 = vpop.permute.xlu1 %1089 }
 0xa51   : > { %v1096_v39 = vsel %vm1095_vm11, %v1094_v36, %v1090_v37 }
 0xa52   : > { %v1097_v40 = vpack.c.bf16 %v1096_v39, %v1096_v39 }
 0xa54   : > { %v1102_v41 = vsel %vm1100_vm14, %v1097_v40, %v1101_v38 }
 0xa55   : > { %1103 = vst [vmem:[%s233_s12] sm:$0x7] %v1102_v41 }
 0xa56 PF: > { %s15_s18 = sadd.s32 1, %s1348_s18  }
 0xa57   : > { %p12_p4 = scmp.ge.s32.totalorder %s15_s18, 4  }
 0xa59   :  { %14 = sbr.rel (!%p12_p4) target bundleno = 1 (0x1), region = 73 }

// kernel: conformer_encoder.34
= control target key start
LH: loop header
LB: loop body
LE: loop exit
PB: predicated region body
PF: predicated region fallthrough
CT: control target
= control target key end

     0   :  { %vm40_vm0 = vcmask 261120   ;;  %v295_v43 = vmov 0.0   ;;  %vm296_vm1 = vmmov 0   ;;  %vm31_vm2 = vcmask 523264   ;;  %s297_s11 = smov 96   ;;  %s381_s0 = inlined_call_operand.vmem [shape: bf16[16,32], index: 0, kind: input, shape index: {}]   ;;  %s382_s2 = inlined_call_operand.vmem [shape: f32[1,32], index: 2, kind: input, shape index: {}]   ;;  %s383_s3 = inlined_call_operand.vmem [shape: f32[1,32], index: 3, kind: input, shape index: {}]   ;;  %s384_s1 = inlined_call_operand.vmem [shape: bf16[32,64], index: 1, kind: input, shape index: {}]   ;;  %s385_s4 = inlined_call_operand.vmem [shape: f32[1,32], index: 4, kind: input, shape index: {}]   ;;  %s386_s5 = inlined_call_operand.vmem [shape: f32[1,32], index: 5, kind: input, shape index: {}]   ;;  %s387_s6 = inlined_call_operand.vmem [shape: f32[1,64], index: 6, kind: input, shape index: {}]   ;;  %s388_s7 = inlined_call_operand.vmem [shape: bf16[16,32], index: 7, kind: output, shape index: {}]  }
   0x1   :  { %v260_v0 = vld [vmem:[%s381_s0] sm:$0xff]   ;;  %266 = vmatprep.subr.bf16.mxu0 %v295_v43  ;;  %v277_v44 = vld [vmem:[%s384_s1 + $0x8] sm:$0xff]   ;;  %270 = vmatprep.mubr.msk.bf16.mxu0 %vm296_vm1, %v295_v43  ;;  %32 = vst.msk [vmem:[#allocation2] sm:$0xff] %vm31_vm2, %v295_v43  ;;  %33 = vst.msk [vmem:[#allocation2 + $0x8] sm:$0xff] %vm31_vm2, %v295_v43  ;;  %vm240_vm3 = vcmask 257024  }
   0x2   :  { %v261_v1 = vunpack.c.l.bf16 %v260_v0  ;;  %v262_v2 = vunpack.c.h.bf16 %v260_v0  ;;  %v247_v22 = vld [vmem:[%s382_s2] ss:$0 sm:$0xff]  ;;  %267 = vmatpush3.bf16.msra.mxu0 %v277_v44 }
   0x3   :  { %v248_v24 = vld [vmem:[%s383_s3] ss:$0 sm:$0xff]  ;;  %268 = vmatprep.subr.bf16.mxu0 %v295_v43 }
   0x4   :  { %v41_v3 = vsel %vm40_vm0, %v261_v1, 0.0  ;;  %v44_v4 = vsel %vm40_vm0, %v262_v2, 0.0  ;;  %v278_v45 = vld [vmem:[%s384_s1] sm:$0xff]  }
   0x5   :  { %42 = vadd.xlane.f32.xlu0 %v41_v3  ;;  %v249_v54 = vld [vmem:[%s385_s4] ss:$0 sm:$0xff] }
   0x6   :  { %269 = vmatpush3.bf16.msra.mxu0 %v278_v45  ;;  %v250_v58 = vld [vmem:[%s386_s5] ss:$0 sm:$0xff] }
   0x8   :  { %v129_v63 = vld [vmem:[#allocation2] sm:$0xff]  ;;  %v130_v3 = vld [vmem:[#allocation2 + $0x8] sm:$0xff] }
   0x9   :  { %45 = vadd.xlane.f32.xlu0 %v44_v4 }
  0x8e   :  { %v43_v5 = vpop.xlane.xlu0 %42 }
  0x8f   :  { %v48_v6 = vmul.f32 0.03125, %v43_v5 }
  0x91   :  { %v50_v7 = vsub.f32 %v261_v1, %v48_v6 }
  0x92   :  { %v46_v8 = vpop.xlane.xlu0 %45 }
  0x93   :  { %v49_v9 = vmul.f32 0.03125, %v46_v8  ;;  %v52_v10 = vmul.f32 %v50_v7, %v50_v7 }
  0x95   :  { %v51_v11 = vsub.f32 %v262_v2, %v49_v9  ;;  %v54_v12 = vsel %vm40_vm0, %v52_v10, 0.0 }
  0x96   :  { %55 = vadd.xlane.f32.xlu1 %v54_v12 }
  0x97   :  { %v53_v13 = vmul.f32 %v51_v11, %v51_v11 }
  0x99   :  { %v57_v14 = vsel %vm40_vm0, %v53_v13, 0.0 }
  0x9a   :  { %58 = vadd.xlane.f32.xlu1 %v57_v14 }
 0x11f   :  { %v56_v15 = vpop.xlane.xlu1 %55 }
 0x120   :  { %v60_v16 = vmul.f32 0.03125, %v56_v15 }
 0x122   :  { %v62_v17 = vadd.f32 1e-05, %v60_v16 }
 0x123   :  { %v59_v18 = vpop.xlane.xlu1 %58 }
 0x124   :  { %279 = vrsqrt.f32 %v62_v17  ;;  %v61_v19 = vmul.f32 0.03125, %v59_v18 }
 0x126   :  { %v63_v20 = vadd.f32 1e-05, %v61_v19 }
 0x128   :  { %281 = vrsqrt.f32 %v63_v20 }
 0x131   :  { %v280_v21 = vpop.eup %279 }
 0x132   :  { %v66_v23 = vmul.f32 %v280_v21, %v50_v7  ;;  %v254_v7 = vld [vmem:[%s387_s6] ss:$0 sm:$0xff] }
 0x134   :  { %v74_v25 = vmul.f32 %v247_v22, %v66_v23 }
 0x135   :  { %v282_v26 = vpop.eup %281 }
 0x136   :  { %v82_v27 = vadd.f32 %v248_v24, %v74_v25  ;;  %v67_v28 = vmul.f32 %v282_v26, %v51_v11 }
 0x138   :  { %v86_v29 = vsel %vm40_vm0, %v82_v27, 0.0  ;;  %v75_v30 = vmul.f32 %v247_v22, %v67_v28 }
 0x139   :  { %87 = vadd.xlane.f32.xlu0 %v86_v29 }
 0x13a   :  { %v83_v31 = vadd.f32 %v248_v24, %v75_v30 }
 0x13c   :  { %v89_v32 = vsel %vm40_vm0, %v83_v31, 0.0 }
 0x13d   :  { %90 = vadd.xlane.f32.xlu1 %v89_v32 }
 0x1c2   :  { %v88_v33 = vpop.xlane.xlu0 %87 }
 0x1c3   :  { %v92_v34 = vmul.f32 0.03125, %v88_v33 }
 0x1c5   :  { %v94_v35 = vsub.f32 %v82_v27, %v92_v34 }
 0x1c6   :  { %v91_v36 = vpop.xlane.xlu1 %90 }
 0x1c7   :  { %v93_v37 = vmul.f32 0.03125, %v91_v36  ;;  %v96_v38 = vmul.f32 %v94_v35, %v94_v35 }
 0x1c9   :  { %v95_v39 = vsub.f32 %v83_v31, %v93_v37  ;;  %v98_v40 = vsel %vm40_vm0, %v96_v38, 0.0 }
 0x1ca   :  { %99 = vadd.xlane.f32.xlu0 %v98_v40 }
 0x1cb   :  { %v97_v41 = vmul.f32 %v95_v39, %v95_v39 }
 0x1cd   :  { %v101_v42 = vsel %vm40_vm0, %v97_v41, 0.0 }
 0x1ce   :  { %102 = vadd.xlane.f32.xlu1 %v101_v42 }
 0x253   :  { %v100_v46 = vpop.xlane.xlu0 %99 }
 0x254   :  { %v104_v47 = vmul.f32 0.03125, %v100_v46 }
 0x256   :  { %v106_v48 = vadd.f32 1e-05, %v104_v47 }
 0x257   :  { %v103_v49 = vpop.xlane.xlu1 %102 }
 0x258   :  { %283 = vrsqrt.f32 %v106_v48  ;;  %v105_v50 = vmul.f32 0.03125, %v103_v49 }
 0x25a   :  { %v107_v51 = vadd.f32 1e-05, %v105_v50 }
 0x25c   :  { %285 = vrsqrt.f32 %v107_v51 }
 0x265   :  { %v284_v52 = vpop.eup %283 }
 0x266   :  { %v110_v53 = vmul.f32 %v284_v52, %v94_v35 }
 0x268   :  { %v118_v57 = vmul.f32 %v249_v54, %v110_v53 }
 0x269   :  { %v286_v55 = vpop.eup %285 }
 0x26a   :  { %v111_v56 = vmul.f32 %v286_v55, %v95_v39  ;;  %v126_v60 = vadd.f32 %v250_v58, %v118_v57 }
 0x26c   :  { %v119_v59 = vmul.f32 %v249_v54, %v111_v56 }
 0x26e   :  { %v127_v61 = vadd.f32 %v250_v58, %v119_v59 }
 0x270   :  { %v128_v62 = vpack.c.bf16 %v127_v61, %v126_v60 }
 0x272   :  { %271 = vmatmul.mubr.msk.bf16.vlgmr.msra.gmra.mxu0 %vm40_vm0, %v128_v62 }
 0x332   :  { %v184_v0 = vpop.f32.mrf.mxu0 }
 0x333   :  { %v191_v1 = vadd.f32 %v184_v0, %v129_v63 }
 0x334   :  { %v272_v2 = vpop.f32.mrf.mxu0 }
 0x335   :  { %194 = vst.msk [vmem:[#allocation2] sm:$0xff] %vm31_vm2, %v191_v1 }
 0x336   :  { %v187_v4 = vpop.f32.mrf.mxu0 }
 0x337   :  { %v192_v5 = vadd.f32 %v187_v4, %v130_v3 }
 0x338   :  { %v273_v6 = vpop.f32.mrf.mxu0 }
 0x339   :  { %195 = vst.msk [vmem:[#allocation2 + $0x8] sm:$0xff] %vm31_vm2, %v192_v5 }
 0x33c   :  { %v199_v8 = vld [vmem:[#allocation2] sm:$0xff] }
 0x33d   :  { %v208_v9 = vadd.f32 %v254_v7, %v199_v8 }
 0x33f   :  { %v210_v10 = vsub.f32 0.0, %v208_v9 }
 0x340   :  { %v200_v11 = vld [vmem:[#allocation2 + $0x8] sm:$0xff] }
 0x341   :  { %v212_v12 = vmul.f32 1.442695, %v210_v10  ;;  %v209_v13 = vadd.f32 %v254_v7, %v200_v11 }
 0x343   :  { %287 = vpow2.f32 %v212_v12  ;;  %v211_v14 = vsub.f32 0.0, %v209_v13 }
 0x345   :  { %v214_v15 = vmul.f32 1.442695, %v211_v14 }
 0x347   :  { %289 = vpow2.f32 %v214_v15 }
 0x350   :  { %v288_v16 = vpop.eup %287 }
 0x351   :  { %v216_v17 = vadd.f32 1.0, %v288_v16 }
 0x353   :  { %291 = vrcp.f32 %v216_v17 }
 0x354   :  { %v290_v18 = vpop.eup %289 }
 0x355   :  { %v217_v19 = vadd.f32 1.0, %v290_v18 }
 0x357   :  { %293 = vrcp.f32 %v217_v19 }
 0x360   :  { %v292_v20 = vpop.eup %291 }
 0x361   :  { %224 = vrot.lane.b32.xlu0 %v292_v20, %s297_s11 }
 0x364   :  { %v294_v21 = vpop.eup %293 }
 0x365   :  { %226 = vrot.lane.b32.xlu1 %v294_v21, %s297_s11 }
 0x3d3   :  { %v225_v22 = vpop.permute.xlu0 %224 }
 0x3d4   :  { %v230_v23 = vmul.f32 %v225_v22, %v208_v9 }
 0x3d6   :  { %v257_v24 = vpack.c.bf16 %v230_v23, %v230_v23 }
 0x3d7   :  { %v227_v25 = vpop.permute.xlu1 %226 }
 0x3d8   :  { %241 = vst.msk [vmem:[%s388_s7] sm:$0xf] %vm240_vm3, %v257_v24  ;;  %v231_v26 = vmul.f32 %v227_v25, %v209_v13 }
 0x3da   :  { %v258_v27 = vpack.c.bf16 %v231_v26, %v231_v26 }
 0x3dc   :  { %242 = vst.msk [vmem:[%s388_s7 + $0x4] sm:$0xf] %vm240_vm3, %v258_v27 }

// kernel: conformer_encoder.35
= control target key start
LH: loop header
LB: loop body
LE: loop exit
PB: predicated region body
PF: predicated region fallthrough
CT: control target
= control target key end

     0   :  { %s437_s15 = smov 0   ;;  %s485_s0 = inlined_call_operand.vmem [shape: bf16[2,16,32], index: 0, kind: input, shape index: {}]   ;;  %s486_s1 = inlined_call_operand.vmem [shape: f32[7,32], index: 1, kind: input, shape index: {}]   ;;  %s487_s2 = inlined_call_operand.vmem [shape: f32[1,32], index: 2, kind: input, shape index: {}]   ;;  %s488_s3 = inlined_call_operand.vmem [shape: f32[1,32], index: 3, kind: input, shape index: {}]   ;;  %s489_s4 = inlined_call_operand.vmem [shape: bf16[2,5,32], index: 4, kind: output, shape index: {}]  }
   0x1 LB: > { %s372_s16 = sadd.s32 4294967295, %s410_s15   ;;  %p376_p0 = scmp.ge.s32.totalorder %s410_s15, 1  ;;  %s410_s15 = sphi %s437_s15, %s14_s15  }
   0x2   : > { %p162_p1 = scmp.lt.s32.totalorder %s410_s15, 3 }
   0x4   : > { %p163_p2 = pnand %p376_p0, %p162_p1 }
   0x5   : > { %p187_p3 = scmp.lt.s32.totalorder (!%p163_p2), %s372_s16, 1 }
   0x6   : > { %166 = sbr.rel (%p163_p2) target bundleno = 77 (0x4d), region = 36 }
   0xb   : > { %s491_s16 = smov (!%p187_p3, %s372_s16), 1  ;;  %v380_v0 = vld [vmem:[%s486_s1] ss:$0 sm:$0xff]  ;;  %v381_v1 = vld [vmem:[%s486_s1 + $0x1] ss:$0 sm:$0xff]  ;;  %vm249_vm0 = vcmask 1043456  }
   0xc   : > { %s391_s17 = sshll.u32 %s491_s16, 3  ;;  %v382_v2 = vld [vmem:[%s486_s1 + $0x2] ss:$0 sm:$0xff]  ;;  %v383_v3 = vld [vmem:[%s486_s1 + $0x3] ss:$0 sm:$0xff]  ;;  %vm264_vm1 = vcmask 1042432  }
   0xd   : > { %s191_s26 = scalar_lea.vmem %s485_s0, %s391_s17  ;;  %v384_v4 = vld [vmem:[%s486_s1 + $0x4] ss:$0 sm:$0xff]  ;;  %v385_v5 = vld [vmem:[%s486_s1 + $0x5] ss:$0 sm:$0xff]  ;;  %v386_v22 = vld [vmem:[%s486_s1 + $0x6] ss:$0 sm:$0xff] }
   0xe   : > { %v196_v6 = vld [vmem:[%s191_s26] sm:$0x7]  ;;  %v237_v11 = vld [vmem:[%s191_s26 + $0x4] sm:$0x1]  ;;  %v270_v13 = vld [vmem:[%s191_s26] sm:$0x8] }
   0xf   : > { %v214_v7 = vld [vmem:[%s191_s26] sm:$0xe]  ;;  %v197_v9 = vunpack.c.l.bf16 %v196_v6  ;;  %v271_v14 = vld [vmem:[%s191_s26 + $0x4] sm:$0x3]  ;;  %v239_v15 = vunpack.c.l.bf16 %v237_v11  ;;  %v272_v16 = vunpack.c.l.bf16 %v270_v13  ;;  %vm283_vm2 = vcmask 1041408   ;;  %s379_s13 = sshll.u32 %s491_s16, 2 }
  0x10   : > { %v236_v8 = vld [vmem:[%s191_s26] sm:$0xc]  ;;  %v215_v10 = vunpack.c.l.bf16 %v214_v7  ;;  %v273_v17 = vunpack.c.l.bf16 %v271_v14  ;;  %v387_v46 = vld [vmem:[%s487_s2] ss:$0 sm:$0xff]  ;;  %s195_s18 = scalar_lea.vmem %s489_s4, %s379_s13  ;;  %vm313_vm3 = vcmask 256000  }
  0x11   : > { %v238_v12 = vunpack.c.l.bf16 %v236_v8  ;;  %v203_v18 = vmul.f32 %v380_v0, %v197_v9  ;;  %v209_v19 = vmul.f32 %v381_v1, %v197_v9  ;;  %v246_v24 = vmul.f32 %v384_v4, %v239_v15  ;;  %v388_v48 = vld [vmem:[%s488_s3] ss:$0 sm:$0xff] }
  0x12   : > { %v221_v20 = vmul.f32 %v382_v2, %v215_v10  ;;  %v231_v21 = vmul.f32 %v383_v3, %v215_v10  ;;  %v261_v26 = vmul.f32 %v385_v5, %v239_v15  ;;  %v279_v31 = vmul.f32 %v386_v22, %v272_v16  ;;  %v316_v57 = vld [vmem:[%s195_s18] sm:$0x7] }
  0x13   : > { %v245_v23 = vmul.f32 %v384_v4, %v238_v12  ;;  %v260_v25 = vmul.f32 %v385_v5, %v238_v12  ;;  %v211_v27 = vrot.slane %v209_v19, 1  ;;  %v251_v30 = vrot.slane %v246_v24, 4 }
  0x14   : > { %v223_v28 = vrot.slane %v221_v20, 2  ;;  %v233_v33 = vrot.slane %v231_v21, 3  ;;  %v280_v34 = vmul.f32 %v386_v22, %v273_v17  ;;  %v266_v36 = vrot.slane %v261_v26, 5 }
  0x15   : > { %v250_v29 = vrot.slane %v245_v23, 4  ;;  %v213_v32 = vadd.f32 %v211_v27, %v203_v18  ;;  %v265_v35 = vrot.slane %v260_v25, 5  ;;  %v284_v39 = vrot.slane %v279_v31, 6 }
  0x16   : > { %v285_v40 = vrot.slane %v280_v34, 6  ;;  %vm314_vm4 = vsmask.f32 2304 }
  0x17   : > { %v225_v37 = vadd.f32 %v223_v28, %v213_v32  ;;  %v252_v38 = vsel %vm249_vm0, %v250_v29, %v251_v30  ;;  %v267_v42 = vsel %vm264_vm1, %v265_v35, %v266_v36  ;;  %vm315_vm5 = vmand %vm313_vm3, %vm314_vm4 }
  0x18   : > { %v286_v44 = vsel %vm283_vm2, %v284_v39, %v285_v40 }
  0x19   : > { %v235_v41 = vadd.f32 %v233_v33, %v225_v37 }
  0x1b   : > { %v254_v43 = vadd.f32 %v252_v38, %v235_v41 }
  0x1d   : > { %v269_v45 = vadd.f32 %v267_v42, %v254_v43 }
  0x1f   : > { %v288_v47 = vadd.f32 %v286_v44, %v269_v45 }
  0x21   : > { %v296_v49 = vmul.f32 %v387_v46, %v288_v47 }
  0x23   : > { %v304_v50 = vadd.f32 %v388_v48, %v296_v49 }
  0x25   : > { %v305_v51 = vsub.f32 0.0, %v304_v50 }
  0x27   : > { %v306_v52 = vmul.f32 1.442695, %v305_v51 }
  0x29   : > { %400 = vpow2.f32 %v306_v52 }
  0x36   : > { %v401_v53 = vpop.eup %400 }
  0x37   : > { %v308_v54 = vadd.f32 1.0, %v401_v53 }
  0x39   : > { %402 = vrcp.f32 %v308_v54 }
  0x46   : > { %v403_v55 = vpop.eup %402 }
  0x47   : > { %v311_v56 = vmul.f32 %v403_v55, %v304_v50 }
  0x49   : > { %v312_v58 = vpack.c.bf16 %v311_v56, %v311_v56 }
  0x4b   : > { %v317_v59 = vsel %vm315_vm5, %v312_v58, %v316_v57 }
  0x4c   : > { %318 = vst [vmem:[%s195_s18] sm:$0x7] %v317_v59 }
  0x4d PF: > { %s14_s15 = sadd.s32 1, %s410_s15  }
  0x4e   : > { %p11_p4 = scmp.ge.s32.totalorder %s14_s15, 4  }
  0x50   :  { %13 = sbr.rel (!%p11_p4) target bundleno = 1 (0x1), region = 66 }

// kernel: conformer_encoder.38
= control target key start
LH: loop header
LB: loop body
LE: loop exit
PB: predicated region body
PF: predicated region fallthrough
CT: control target
= control target key end

     0   :  { %vm28_vm0 = vcmask 261120   ;;  %v297_v0 = vmov 0.0   ;;  %vm298_vm1 = vmmov 0   ;;  %vm226_vm2 = vcmask 257024   ;;  %s387_s1 = inlined_call_operand.vmem [shape: bf16[128,32], index: 1, kind: input, shape index: {}]   ;;  %s388_s0 = inlined_call_operand.vmem [shape: bf16[16,128], index: 0, kind: input, shape index: {}]   ;;  %s389_s2 = inlined_call_operand.vmem [shape: f32[1,32], index: 2, kind: input, shape index: {}]   ;;  %s390_s3 = inlined_call_operand.vmem [shape: bf16[16,32], index: 3, kind: input, shape index: {}]   ;;  %s391_s4 = inlined_call_operand.vmem [shape: f32[1,32], index: 4, kind: input, shape index: {}]   ;;  %s392_s5 = inlined_call_operand.vmem [shape: f32[1,32], index: 5, kind: input, shape index: {}]   ;;  %s393_s6 = inlined_call_operand.vmem [shape: bf16[16,32], index: 6, kind: output, shape index: {}]  }
   0x1   :  { %262 = vmatprep.subr.bf16.mxu0 %v297_v0  ;;  %v284_v1 = vld [vmem:[%s387_s1 + $0x38] sm:$0xff]   ;;  %278 = vmatprep.mubr.msk.bf16.mxu0 %vm298_vm1, %v297_v0  ;;  %29 = vst.msk [vmem:[#allocation2] sm:$0xff] %vm28_vm0, %v297_v0  ;;  %30 = vst.msk [vmem:[#allocation2 + $0x8] sm:$0xff] %vm28_vm0, %v297_v0  ;;  %v285_v2 = vld [vmem:[%s387_s1 + $0x30] sm:$0xff]  }
   0x2   :  { %263 = vmatpush3.bf16.msra.mxu0 %v284_v1  ;;  %v286_v3 = vld [vmem:[%s387_s1 + $0x28] sm:$0xff]   ;;  %v287_v4 = vld [vmem:[%s387_s1 + $0x20] sm:$0xff]   ;;  %v288_v5 = vld [vmem:[%s387_s1 + $0x18] sm:$0xff]  }
   0x3   :  { %264 = vmatprep.subr.bf16.mxu0 %v297_v0  ;;  %v289_v6 = vld [vmem:[%s387_s1 + $0x10] sm:$0xff]   ;;  %v290_v7 = vld [vmem:[%s387_s1 + $0x8] sm:$0xff]   ;;  %v291_v8 = vld [vmem:[%s387_s1] sm:$0xff]  }
   0x4   :  { %v292_v9 = vld [vmem:[%s388_s0] sm:$0xff]  }
   0x5   :  { %v242_v18 = vld [vmem:[%s389_s2] ss:$0 sm:$0xff] }
   0x6   :  { %265 = vmatpush3.bf16.msra.mxu0 %v285_v2  ;;  %v250_v19 = vld [vmem:[%s390_s3] sm:$0xff]  }
   0x7   :  { %266 = vmatprep.subr.bf16.mxu0 %v297_v0  ;;  %v251_v22 = vunpack.c.l.bf16 %v250_v19  ;;  %v252_v27 = vunpack.c.h.bf16 %v250_v19  ;;  %v243_v49 = vld [vmem:[%s391_s4] ss:$0 sm:$0xff] }
   0x8   :  { %v33_v10 = vld [vmem:[#allocation2] sm:$0xff]  ;;  %v34_v14 = vld [vmem:[#allocation2 + $0x8] sm:$0xff] }
   0x9   :  { %v244_v51 = vld [vmem:[%s392_s5] ss:$0 sm:$0xff] }
   0xa   :  { %267 = vmatpush3.bf16.msra.mxu0 %v286_v3 }
   0xb   :  { %268 = vmatprep.subr.bf16.mxu0 %v297_v0 }
   0xe   :  { %269 = vmatpush3.bf16.msra.mxu0 %v287_v4 }
   0xf   :  { %270 = vmatprep.subr.bf16.mxu0 %v297_v0 }
  0x12   :  { %271 = vmatpush3.bf16.msra.mxu0 %v288_v5 }
  0x13   :  { %272 = vmatprep.subr.bf16.mxu0 %v297_v0 }
  0x16   :  { %273 = vmatpush3.bf16.msra.mxu0 %v289_v6 }
  0x17   :  { %274 = vmatprep.subr.bf16.mxu0 %v297_v0 }
  0x1a   :  { %275 = vmatpush3.bf16.msra.mxu0 %v290_v7 }
  0x1b   :  { %276 = vmatprep.subr.bf16.mxu0 %v297_v0 }
  0x1e   :  { %277 = vmatpush3.bf16.msra.mxu0 %v291_v8 }
  0x21   :  { %279 = vmatmul.mubr.bf16.vlgmr.msra.gmra.mxu0 %v292_v9 }
  0xe1   :  { %v139_v11 = vpop.f32.mrf.mxu0 }
  0xe2   :  { %v146_v12 = vadd.f32 %v139_v11, %v33_v10 }
  0xe3   :  { %v280_v13 = vpop.f32.mrf.mxu0 }
  0xe4   :  { %149 = vst.msk [vmem:[#allocation2] sm:$0xff] %vm28_vm0, %v146_v12 }
  0xe5   :  { %v142_v15 = vpop.f32.mrf.mxu0 }
  0xe6   :  { %v147_v16 = vadd.f32 %v142_v15, %v34_v14 }
  0xe7   :  { %v281_v17 = vpop.f32.mrf.mxu0 }
  0xe8   :  { %150 = vst.msk [vmem:[#allocation2 + $0x8] sm:$0xff] %vm28_vm0, %v147_v16 }
  0xeb   :  { %v154_v20 = vld [vmem:[#allocation2] sm:$0xff] }
  0xec   :  { %v163_v21 = vadd.f32 %v242_v18, %v154_v20 }
  0xee   :  { %v169_v23 = vmul.f32 0.5, %v163_v21 }
  0xef   :  { %v155_v24 = vld [vmem:[#allocation2 + $0x8] sm:$0xff] }
  0xf0   :  { %v171_v25 = vadd.f32 %v251_v22, %v169_v23  ;;  %v164_v26 = vadd.f32 %v242_v18, %v155_v24 }
  0xf2   :  { %v175_v28 = vsel %vm28_vm0, %v171_v25, 0.0  ;;  %v170_v29 = vmul.f32 0.5, %v164_v26 }
  0xf3   :  { %176 = vadd.xlane.f32.xlu0 %v175_v28 }
  0xf4   :  { %v172_v30 = vadd.f32 %v252_v27, %v170_v29 }
  0xf6   :  { %v178_v31 = vsel %vm28_vm0, %v172_v30, 0.0 }
  0xf7   :  { %179 = vadd.xlane.f32.xlu0 %v178_v31 }
 0x17c   :  { %v177_v32 = vpop.xlane.xlu0 %176 }
 0x17d   :  { %v182_v33 = vmul.f32 0.03125, %v177_v32 }
 0x17f   :  { %v184_v34 = vsub.f32 %v171_v25, %v182_v33 }
 0x180   :  { %v180_v35 = vpop.xlane.xlu0 %179 }
 0x181   :  { %v183_v36 = vmul.f32 0.03125, %v180_v35  ;;  %v186_v37 = vmul.f32 %v184_v34, %v184_v34 }
 0x183   :  { %v185_v38 = vsub.f32 %v172_v30, %v183_v36  ;;  %v188_v39 = vsel %vm28_vm0, %v186_v37, 0.0 }
 0x184   :  { %189 = vadd.xlane.f32.xlu1 %v188_v39 }
 0x185   :  { %v187_v40 = vmul.f32 %v185_v38, %v185_v38 }
 0x187   :  { %v191_v41 = vsel %vm28_vm0, %v187_v40, 0.0 }
 0x188   :  { %192 = vadd.xlane.f32.xlu1 %v191_v41 }
 0x20d   :  { %v190_v42 = vpop.xlane.xlu1 %189 }
 0x20e   :  { %v194_v43 = vmul.f32 0.03125, %v190_v42 }
 0x210   :  { %v196_v44 = vadd.f32 1e-05, %v194_v43 }
 0x211   :  { %v193_v45 = vpop.xlane.xlu1 %192 }
 0x212   :  { %293 = vrsqrt.f32 %v196_v44  ;;  %v195_v46 = vmul.f32 0.03125, %v193_v45 }
 0x214   :  { %v197_v47 = vadd.f32 1e-05, %v195_v46 }
 0x216   :  { %295 = vrsqrt.f32 %v197_v47 }
 0x21f   :  { %v294_v48 = vpop.eup %293 }
 0x220   :  { %v200_v50 = vmul.f32 %v294_v48, %v184_v34 }
 0x222   :  { %v208_v52 = vmul.f32 %v243_v49, %v200_v50 }
 0x223   :  { %v296_v53 = vpop.eup %295 }
 0x224   :  { %v216_v54 = vadd.f32 %v244_v51, %v208_v52  ;;  %v201_v55 = vmul.f32 %v296_v53, %v185_v38 }
 0x226   :  { %v247_v56 = vpack.c.bf16 %v216_v54, %v216_v54  ;;  %v209_v57 = vmul.f32 %v243_v49, %v201_v55 }
 0x228   :  { %227 = vst.msk [vmem:[%s393_s6] sm:$0xf] %vm226_vm2, %v247_v56  ;;  %v217_v58 = vadd.f32 %v244_v51, %v209_v57 }
 0x22a   :  { %v248_v59 = vpack.c.bf16 %v217_v58, %v217_v58 }
 0x22c   :  { %228 = vst.msk [vmem:[%s393_s6 + $0x4] sm:$0xf] %vm226_vm2, %v248_v59 }

</bundles_post_ra>
